<compile_context>
chip_gen: v6e
topology: v6e:2x2x1
jax: 0.10.0
libtpu: 0.0.40
codegen_flags: <defaults>
</compile_context>

<pallas_src>
import functools

import jax
import jax.numpy as jnp
from jax import lax
from jax.experimental import pallas as pl
from jax.experimental.pallas import tpu as pltpu

LANE = 128


def _round_up(x, m):
    return (x + m - 1) // m * m


def _vmem_limit_bytes():
    cap = 128 * 1024 * 1024
    try:
        info = pltpu.get_tpu_info()
        cap = int(getattr(info, "vmem_capacity_bytes", cap))
    except Exception:
        pass
    # Leave half of physical VMEM as headroom, never below the 32 MiB default.
    return int(max(32 * 1024 * 1024, min(cap // 2, 96 * 1024 * 1024)))


def _pick_row_tile(H, W):
    """Output-row tile: smallest divisor of H with >= 512 matmul rows, capped."""
    divs = [d for d in range(1, H + 1) if H % d == 0]
    th = next((d for d in divs if d * W >= 512), H)
    while th * W > 8192 and th > divs[0]:
        th = max(d for d in divs if d < th)
    return th


def _stem_conv_kernel(x_ref, w_ref, b_ref, o_ref, *, TH, W, WP, CP, use_roll):
    # x_ref: (H+2, WP, CP)   zero-padded, lane-padded image (resident per batch)
    # w_ref: (3, 3*CP, COP)  gamma-folded weights; kx-major, (ky, ci) fused as K
    # b_ref: (1, COP)
    # o_ref: (TH, W, COP)
    cop = o_ref.shape[-1]
    h = pl.program_id(1)
    row0 = pl.multiple_of(h * TH, TH)

    # ky fusion: concat the three row-shifted views along lanes -> K = 3*CP.
    # Row slices are leading-dim offsets (cheap); the concat builds one buffer.
    parts = [x_ref[pl.ds(row0 + ky, TH)] for ky in range(3)]     # 3 x (TH, WP, CP)
    xky = jnp.concatenate(parts, axis=-1)                        # (TH, WP, 3*CP)

    # Bias-initialized accumulator (TH*W, COP), f32.
    acc = jnp.broadcast_to(b_ref[...].astype(jnp.float32), (TH * W, cop))

    # kx (width) shift: pltpu.roll on the sublane axis (XLU), then an aligned
    # [:W] slice; three K=3*CP tap matmuls per tile instead of nine K=CP ones.
    for kx in range(3):
        if kx == 0:
            cols = xky[:, :W, :]
        elif use_roll:
            cols = pltpu.roll(xky, shift=WP - kx, axis=1)[:, :W, :]
        else:
            cols = xky[:, kx:kx + W, :]
        patch = cols.reshape(TH * W, 3 * CP)
        acc = acc + jnp.dot(patch, w_ref[kx],
                            preferred_element_type=jnp.float32)

    o_ref[...] = acc.reshape(TH, W, cop).astype(o_ref.dtype)


def momentum_net_stem_conv(x_nchw, weight, bias, gamma, *,
                           compute_dtype=None, use_roll=True):
    """out = Conv2d(x * gamma), 3x3, stride 1, padding 1 (PyTorch layouts).

    x_nchw : (N, C, H, W)
    weight : (Cout, Cin, 3, 3)
    bias   : (Cout,)
    gamma  : scalar (python float or traced; folded into weights, no recompile)
    """
    N, C, H, W = x_nchw.shape
    cout = weight.shape[0]

    CP = _round_up(C, LANE)        # lane-dense input channels
    COP = _round_up(cout, LANE)    # lane-dense output channels -> unmasked stores
    WP = _round_up(W + 2, 8)       # sublane-friendly padded width (roll-safe)
    dtype = compute_dtype if compute_dtype is not None else x_nchw.dtype

    TH = _pick_row_tile(H, W)      # output-row tile (whole image for small H*W)
    HB = H // TH

    # NCHW -> NHWC, spatial halo pad + width pad to WP + channel pad to CP.
    x_nhwc = jnp.transpose(x_nchw, (0, 2, 3, 1)).astype(dtype)
    x_pad = jnp.pad(x_nhwc,
                    ((0, 0), (1, 1), (1, WP - W - 1), (0, CP - C)))
    # Shape: (N, H+2, WP, CP).  No halo pre-slab / jnp.stack copy.

    # (Cout, Cin, 3, 3) -> (kx, ky*CP + ci, co); gamma folded into weights.
    w_hwio = jnp.transpose(weight, (2, 3, 1, 0)) * gamma          # (ky, kx, Ci, Co)
    w_pad = jnp.pad(w_hwio, ((0, 0), (0, 0), (0, CP - C), (0, COP - cout)))
    w_fused = jnp.transpose(w_pad, (1, 0, 2, 3)).reshape(3, 3 * CP, COP)
    w_fused = w_fused.astype(dtype)
    b_pad = jnp.pad(bias, (0, COP - cout)).reshape(1, COP).astype(jnp.float32)

    kernel = functools.partial(_stem_conv_kernel, TH=TH, W=W, WP=WP, CP=CP,
                               use_roll=use_roll)

    out = pl.pallas_call(
        kernel,
        out_shape=jax.ShapeDtypeStruct((N, H, W, COP), x_nchw.dtype),
        grid=(N, HB),
        in_specs=[
            # Full padded image per batch element; block index depends only on
            # n, so it stays resident in VMEM across the row-tile axis.
            pl.BlockSpec((None, H + 2, WP, CP), lambda n, h: (n, 0, 0, 0)),
            pl.BlockSpec((3, 3 * CP, COP), lambda n, h: (0, 0, 0)),
            pl.BlockSpec((1, COP), lambda n, h: (0, 0)),
        ],
        out_specs=pl.BlockSpec((None, TH, W, COP), lambda n, h: (n, h, 0, 0)),
        compiler_params=pltpu.CompilerParams(
            dimension_semantics=("parallel", "arbitrary"),
            vmem_limit_bytes=_vmem_limit_bytes(),
        ),
    )(x_pad, w_fused, b_pad)

    # (N, H, W, COP) -> (N, Cout, H, W).  Kept NCHW to match the PyTorch module;
    # return out[..., :cout] directly if the consumer accepts NHWC.
    out_nhwc = out[..., :cout]
    return jnp.transpose(out_nhwc, (0, 3, 1, 2))


def _reference(x_nchw, weight, bias, gamma):
    # Pure-JAX reference: MomentumNetStem forward with a Conv2d wrapped module.
    y = lax.conv_general_dilated(
        x_nchw * gamma,
        weight,
        window_strides=(1, 1),
        padding=((1, 1), (1, 1)),
        dimension_numbers=("NCHW", "OIHW", "NCHW"),
    )
    return y + bias.reshape(1, -1, 1, 1)


if __name__ == "__main__":
    key = jax.random.PRNGKey(0)
    k_x, k_w, k_b = jax.random.split(key, 3)

    N, C, H, W = 2, 4, 16, 16
    gamma = 0.5  # MomentumNetStem gamma (constant scale)

    x = jax.random.normal(k_x, (N, C, H, W), dtype=jnp.float32)
    weight = jax.random.normal(k_w, (C, C, 3, 3), dtype=jnp.float32) * 0.1
    bias = jax.random.normal(k_b, (C,), dtype=jnp.float32) * 0.1

    def run(use_roll):
        fn = jax.jit(functools.partial(momentum_net_stem_conv,
                                       gamma=gamma, use_roll=use_roll))
        return jax.block_until_ready(fn(x, weight, bias))

    try:
        out = run(True)
    except Exception:
        # TODO(synk): pltpu.roll on the sublane axis may not lower on some
        # toolchains; the sliced-column path is the functional fallback.
        out = run(False)

    ref = jax.block_until_ready(_reference(x, weight, bias, gamma))
    assert out.shape == ref.shape == (N, C, H, W)
    assert jnp.allclose(out, ref, atol=1e-3, rtol=1e-3), "mismatch vs reference"

    print("KERNEL_OK")
</pallas_src>

<mosaic_0001>
module attributes {stable_mosaic.version = 11 : i64} {
  func.func @_stem_conv_kernel(%arg0: i32, %arg1: i32, %arg2: memref<1x18x24x128xf32, #tpu.memory_space<vmem>>, %arg3: memref<3x384x128xf32, #tpu.memory_space<vmem>>, %arg4: memref<1x128xf32, #tpu.memory_space<vmem>>, %arg5: memref<1x16x16x128xf32, #tpu.memory_space<vmem>>) attributes {dimension_semantics = [#tpu.dimension_semantics<parallel>, #tpu.dimension_semantics<arbitrary>], iteration_bounds = array<i64: 2, 1>, scalar_prefetch = 0 : i64, scratch_operands = 0 : i64, tpu.core_type = #tpu.core_type<tc>, window_params = [{transform_indices = @transform_0, window_bounds = array<i64: 1, 18, 24, 128>}, {pipeline_mode = #tpu.pipeline_mode<synchronous>, transform_indices = @transform_1, window_bounds = array<i64: 3, 384, 128>}, {pipeline_mode = #tpu.pipeline_mode<synchronous>, transform_indices = @transform_2, window_bounds = array<i64: 1, 128>}, {transform_indices = @transform_3, window_bounds = array<i64: 1, 16, 16, 128>}]} {
    %c16_i32 = arith.constant 16 : i32
    %0 = arith.muli %arg1, %c16_i32 : i32
    %1 = tpu.assume_multiple %0, 16 : i32
    %c0_i32 = arith.constant 0 : i32
    %2 = arith.addi %1, %c0_i32 : i32
    %c0 = arith.constant 0 : index
    %3 = arith.index_cast %2 : i32 to index
    %c0_0 = arith.constant 0 : index
    %c0_1 = arith.constant 0 : index
    %4 = vector.load %arg2[%c0, %3, %c0_0, %c0_1] : memref<1x18x24x128xf32, #tpu.memory_space<vmem>>, vector<1x16x24x128xf32>
    %5 = vector.shape_cast %4 : vector<1x16x24x128xf32> to vector<16x24x128xf32>
    %c1_i32 = arith.constant 1 : i32
    %6 = arith.addi %1, %c1_i32 : i32
    %c0_2 = arith.constant 0 : index
    %7 = arith.index_cast %6 : i32 to index
    %c0_3 = arith.constant 0 : index
    %c0_4 = arith.constant 0 : index
    %8 = vector.load %arg2[%c0_2, %7, %c0_3, %c0_4] : memref<1x18x24x128xf32, #tpu.memory_space<vmem>>, vector<1x16x24x128xf32>
    %9 = vector.shape_cast %8 : vector<1x16x24x128xf32> to vector<16x24x128xf32>
    %c2_i32 = arith.constant 2 : i32
    %10 = arith.addi %1, %c2_i32 : i32
    %c0_5 = arith.constant 0 : index
    %11 = arith.index_cast %10 : i32 to index
    %c0_6 = arith.constant 0 : index
    %c0_7 = arith.constant 0 : index
    %12 = vector.load %arg2[%c0_5, %11, %c0_6, %c0_7] : memref<1x18x24x128xf32, #tpu.memory_space<vmem>>, vector<1x16x24x128xf32>
    %13 = vector.shape_cast %12 : vector<1x16x24x128xf32> to vector<16x24x128xf32>
    %14 = tpu.concatenate %5, %9, %13 in 2 : vector<16x24x128xf32>, vector<16x24x128xf32>, vector<16x24x128xf32> -> vector<16x24x384xf32>
    %c0_8 = arith.constant 0 : index
    %c0_9 = arith.constant 0 : index
    %15 = vector.load %arg4[%c0_8, %c0_9] : memref<1x128xf32, #tpu.memory_space<vmem>>, vector<1x128xf32>
    %16 = vector.shape_cast %15 : vector<1x128xf32> to vector<1x128xf32>
    %17 = vector.broadcast %16 : vector<1x128xf32> to vector<256x128xf32>
    %18 = vector.extract_strided_slice %14 {offsets = [0, 0, 0], sizes = [16, 16, 384], strides = [1, 1, 1]} : vector<16x24x384xf32> to vector<16x16x384xf32>
    %19 = vector.shape_cast %18 : vector<16x16x384xf32> to vector<256x384xf32>
    %c0_10 = arith.constant 0 : index
    %c0_11 = arith.constant 0 : index
    %c0_12 = arith.constant 0 : index
    %20 = vector.load %arg3[%c0_10, %c0_11, %c0_12] : memref<3x384x128xf32, #tpu.memory_space<vmem>>, vector<1x384x128xf32>
    %21 = vector.shape_cast %20 : vector<1x384x128xf32> to vector<384x128xf32>
    %cst = arith.constant dense<0.000000e+00> : vector<256x128xf32>
    %22 = tpu.matmul %19, %21, %cst {dimension_numbers = #tpu.dot_dimension_numbers<[1], [0], [0], [1], [0, 0, 1, 1], [], []>} : vector<256x384xf32>, vector<384x128xf32>, vector<256x128xf32> -> vector<256x128xf32>
    %23 = arith.addf %17, %22 : vector<256x128xf32>
    %c23_i32 = arith.constant 23 : i32
    %24 = tpu.dynamic_rotate %14 by %c23_i32 dim 1 : vector<16x24x384xf32>, i32 -> vector<16x24x384xf32>
    %25 = vector.extract_strided_slice %24 {offsets = [0, 0, 0], sizes = [16, 16, 384], strides = [1, 1, 1]} : vector<16x24x384xf32> to vector<16x16x384xf32>
    %26 = vector.shape_cast %25 : vector<16x16x384xf32> to vector<256x384xf32>
    %c1 = arith.constant 1 : index
    %c0_13 = arith.constant 0 : index
    %c0_14 = arith.constant 0 : index
    %27 = vector.load %arg3[%c1, %c0_13, %c0_14] : memref<3x384x128xf32, #tpu.memory_space<vmem>>, vector<1x384x128xf32>
    %28 = vector.shape_cast %27 : vector<1x384x128xf32> to vector<384x128xf32>
    %cst_15 = arith.constant dense<0.000000e+00> : vector<256x128xf32>
    %29 = tpu.matmul %26, %28, %cst_15 {dimension_numbers = #tpu.dot_dimension_numbers<[1], [0], [0], [1], [0, 0, 1, 1], [], []>} : vector<256x384xf32>, vector<384x128xf32>, vector<256x128xf32> -> vector<256x128xf32>
    %30 = arith.addf %23, %29 : vector<256x128xf32>
    %c22_i32 = arith.constant 22 : i32
    %31 = tpu.dynamic_rotate %14 by %c22_i32 dim 1 : vector<16x24x384xf32>, i32 -> vector<16x24x384xf32>
    %32 = vector.extract_strided_slice %31 {offsets = [0, 0, 0], sizes = [16, 16, 384], strides = [1, 1, 1]} : vector<16x24x384xf32> to vector<16x16x384xf32>
    %33 = vector.shape_cast %32 : vector<16x16x384xf32> to vector<256x384xf32>
    %c2 = arith.constant 2 : index
    %c0_16 = arith.constant 0 : index
    %c0_17 = arith.constant 0 : index
    %34 = vector.load %arg3[%c2, %c0_16, %c0_17] : memref<3x384x128xf32, #tpu.memory_space<vmem>>, vector<1x384x128xf32>
    %35 = vector.shape_cast %34 : vector<1x384x128xf32> to vector<384x128xf32>
    %cst_18 = arith.constant dense<0.000000e+00> : vector<256x128xf32>
    %36 = tpu.matmul %33, %35, %cst_18 {dimension_numbers = #tpu.dot_dimension_numbers<[1], [0], [0], [1], [0, 0, 1, 1], [], []>} : vector<256x384xf32>, vector<384x128xf32>, vector<256x128xf32> -> vector<256x128xf32>
    %37 = arith.addf %30, %36 : vector<256x128xf32>
    %38 = vector.shape_cast %37 : vector<256x128xf32> to vector<16x16x128xf32>
    %c0_19 = arith.constant 0 : index
    %c0_20 = arith.constant 0 : index
    %c0_21 = arith.constant 0 : index
    %c0_22 = arith.constant 0 : index
    %39 = vector.load %arg5[%c0_19, %c0_20, %c0_21, %c0_22] : memref<1x16x16x128xf32, #tpu.memory_space<vmem>>, vector<1x16x16x128xf32>
    %40 = vector.shape_cast %39 : vector<1x16x16x128xf32> to vector<16x16x128xf32>
    %41 = vector.shape_cast %38 : vector<16x16x128xf32> to vector<1x16x16x128xf32>
    tpu.vector_store %arg5[%c0_19, %c0_20, %c0_21, %c0_22], %41 {strides = array<i32>} : memref<1x16x16x128xf32, #tpu.memory_space<vmem>>, vector<1x16x16x128xf32>,
    return
  }
  func.func @transform_0(%arg0: i32, %arg1: i32) -> (i32, i32, i32, i32) {
    %c0_i32 = arith.constant 0 : i32
    %c0_i32_0 = arith.constant 0 : i32
    %c0_i32_1 = arith.constant 0 : i32
    %c0_i32_2 = arith.constant 0 : i32
    return %arg0, %c0_i32, %c0_i32_0, %c0_i32_1 : i32, i32, i32, i32
  }
  func.func @transform_1(%arg0: i32, %arg1: i32) -> (i32, i32, i32) {
    %c0_i32 = arith.constant 0 : i32
    %c0_i32_0 = arith.constant 0 : i32
    %c0_i32_1 = arith.constant 0 : i32
    %c0_i32_2 = arith.constant 0 : i32
    return %c0_i32, %c0_i32_0, %c0_i32_1 : i32, i32, i32
  }
  func.func @transform_2(%arg0: i32, %arg1: i32) -> (i32, i32) {
    %c0_i32 = arith.constant 0 : i32
    %c0_i32_0 = arith.constant 0 : i32
    %c0_i32_1 = arith.constant 0 : i32
    return %c0_i32, %c0_i32_0 : i32, i32
  }
  func.func @transform_3(%arg0: i32, %arg1: i32) -> (i32, i32, i32, i32) {
    %c0_i32 = arith.constant 0 : i32
    %c0_i32_0 = arith.constant 0 : i32
    %c0_i32_1 = arith.constant 0 : i32
    return %arg0, %arg1, %c0_i32, %c0_i32_0 : i32, i32, i32, i32
  }
}

module attributes {stable_mosaic.version = 11 : i64} {
  func.func @_stem_conv_kernel(%arg0: i32, %arg1: i32, %arg2: memref<1x18x24x128xf32, #tpu.memory_space<vmem>>, %arg3: memref<3x384x128xf32, #tpu.memory_space<vmem>>, %arg4: memref<1x128xf32, #tpu.memory_space<vmem>>, %arg5: memref<1x16x16x128xf32, #tpu.memory_space<vmem>>) attributes {dimension_semantics = [#tpu.dimension_semantics<parallel>, #tpu.dimension_semantics<arbitrary>], iteration_bounds = array<i64: 2, 1>, scalar_prefetch = 0 : i64, scratch_operands = 0 : i64, tpu.core_type = #tpu.core_type<tc>, window_params = [{transform_indices = @transform_0, window_bounds = array<i64: 1, 18, 24, 128>}, {pipeline_mode = #tpu.pipeline_mode<synchronous>, transform_indices = @transform_1, window_bounds = array<i64: 3, 384, 128>}, {pipeline_mode = #tpu.pipeline_mode<synchronous>, transform_indices = @transform_2, window_bounds = array<i64: 1, 128>}, {transform_indices = @transform_3, window_bounds = array<i64: 1, 16, 16, 128>}]} {
    %c16_i32 = arith.constant 16 : i32
    %0 = arith.muli %arg1, %c16_i32 : i32
    %1 = tpu.assume_multiple %0, 16 : i32
    %c0_i32 = arith.constant 0 : i32
    %2 = arith.addi %1, %c0_i32 : i32
    %c0 = arith.constant 0 : index
    %3 = arith.index_cast %2 : i32 to index
    %c0_0 = arith.constant 0 : index
    %c0_1 = arith.constant 0 : index
    %4 = vector.load %arg2[%c0, %3, %c0_0, %c0_1] : memref<1x18x24x128xf32, #tpu.memory_space<vmem>>, vector<1x16x24x128xf32>
    %5 = vector.shape_cast %4 : vector<1x16x24x128xf32> to vector<16x24x128xf32>
    %c1_i32 = arith.constant 1 : i32
    %6 = arith.addi %1, %c1_i32 : i32
    %c0_2 = arith.constant 0 : index
    %7 = arith.index_cast %6 : i32 to index
    %c0_3 = arith.constant 0 : index
    %c0_4 = arith.constant 0 : index
    %8 = vector.load %arg2[%c0_2, %7, %c0_3, %c0_4] : memref<1x18x24x128xf32, #tpu.memory_space<vmem>>, vector<1x16x24x128xf32>
    %9 = vector.shape_cast %8 : vector<1x16x24x128xf32> to vector<16x24x128xf32>
    %c2_i32 = arith.constant 2 : i32
    %10 = arith.addi %1, %c2_i32 : i32
    %c0_5 = arith.constant 0 : index
    %11 = arith.index_cast %10 : i32 to index
    %c0_6 = arith.constant 0 : index
    %c0_7 = arith.constant 0 : index
    %12 = vector.load %arg2[%c0_5, %11, %c0_6, %c0_7] : memref<1x18x24x128xf32, #tpu.memory_space<vmem>>, vector<1x16x24x128xf32>
    %13 = vector.shape_cast %12 : vector<1x16x24x128xf32> to vector<16x24x128xf32>
    %14 = tpu.concatenate %5, %9, %13 in 2 : vector<16x24x128xf32>, vector<16x24x128xf32>, vector<16x24x128xf32> -> vector<16x24x384xf32>
    %c0_8 = arith.constant 0 : index
    %c0_9 = arith.constant 0 : index
    %15 = vector.load %arg4[%c0_8, %c0_9] : memref<1x128xf32, #tpu.memory_space<vmem>>, vector<1x128xf32>
    %16 = vector.shape_cast %15 : vector<1x128xf32> to vector<1x128xf32>
    %17 = vector.broadcast %16 : vector<1x128xf32> to vector<256x128xf32>
    %18 = vector.extract_strided_slice %14 {offsets = [0, 0, 0], sizes = [16, 16, 384], strides = [1, 1, 1]} : vector<16x24x384xf32> to vector<16x16x384xf32>
    %19 = vector.shape_cast %18 : vector<16x16x384xf32> to vector<256x384xf32>
    %c0_10 = arith.constant 0 : index
    %c0_11 = arith.constant 0 : index
    %c0_12 = arith.constant 0 : index
    %20 = vector.load %arg3[%c0_10, %c0_11, %c0_12] : memref<3x384x128xf32, #tpu.memory_space<vmem>>, vector<1x384x128xf32>
    %21 = vector.shape_cast %20 : vector<1x384x128xf32> to vector<384x128xf32>
    %cst = arith.constant dense<0.000000e+00> : vector<256x128xf32>
    %22 = tpu.matmul %19, %21, %cst {dimension_numbers = #tpu.dot_dimension_numbers<[1], [0], [0], [1], [0, 0, 1, 1], [], []>} : vector<256x384xf32>, vector<384x128xf32>, vector<256x128xf32> -> vector<256x128xf32>
    %23 = arith.addf %17, %22 : vector<256x128xf32>
    %24 = vector.extract_strided_slice %14 {offsets = [0, 1, 0], sizes = [16, 16, 384], strides = [1, 1, 1]} : vector<16x24x384xf32> to vector<16x16x384xf32>
    %25 = vector.shape_cast %24 : vector<16x16x384xf32> to vector<256x384xf32>
    %c1 = arith.constant 1 : index
    %c0_13 = arith.constant 0 : index
    %c0_14 = arith.constant 0 : index
    %26 = vector.load %arg3[%c1, %c0_13, %c0_14] : memref<3x384x128xf32, #tpu.memory_space<vmem>>, vector<1x384x128xf32>
    %27 = vector.shape_cast %26 : vector<1x384x128xf32> to vector<384x128xf32>
    %cst_15 = arith.constant dense<0.000000e+00> : vector<256x128xf32>
    %28 = tpu.matmul %25, %27, %cst_15 {dimension_numbers = #tpu.dot_dimension_numbers<[1], [0], [0], [1], [0, 0, 1, 1], [], []>} : vector<256x384xf32>, vector<384x128xf32>, vector<256x128xf32> -> vector<256x128xf32>
    %29 = arith.addf %23, %28 : vector<256x128xf32>
    %30 = vector.extract_strided_slice %14 {offsets = [0, 2, 0], sizes = [16, 16, 384], strides = [1, 1, 1]} : vector<16x24x384xf32> to vector<16x16x384xf32>
    %31 = vector.shape_cast %30 : vector<16x16x384xf32> to vector<256x384xf32>
    %c2 = arith.constant 2 : index
    %c0_16 = arith.constant 0 : index
    %c0_17 = arith.constant 0 : index
    %32 = vector.load %arg3[%c2, %c0_16, %c0_17] : memref<3x384x128xf32, #tpu.memory_space<vmem>>, vector<1x384x128xf32>
    %33 = vector.shape_cast %32 : vector<1x384x128xf32> to vector<384x128xf32>
    %cst_18 = arith.constant dense<0.000000e+00> : vector<256x128xf32>
    %34 = tpu.matmul %31, %33, %cst_18 {dimension_numbers = #tpu.dot_dimension_numbers<[1], [0], [0], [1], [0, 0, 1, 1], [], []>} : vector<256x384xf32>, vector<384x128xf32>, vector<256x128xf32> -> vector<256x128xf32>
    %35 = arith.addf %29, %34 : vector<256x128xf32>
    %36 = vector.shape_cast %35 : vector<256x128xf32> to vector<16x16x128xf32>
    %c0_19 = arith.constant 0 : index
    %c0_20 = arith.constant 0 : index
    %c0_21 = arith.constant 0 : index
    %c0_22 = arith.constant 0 : index
    %37 = vector.load %arg5[%c0_19, %c0_20, %c0_21, %c0_22] : memref<1x16x16x128xf32, #tpu.memory_space<vmem>>, vector<1x16x16x128xf32>
    %38 = vector.shape_cast %37 : vector<1x16x16x128xf32> to vector<16x16x128xf32>
    %39 = vector.shape_cast %36 : vector<16x16x128xf32> to vector<1x16x16x128xf32>
    tpu.vector_store %arg5[%c0_19, %c0_20, %c0_21, %c0_22], %39 {strides = array<i32>} : memref<1x16x16x128xf32, #tpu.memory_space<vmem>>, vector<1x16x16x128xf32>,
    return
  }
  func.func @transform_0(%arg0: i32, %arg1: i32) -> (i32, i32, i32, i32) {
    %c0_i32 = arith.constant 0 : i32
    %c0_i32_0 = arith.constant 0 : i32
    %c0_i32_1 = arith.constant 0 : i32
    %c0_i32_2 = arith.constant 0 : i32
    return %arg0, %c0_i32, %c0_i32_0, %c0_i32_1 : i32, i32, i32, i32
  }
  func.func @transform_1(%arg0: i32, %arg1: i32) -> (i32, i32, i32) {
    %c0_i32 = arith.constant 0 : i32
    %c0_i32_0 = arith.constant 0 : i32
    %c0_i32_1 = arith.constant 0 : i32
    %c0_i32_2 = arith.constant 0 : i32
    return %c0_i32, %c0_i32_0, %c0_i32_1 : i32, i32, i32
  }
  func.func @transform_2(%arg0: i32, %arg1: i32) -> (i32, i32) {
    %c0_i32 = arith.constant 0 : i32
    %c0_i32_0 = arith.constant 0 : i32
    %c0_i32_1 = arith.constant 0 : i32
    return %c0_i32, %c0_i32_0 : i32, i32
  }
  func.func @transform_3(%arg0: i32, %arg1: i32) -> (i32, i32, i32, i32) {
    %c0_i32 = arith.constant 0 : i32
    %c0_i32_0 = arith.constant 0 : i32
    %c0_i32_1 = arith.constant 0 : i32
    return %arg0, %arg1, %c0_i32, %c0_i32_0 : i32, i32, i32, i32
  }
}

</mosaic_0001>

<bundles_post_ra>
// kernel: momentum_net_stem_conv.1
= control target key start
LH: loop header
LB: loop body
LE: loop exit
PB: predicated region body
PF: predicated region fallthrough
CT: control target
= control target key end

     0   :  { %s3250_s12 = smov 0   ;;  %s3252_s13 = smov 0   ;;  %s5111_s0 = inlined_call_operand.vmem [shape: f32[2,18,24,128], index: 0, kind: input, shape index: {}]   ;;  %s5112_s1 = inlined_call_operand.vmem [shape: f32[3,384,128], index: 1, kind: input, shape index: {}]   ;;  %s5113_s2 = inlined_call_operand.vmem [shape: f32[1,128], index: 2, kind: input, shape index: {}]   ;;  %s5114_s3 = inlined_call_operand.vmem [shape: f32[2,16,16,128], index: 3, kind: output, shape index: {}]  }
   0x1   :  { %s3254_s14 = smov 0  }
   0x2 LB: > { %s25_s15 = sadd.s32 1, %s3223_s13  ;;  %p2565_p0 = scmp.ge.s32.totalorder %s3227_s14, 1  ;;  %s3227_s14 = sphi %s3254_s14, %s13_s14   ;;  %s3223_s13 = sphi %s3252_s13, %s5200_s13   ;;  %s3219_s12 = sphi %s3250_s12, %s5199_s12  }
   0x3   : > { %p27_p1 = scmp.ge.s32.totalorder %s25_s15, 2  ;;  %p151_p2 = scmp.lt.s32.totalorder %s3227_s14, 3 }
   0x5   : > { %s5202_s15 = smov (%p27_p1, %s25_s15), 0  ;;  %p152_p3 = pnand %p2565_p0, %p151_p2 }
   0x7   : > { %155 = sbr.rel (%p152_p3) target bundleno = 569 (0x239), region = 32 }
   0xc   : > { %v403_v0 = vld [vmem:[%s5112_s1 + $0x178] sm:$0xff]  ;;  %v402_v2 = vld [vmem:[%s5112_s1 + $0x170] sm:$0xff]  ;;  %v3229_v3 = vmov 0.0   ;;  %v401_v5 = vld [vmem:[%s5112_s1 + $0x168] sm:$0xff]  ;;  %p180_p4 = scmp.lt.s32.totalorder %s3219_s12, 1 }
   0xd   : > { %v371_v1 = vld [vmem:[%s5112_s1 + $0x78] sm:$0xff]  ;;  %404 = vmatprep.subr.mxu0 %v3229_v3  ;;  %2909 = vmatprep.subr.mxu1 %v403_v0  ;;  %v370_v4 = vld [vmem:[%s5112_s1 + $0x70] sm:$0xff]  ;;  %v369_v6 = vld [vmem:[%s5112_s1 + $0x68] sm:$0xff] }
   0xe   : > { %405 = vmatpush1.msra.mxu0 %v371_v1  ;;  %2910 = vmatpush3.msra.mxu1 %v403_v0  ;;  %v400_v7 = vld [vmem:[%s5112_s1 + $0x160] sm:$0xff]  ;;  %v399_v9 = vld [vmem:[%s5112_s1 + $0x158] sm:$0xff]  ;;  %v398_v11 = vld [vmem:[%s5112_s1 + $0x150] sm:$0xff]  ;;  %s5204_s12 = smov (!%p180_p4, %s3219_s12), 1 }
   0xf   : > { %406 = vmatprep.subr.mxu0 %v3229_v3  ;;  %2911 = vmatprep.subr.mxu1 %v402_v2  ;;  %v368_v8 = vld [vmem:[%s5112_s1 + $0x60] sm:$0xff]  ;;  %v367_v10 = vld [vmem:[%s5112_s1 + $0x58] sm:$0xff]  ;;  %v366_v12 = vld [vmem:[%s5112_s1 + $0x50] sm:$0xff]  ;;  %s3149_s22 = smul.u32 432, %s5204_s12  ;;  %s2764_s20 = sshll.u32 %s5204_s12, 8 }
  0x10   : > { %407 = vmatpush1.msra.mxu0 %v370_v4  ;;  %2912 = vmatpush3.msra.mxu1 %v402_v2  ;;  %v397_v13 = vld [vmem:[%s5112_s1 + $0x148] sm:$0xff]  ;;  %v396_v15 = vld [vmem:[%s5112_s1 + $0x140] sm:$0xff]  ;;  %v395_v17 = vld [vmem:[%s5112_s1 + $0x138] sm:$0xff]  ;;  %s4992_s12 = scalar_lea.vmem %s5114_s3, %s2764_s20 }
  0x11   : > { %408 = vmatprep.subr.mxu0 %v3229_v3  ;;  %2913 = vmatprep.subr.mxu1 %v401_v5  ;;  %v365_v14 = vld [vmem:[%s5112_s1 + $0x48] sm:$0xff]  ;;  %v364_v16 = vld [vmem:[%s5112_s1 + $0x40] sm:$0xff]  ;;  %v363_v18 = vld [vmem:[%s5112_s1 + $0x38] sm:$0xff]  ;;  %s3382_s6 = scalar_lea.vmem %s5111_s0, %s3149_s22 }
  0x12   : > { %409 = vmatpush1.msra.mxu0 %v369_v6  ;;  %2914 = vmatpush3.msra.mxu1 %v401_v5  ;;  %v394_v19 = vld [vmem:[%s5112_s1 + $0x130] sm:$0xff]  ;;  %v393_v21 = vld [vmem:[%s5112_s1 + $0x128] sm:$0xff]  ;;  %v392_v23 = vld [vmem:[%s5112_s1 + $0x120] sm:$0xff] }
  0x13   : > { %410 = vmatprep.subr.mxu0 %v3229_v3  ;;  %2915 = vmatprep.subr.mxu1 %v400_v7  ;;  %v362_v20 = vld [vmem:[%s5112_s1 + $0x30] sm:$0xff]  ;;  %v361_v22 = vld [vmem:[%s5112_s1 + $0x28] sm:$0xff]  ;;  %v360_v24 = vld [vmem:[%s5112_s1 + $0x20] sm:$0xff] }
  0x14   : > { %411 = vmatpush1.msra.mxu0 %v368_v8  ;;  %2916 = vmatpush3.msra.mxu1 %v400_v7  ;;  %v391_v25 = vld [vmem:[%s5112_s1 + $0x118] sm:$0xff]  ;;  %v390_v27 = vld [vmem:[%s5112_s1 + $0x110] sm:$0xff]  ;;  %v389_v29 = vld [vmem:[%s5112_s1 + $0x108] sm:$0xff] }
  0x15   : > { %412 = vmatprep.subr.mxu0 %v3229_v3  ;;  %2917 = vmatprep.subr.mxu1 %v399_v9  ;;  %v359_v26 = vld [vmem:[%s5112_s1 + $0x18] sm:$0xff]  ;;  %v358_v28 = vld [vmem:[%s5112_s1 + $0x10] sm:$0xff]  ;;  %v357_v30 = vld [vmem:[%s5112_s1 + $0x8] sm:$0xff] }
  0x16   : > { %413 = vmatpush1.msra.mxu0 %v367_v10  ;;  %2918 = vmatpush3.msra.mxu1 %v399_v9  ;;  %v388_v31 = vld [vmem:[%s5112_s1 + $0x100] sm:$0xff]  ;;  %v3392_v33 = vld [vmem:[%s3382_s6 + $0x30] sm:$0xff]  ;;  %v3396_v34 = vld [vmem:[%s3382_s6 + $0x38] sm:$0xff]  ;;  %v1030_v10 = vlaneseq }
  0x17   : > { %414 = vmatprep.subr.mxu0 %v3229_v3  ;;  %2919 = vmatprep.subr.mxu1 %v398_v11  ;;  %v356_v32 = vld [vmem:[%s5112_s1] sm:$0xff]  ;;  %v387_v35 = vld [vmem:[%s5112_s1 + $0xf8] sm:$0xff]  ;;  %v386_v37 = vld [vmem:[%s5112_s1 + $0xf0] sm:$0xff] }
  0x18   : > { %415 = vmatpush1.msra.mxu0 %v366_v12  ;;  %2920 = vmatpush3.msra.mxu1 %v398_v11  ;;  %v2681_v36 = vld [vmem:[%s5112_s1 + $0x1f8] sm:$0xff]  ;;  %v3412_v38 = vld [vmem:[%s3382_s6 + $0x48] sm:$0xff]  ;;  %v2680_v39 = vld [vmem:[%s5112_s1 + $0x1f0] sm:$0xff] }
  0x19   : > { %416 = vmatprep.subr.mxu0 %v3229_v3  ;;  %2921 = vmatprep.subr.mxu1 %v397_v13  ;;  %v3420_v40 = vld [vmem:[%s3382_s6 + $0x50] sm:$0xff]  ;;  %v385_v41 = vld [vmem:[%s5112_s1 + $0xe8] sm:$0xff]  ;;  %v384_v43 = vld [vmem:[%s5112_s1 + $0xe0] sm:$0xff] }
  0x1a   : > { %417 = vmatpush1.msra.mxu0 %v365_v14  ;;  %2922 = vmatpush3.msra.mxu1 %v397_v13  ;;  %v2679_v42 = vld [vmem:[%s5112_s1 + $0x1e8] sm:$0xff]  ;;  %v3436_v44 = vld [vmem:[%s3382_s6 + $0x60] sm:$0xff]  ;;  %v383_v47 = vld [vmem:[%s5112_s1 + $0xd8] sm:$0xff] }
  0x1b   : > { %418 = vmatprep.subr.mxu0 %v3229_v3  ;;  %2923 = vmatprep.subr.mxu1 %v396_v15  ;;  %v2678_v45 = vld [vmem:[%s5112_s1 + $0x1e0] sm:$0xff]  ;;  %v3444_v46 = vld [vmem:[%s3382_s6 + $0x68] sm:$0xff]  ;;  %v2677_v48 = vld [vmem:[%s5112_s1 + $0x1d8] sm:$0xff] }
  0x1c   : > { %419 = vmatpush1.msra.mxu0 %v364_v16  ;;  %2924 = vmatpush3.msra.mxu1 %v396_v15  ;;  %v382_v49 = vld [vmem:[%s5112_s1 + $0xd0] sm:$0xff]  ;;  %v3460_v50 = vld [vmem:[%s3382_s6 + $0x78] sm:$0xff]  ;;  %v3468_v52 = vld [vmem:[%s3382_s6 + $0x80] sm:$0xff] }
  0x1d   : > { %420 = vmatprep.subr.mxu0 %v3229_v3  ;;  %2925 = vmatprep.subr.mxu1 %v395_v17  ;;  %v2676_v51 = vld [vmem:[%s5112_s1 + $0x1d0] sm:$0xff]  ;;  %v381_v53 = vld [vmem:[%s5112_s1 + $0xc8] sm:$0xff]  ;;  %v380_v55 = vld [vmem:[%s5112_s1 + $0xc0] sm:$0xff] }
  0x1e   : > { %421 = vmatpush1.msra.mxu0 %v363_v18  ;;  %2926 = vmatpush3.msra.mxu1 %v395_v17  ;;  %v2675_v54 = vld [vmem:[%s5112_s1 + $0x1c8] sm:$0xff]  ;;  %v3484_v56 = vld [vmem:[%s3382_s6 + $0x90] sm:$0xff]  ;;  %v2674_v57 = vld [vmem:[%s5112_s1 + $0x1c0] sm:$0xff]  ;;  %v3573_v17 = vshrl.u32 %v1030_v10, 7 }
  0x1f   : > { %422 = vmatprep.subr.mxu0 %v3229_v3  ;;  %2927 = vmatprep.subr.mxu1 %v394_v19  ;;  %v3492_v58 = vld [vmem:[%s3382_s6 + $0x98] sm:$0xff]  ;;  %v378_v61 = vld [vmem:[%s5112_s1 + $0xb0] sm:$0xff]  ;;  %v3508_v62 = vld [vmem:[%s3382_s6 + $0xa8] sm:$0xff] }
  0x20   : > { %423 = vmatpush1.msra.mxu0 %v362_v20  ;;  %2928 = vmatpush3.msra.mxu1 %v394_v19  ;;  %v379_v59 = vld [vmem:[%s5112_s1 + $0xb8] sm:$0xff]  ;;  %v2672_v63 = vld [vmem:[%s5112_s1 + $0x1b0] sm:$0xff]  ;;  %v377_v1 = vld [vmem:[%s5112_s1 + $0xa8] sm:$0xff]  ;;  %v888_v20 = vrot.slane %v3392_v33, 1  ;;  %vm1032_vm0 = vcmp.lt.s32.totalorder %v3573_v17, 7  ;;  %vm1804_vm1 = vcmp.lt.s32.totalorder %v3573_v17, 6 }
  0x21   : > { %424 = vmatprep.subr.mxu0 %v3229_v3  ;;  %2929 = vmatprep.subr.mxu1 %v393_v21  ;;  %v2673_v60 = vld [vmem:[%s5112_s1 + $0x1b8] sm:$0xff]  ;;  %v3516_v0 = vld [vmem:[%s3382_s6 + $0xb0] sm:$0xff]  ;;  %v2671_v2 = vld [vmem:[%s5112_s1 + $0x1a8] sm:$0xff] }
  0x22   : > { %425 = vmatpush1.msra.mxu0 %v361_v22  ;;  %2930 = vmatpush3.msra.mxu1 %v393_v21  ;;  %v376_v4 = vld [vmem:[%s5112_s1 + $0xa0] sm:$0xff]  ;;  %v3540_v7 = vld [vmem:[%s3382_s6 + $0xc8] sm:$0xff]  ;;  %v375_v8 = vld [vmem:[%s5112_s1 + $0x98] sm:$0xff]  ;;  %v936_v21 = vrot.slane %v3396_v34, 1 }
  0x23   : > { %426 = vmatprep.subr.mxu0 %v3229_v3  ;;  %2931 = vmatprep.subr.mxu1 %v392_v23  ;;  %v3532_v5 = vld [vmem:[%s3382_s6 + $0xc0] sm:$0xff]  ;;  %v2669_v9 = vld [vmem:[%s5112_s1 + $0x198] sm:$0xff]  ;;  %v374_v11 = vld [vmem:[%s5112_s1 + $0x90] sm:$0xff] }
  0x24   : > { %427 = vmatpush1.msra.mxu0 %v360_v24  ;;  %2932 = vmatpush3.msra.mxu1 %v392_v23  ;;  %v2670_v6 = vld [vmem:[%s5112_s1 + $0x1a0] sm:$0xff]  ;;  %v3556_v12 = vld [vmem:[%s3382_s6 + $0xd8] sm:$0xff]  ;;  %v2668_v13 = vld [vmem:[%s5112_s1 + $0x190] sm:$0xff]  ;;  %v906_v10 = vrot.slane %v3532_v5, 1 }
  0x25   : > { %428 = vmatprep.subr.mxu0 %v3229_v3  ;;  %2933 = vmatprep.subr.mxu1 %v391_v25  ;;  %v3564_v14 = vld [vmem:[%s3382_s6 + $0xe0] sm:$0xff]  ;;  %v373_v15 = vld [vmem:[%s5112_s1 + $0x88] sm:$0xff]  ;;  %v3582_v19 = vld [vmem:[%s3382_s6 + $0x18] sm:$0xff] }
  0x26   : > { %429 = vmatpush1.msra.mxu0 %v359_v26  ;;  %2934 = vmatpush3.msra.mxu1 %v391_v25  ;;  %v2667_v16 = vld [vmem:[%s5112_s1 + $0x188] sm:$0xff]  ;;  %v372_v18 = vld [vmem:[%s5112_s1 + $0x80] sm:$0xff]  ;;  %v3587_v22 = vld [vmem:[%s3382_s6 + $0xf0] sm:$0xff] }
  0x27   : > { %430 = vmatprep.subr.mxu0 %v3229_v3  ;;  %2935 = vmatprep.subr.mxu1 %v390_v27  ;;  %v2666_v23 = vld [vmem:[%s5112_s1 + $0x180] sm:$0xff]  ;;  %v3598_v25 = vld [vmem:[%s3382_s6 + $0xf8] sm:$0xff] }
  0x28   : > { %431 = vmatpush1.msra.mxu0 %v358_v28  ;;  %2936 = vmatpush3.msra.mxu1 %v390_v27  ;;  %v3595_v24 = vld [vmem:[%s3382_s6] sm:$0xff]  ;;  %v3609_v27 = vsel %vm1032_vm0, %v888_v20, %v936_v21  ;;  %v2697_v28 = vld [vmem:[%s5112_s1 + $0x278] sm:$0xff] }
  0x29   : > { %432 = vmatprep.subr.mxu0 %v3229_v3  ;;  %2937 = vmatprep.subr.mxu1 %v389_v29  ;;  %v3603_v26 = vld [vmem:[%s3382_s6 + $0x20] sm:$0xff]  ;;  %v2685_v20 = vld [vmem:[%s5112_s1 + $0x218] sm:$0xff] }
  0x2a   : > { %433 = vmatpush1.msra.mxu0 %v357_v30  ;;  %2938 = vmatpush3.msra.mxu1 %v389_v29  ;;  %v3616_v29 = vld [vmem:[%s3382_s6 + $0x108] sm:$0xff]  ;;  %v891_v30 = vrot.slane %v3412_v38, 1 }
  0x2b   : > { %434 = vmatprep.subr.mxu0 %v3229_v3  ;;  %2939 = vmatprep.subr.mxu1 %v388_v31 }
  0x2c   : > { %435 = vmatpush1.msra.mxu0 %v356_v32  ;;  %2940 = vmatpush3.msra.mxu1 %v388_v31  ;;  %v939_v31 = vrot.slane %v3420_v40, 1  ;;  %v3625_v32 = vld [vmem:[%s5112_s1 + $0x2f8] sm:$0xff] }
  0x2d   : > { %2941 = vmatprep.mubr.f32.mxu1 %v3392_v33  ;;  %436 = vmatprep.subr.mxu0 %v3229_v3 }
  0x2e   : > { %2942 = vmatmul.mubr.f32.vlgmr.msra.gmra.mxu1 %v3396_v34  ;;  %1178 = vmatprep.subr.mxu1 %v3229_v3 }
  0x2f   : > { %437 = vmatpush2.msra.mxu0 %v387_v35  ;;  %1179 = vmatpush1.msra.mxu1 %v2681_v36  ;;  %v2696_v35 = vld [vmem:[%s5112_s1 + $0x270] sm:$0xff]  ;;  %v3633_v36 = vld [vmem:[%s3382_s6 + $0x8] sm:$0xff] }
  0x30   : > { %438 = vmatprep.subr.mxu0 %v3229_v3  ;;  %1180 = vmatprep.subr.mxu1 %v3229_v3 }
  0x31   : > { %439 = vmatpush2.msra.mxu0 %v386_v37  ;;  %2944 = vmatprep.mubr.f32.mxu1 %v3412_v38  ;;  %v3637_v37 = vld [vmem:[%s3382_s6 + $0x110] sm:$0xff] }
  0x32   : > { %1181 = vmatpush1.msra.mxu1 %v2680_v39  ;;  %440 = vmatprep.subr.mxu0 %v3229_v3  ;;  %v3643_v39 = vsel %vm1032_vm0, %v891_v30, %v939_v31  ;;  %v3768_v30 = vld [vmem:[%s3382_s6 + $0x198] sm:$0xff] }
  0x33   : > { %2945 = vmatmul.mubr.f32.gmra.mxu1 %v3420_v40  ;;  %1182 = vmatprep.subr.mxu1 %v3229_v3 }
  0x34   : > { %441 = vmatpush2.msra.mxu0 %v385_v41  ;;  %1183 = vmatpush1.msra.mxu1 %v2679_v42  ;;  %v2695_v41 = vld [vmem:[%s5112_s1 + $0x268] sm:$0xff]  ;;  %v894_v42 = vrot.slane %v3436_v44, 1 }
  0x35   : > { %442 = vmatprep.subr.mxu0 %v3229_v3  ;;  %1184 = vmatprep.subr.mxu1 %v3229_v3 }
  0x36   : > { %443 = vmatpush2.msra.mxu0 %v384_v43  ;;  %2947 = vmatprep.mubr.f32.mxu1 %v3436_v44  ;;  %v942_v43 = vrot.slane %v3444_v46, 1 }
  0x37   : > { %1185 = vmatpush1.msra.mxu1 %v2678_v45  ;;  %444 = vmatprep.subr.mxu0 %v3229_v3  ;;  %v3654_v45 = vld [vmem:[%s3382_s6 + $0x120] sm:$0xff] }
  0x38   : > { %2948 = vmatmul.mubr.f32.gmra.mxu1 %v3444_v46  ;;  %1186 = vmatprep.subr.mxu1 %v3229_v3 }
  0x39   : > { %445 = vmatpush2.msra.mxu0 %v383_v47  ;;  %1187 = vmatpush1.msra.mxu1 %v2677_v48  ;;  %v2694_v47 = vld [vmem:[%s5112_s1 + $0x260] sm:$0xff]  ;;  %v3663_v48 = vld [vmem:[%s3382_s6 + $0x128] sm:$0xff] }
  0x3a   : > { %446 = vmatprep.subr.mxu0 %v3229_v3  ;;  %1188 = vmatprep.subr.mxu1 %v3229_v3 }
  0x3b   : > { %447 = vmatpush2.msra.mxu0 %v382_v49  ;;  %2950 = vmatprep.mubr.f32.mxu1 %v3460_v50  ;;  %v3669_v49 = vsel %vm1032_vm0, %v894_v42, %v942_v43  ;;  %v886_v42 = vrot.slane %v3595_v24, 1 }
  0x3c   : > { %1189 = vmatpush1.msra.mxu1 %v2676_v51  ;;  %448 = vmatprep.subr.mxu0 %v3229_v3  ;;  %v2693_v51 = vld [vmem:[%s5112_s1 + $0x258] sm:$0xff] }
  0x3d   : > { %2951 = vmatmul.mubr.f32.gmra.mxu1 %v3468_v52  ;;  %1190 = vmatprep.subr.mxu1 %v3229_v3 }
  0x3e   : > { %449 = vmatpush2.msra.mxu0 %v381_v53  ;;  %1191 = vmatpush1.msra.mxu1 %v2675_v54  ;;  %v897_v53 = vrot.slane %v3460_v50, 1  ;;  %v945_v54 = vrot.slane %v3468_v52, 1 }
  0x3f   : > { %450 = vmatprep.subr.mxu0 %v3229_v3  ;;  %1192 = vmatprep.subr.mxu1 %v3229_v3 }
  0x40   : > { %451 = vmatpush2.msra.mxu0 %v380_v55  ;;  %2953 = vmatprep.mubr.f32.mxu1 %v3484_v56  ;;  %v3680_v55 = vld [vmem:[%s3382_s6 + $0x138] sm:$0xff] }
  0x41   : > { %1193 = vmatpush1.msra.mxu1 %v2674_v57  ;;  %452 = vmatprep.subr.mxu0 %v3229_v3  ;;  %v2692_v57 = vld [vmem:[%s5112_s1 + $0x250] sm:$0xff] }
  0x42   : > { %2954 = vmatmul.mubr.f32.gmra.mxu1 %v3492_v58  ;;  %1194 = vmatprep.subr.mxu1 %v3229_v3 }
  0x43   : > { %453 = vmatpush2.msra.mxu0 %v379_v59  ;;  %1195 = vmatpush1.msra.mxu1 %v2673_v60  ;;  %v3689_v59 = vld [vmem:[%s3382_s6 + $0x140] sm:$0xff]  ;;  %v3695_v60 = vsel %vm1032_vm0, %v897_v53, %v945_v54  ;;  %v1709_v53 = vrot.slane %v3603_v26, 2 }
  0x44   : > { %454 = vmatprep.subr.mxu0 %v3229_v3  ;;  %1196 = vmatprep.subr.mxu1 %v3229_v3 }
  0x45   : > { %455 = vmatpush2.msra.mxu0 %v378_v61  ;;  %2956 = vmatprep.mubr.f32.mxu1 %v3508_v62  ;;  %v2691_v61 = vld [vmem:[%s5112_s1 + $0x248] sm:$0xff] }
  0x46   : > { %1197 = vmatpush1.msra.mxu1 %v2672_v63  ;;  %456 = vmatprep.subr.mxu0 %v3229_v3  ;;  %v3704_v63 = vld [vmem:[%s3382_s6 + $0x150] sm:$0xff] }
  0x47   : > { %2957 = vmatmul.mubr.f32.gmra.mxu1 %v3516_v0  ;;  %1198 = vmatprep.subr.mxu1 %v3229_v3 }
  0x48   : > { %457 = vmatpush2.msra.mxu0 %v377_v1  ;;  %1199 = vmatpush1.msra.mxu1 %v2671_v2  ;;  %v2690_v1 = vld [vmem:[%s5112_s1 + $0x240] sm:$0xff]  ;;  %v3713_v2 = vld [vmem:[%s3382_s6 + $0x158] sm:$0xff] }
  0x49   : > { %458 = vmatprep.subr.mxu0 %v3229_v3  ;;  %1200 = vmatprep.subr.mxu1 %v3229_v3 }
  0x4a   : > { %459 = vmatpush2.msra.mxu0 %v376_v4  ;;  %2959 = vmatprep.mubr.f32.mxu1 %v3532_v5  ;;  %v2689_v4 = vld [vmem:[%s5112_s1 + $0x238] sm:$0xff] }
  0x4b   : > { %1201 = vmatpush1.msra.mxu1 %v2670_v6  ;;  %460 = vmatprep.subr.mxu0 %v3229_v3  ;;  %v3722_v6 = vld [vmem:[%s3382_s6 + $0x168] sm:$0xff] }
  0x4c   : > { %2960 = vmatmul.mubr.f32.gmra.mxu1 %v3540_v7  ;;  %1202 = vmatprep.subr.mxu1 %v3229_v3 }
  0x4d   : > { %461 = vmatpush2.msra.mxu0 %v375_v8  ;;  %1203 = vmatpush1.msra.mxu1 %v2669_v9  ;;  %v2688_v8 = vld [vmem:[%s5112_s1 + $0x230] sm:$0xff] }
  0x4e   : > { %462 = vmatprep.subr.mxu0 %v3229_v3  ;;  %1204 = vmatprep.subr.mxu1 %v3229_v3  ;;  %v3731_v9 = vld [vmem:[%s3382_s6 + $0x170] sm:$0xff] }
  0x4f   : > { %463 = vmatpush2.msra.mxu0 %v374_v11  ;;  %2962 = vmatprep.mubr.f32.mxu1 %v3556_v12  ;;  %v954_v11 = vrot.slane %v3540_v7, 1 }
  0x50   : > { %1205 = vmatpush1.msra.mxu1 %v2668_v13  ;;  %464 = vmatprep.subr.mxu0 %v3229_v3  ;;  %v3742_v13 = vld [vmem:[%s3382_s6 + $0x180] sm:$0xff] }
  0x51   : > { %2963 = vmatmul.mubr.f32.gmra.mxu1 %v3564_v14  ;;  %1206 = vmatprep.subr.mxu1 %v3229_v3 }
  0x52   : > { %465 = vmatpush2.msra.mxu0 %v373_v15  ;;  %1207 = vmatpush1.msra.mxu1 %v2667_v16  ;;  %v2686_v15 = vld [vmem:[%s5112_s1 + $0x220] sm:$0xff]  ;;  %v3751_v16 = vld [vmem:[%s3382_s6 + $0x188] sm:$0xff] }
  0x53   : > { %466 = vmatprep.subr.mxu0 %v3229_v3  ;;  %1208 = vmatprep.subr.mxu1 %v3229_v3 }
  0x54   : > { %467 = vmatpush2.msra.mxu0 %v372_v18  ;;  %468 = vmatprep.mubr.f32.mxu0 %v3582_v19  ;;  %v3757_v18 = vsel %vm1032_vm0, %v906_v10, %v954_v11 }
  0x55   : > { %2965 = vmatprep.mubr.f32.mxu1 %v3587_v22  ;;  %1209 = vmatpush1.msra.mxu1 %v2666_v23  ;;  %v887_v23 = vrot.slane %v3582_v19, 1 }
  0x56   : > { %469 = vmatmul.mubr.f32.vlgmr.msra.gmra.mxu0 %v3595_v24  ;;  %2966 = vmatmul.mubr.f32.gmra.mxu1 %v3598_v25 }
  0x57   : > { %1210 = vmatprep.subr.mxu1 %v3229_v3  ;;  %473 = vmatprep.mubr.f32.mxu0 %v3603_v26 }
  0x58   : > { %1211 = vmatpush2.msra.mxu1 %v2697_v28  ;;  %2968 = vmatprep.mubr.f32.mxu1 %v3616_v29  ;;  %v935_v28 = vrot.slane %v3603_v26, 1 }
  0x59   : > { %1212 = vmatprep.subr.mxu1 %v3229_v3  ;;  %2989 = vmatprep.subr.mxu0 %v3625_v32 }
  0x5a   : > { %1213 = vmatpush2.msra.mxu1 %v2696_v35  ;;  %474 = vmatmul.mubr.f32.gmra.mxu0 %v3633_v36  ;;  %v2684_v35 = vld [vmem:[%s5112_s1 + $0x210] sm:$0xff] }
  0x5b   : > { %2969 = vmatmul.mubr.f32.gmra.mxu1 %v3637_v37  ;;  %1214 = vmatprep.subr.mxu1 %v3229_v3 }
  0x5c   : > { %1215 = vmatpush2.msra.mxu1 %v2695_v41  ;;  %478 = vmatprep.mubr.f32.mxu0 %v3392_v33  ;;  %v3776_v41 = vld [vmem:[%s3382_s6 + $0x28] sm:$0xff] }
  0x5d   : > { %1216 = vmatprep.subr.mxu1 %v3229_v3  ;;  %2971 = vmatprep.mubr.f32.mxu1 %v3654_v45 }
  0x5e   : > { %1217 = vmatpush2.msra.mxu1 %v2694_v47  ;;  %479 = vmatmul.mubr.f32.gmra.mxu0 %v3582_v19  ;;  %v934_v47 = vrot.slane %v3633_v36, 1 }
  0x5f   : > { %2972 = vmatmul.mubr.f32.gmra.mxu1 %v3663_v48  ;;  %1218 = vmatprep.subr.mxu1 %v3229_v3 }
  0x60   : > { %1219 = vmatpush2.msra.mxu1 %v2693_v51  ;;  %483 = vmatprep.mubr.f32.mxu0 %v3396_v34  ;;  %v1661_v51 = vrot.slane %v3582_v19, 2  ;;  %v1082_v19 = vsel %vm1032_vm0, %v887_v23, %v935_v28 }
  0x61   : > { %1220 = vmatprep.subr.mxu1 %v3229_v3  ;;  %2974 = vmatprep.mubr.f32.mxu1 %v3680_v55 }
  0x62   : > { %1221 = vmatpush2.msra.mxu1 %v2692_v57  ;;  %484 = vmatmul.mubr.f32.gmra.mxu0 %v3603_v26  ;;  %v2683_v57 = vld [vmem:[%s5112_s1 + $0x208] sm:$0xff] }
  0x63   : > { %2975 = vmatmul.mubr.f32.gmra.mxu1 %v3689_v59  ;;  %1222 = vmatprep.subr.mxu1 %v3229_v3 }
  0x64   : > { %1223 = vmatpush2.msra.mxu1 %v2691_v61  ;;  %488 = vmatprep.mubr.f32.mxu0 %v3412_v38  ;;  %v3792_v61 = vld [vmem:[%s3382_s6 + $0x10] sm:$0xff] }
  0x65   : > { %1224 = vmatprep.subr.mxu1 %v3229_v3  ;;  %2977 = vmatprep.mubr.f32.mxu1 %v3704_v63  ;;  %v982_v10 = vrot.slane %v3792_v61, 1 }
  0x66   : > { %1225 = vmatpush2.msra.mxu1 %v2690_v1  ;;  %489 = vmatmul.mubr.f32.gmra.mxu0 %v3392_v33  ;;  %v2687_v33 = vld [vmem:[%s5112_s1 + $0x228] sm:$0xff]  ;;  %v1660_v1 = vrot.slane %v3595_v24, 2  ;;  %v1081_v24 = vsel %vm1032_vm0, %v886_v42, %v934_v47  ;;  %v3834_v42 = vld [vmem:[%s3382_s6 + $0x40] sm:$0xff] }
  0x67   : > { %2978 = vmatmul.mubr.f32.gmra.mxu1 %v3713_v2  ;;  %1226 = vmatprep.subr.mxu1 %v3229_v3 }
  0x68   : > { %1227 = vmatpush2.msra.mxu1 %v2689_v4  ;;  %493 = vmatprep.mubr.f32.mxu0 %v3420_v40  ;;  %v1708_v4 = vrot.slane %v3633_v36, 2  ;;  %v2751_v36 = vld [vmem:[%s5112_s1 + $0x428] sm:$0xff] }
  0x69   : > { %1228 = vmatprep.subr.mxu1 %v3229_v3  ;;  %2980 = vmatprep.mubr.f32.mxu1 %v3722_v6 }
  0x6a   : > { %1229 = vmatpush2.msra.mxu1 %v2688_v8  ;;  %494 = vmatmul.mubr.f32.gmra.mxu0 %v3396_v34  ;;  %v983_v8 = vrot.slane %v3776_v41, 1 }
  0x6b   : > { %2981 = vmatmul.mubr.f32.gmra.mxu1 %v3731_v9  ;;  %1230 = vmatprep.subr.mxu1 %v3229_v3 }
  0x6c   : > { %1231 = vmatpush2.msra.mxu1 %v2687_v33  ;;  %498 = vmatprep.mubr.f32.mxu0 %v3436_v44  ;;  %v2682_v33 = vld [vmem:[%s5112_s1 + $0x200] sm:$0xff]  ;;  %v1034_v23 = vsel %vm1032_vm0, %v935_v28, %v983_v8  ;;  %v1033_v28 = vsel %vm1032_vm0, %v934_v47, %v982_v10  ;;  %v2727_v47 = vld [vmem:[%s5112_s1 + $0x368] sm:$0xff]  ;;  %v3862_v8 = vld [vmem:[%s3382_s6 + $0x58] sm:$0xff] }
  0x6d   : > { %1232 = vmatprep.subr.mxu1 %v3229_v3  ;;  %2983 = vmatprep.mubr.f32.mxu1 %v3742_v13  ;;  %v989_v34 = vrot.slane %v3862_v8, 1  ;;  %v2709_v10 = vld [vmem:[%s5112_s1 + $0x2d8] sm:$0xff] }
  0x6e   : > { %1233 = vmatpush2.msra.mxu1 %v2686_v15  ;;  %499 = vmatmul.mubr.f32.gmra.mxu0 %v3412_v38  ;;  %v3782_v38 = vld [vmem:[%s3382_s6 + $0x1a0] sm:$0xff]  ;;  %v3815_v15 = vsel %vm1804_vm1, %v1661_v51, %v1709_v53  ;;  %v986_v51 = vrot.slane %v3834_v42, 1 }
  0x6f   : > { %2984 = vmatmul.mubr.f32.gmra.mxu1 %v3751_v16  ;;  %1234 = vmatprep.subr.mxu1 %v3229_v3 }
  0x70   : > { %1235 = vmatpush2.msra.mxu1 %v2685_v20  ;;  %503 = vmatprep.mubr.f32.mxu0 %v3444_v46  ;;  %v2729_v20 = vld [vmem:[%s5112_s1 + $0x378] sm:$0xff] }
  0x71   : > { %1236 = vmatprep.subr.mxu1 %v3229_v3  ;;  %2986 = vmatprep.mubr.f32.mxu1 %v3768_v30 }
  0x72   : > { %1237 = vmatpush2.msra.mxu1 %v2684_v35  ;;  %504 = vmatmul.mubr.f32.gmra.mxu0 %v3420_v40  ;;  %v3827_v35 = vsel %vm1804_vm1, %v1660_v1, %v1708_v4  ;;  %v3859_v1 = vsel %vm1032_vm0, %v936_v21, %v986_v51  ;;  %v2725_v21 = vld [vmem:[%s5112_s1 + $0x358] sm:$0xff]  ;;  %v2724_v40 = vld [vmem:[%s5112_s1 + $0x350] sm:$0xff]  ;;  %v3923_v51 = vld [vmem:[%s3382_s6 + $0x88] sm:$0xff] }
  0x73   : > { %2987 = vmatmul.mubr.f32.gmra.mxu1 %v3782_v38  ;;  %1238 = vmatprep.subr.mxu1 %v3229_v3 }
  0x74   : > { %1239 = vmatpush2.msra.mxu1 %v2683_v57  ;;  %508 = vmatprep.mubr.f32.mxu0 %v3460_v50  ;;  %v2711_v57 = vld [vmem:[%s5112_s1 + $0x2e8] sm:$0xff] }
  0x75   : > { %1240 = vmatprep.subr.mxu1 %v3229_v3  ;;  %1242 = vmatprep.mubr.f32.mxu1 %v1082_v19 }
  0x76   : > { %1241 = vmatpush2.msra.mxu1 %v2682_v33  ;;  %2990 = vmatpush3.msra.mxu0 %v3625_v32  ;;  %v2712_v32 = vld [vmem:[%s5112_s1 + $0x2f0] sm:$0xff]  ;;  %v2726_v33 = vld [vmem:[%s5112_s1 + $0x360] sm:$0xff] }
  0x77   : > { %509 = vmatmul.mubr.f32.gmra.mxu0 %v3436_v44  ;;  %1243 = vmatmul.mubr.f32.vlgmr.msra.gmra.mxu1 %v1081_v24  ;;  %v2728_v44 = vld [vmem:[%s5112_s1 + $0x370] sm:$0xff] }
  0x78   : > { %1950 = vmatprep.subr.mxu1 %v3229_v3  ;;  %513 = vmatprep.mubr.f32.mxu0 %v3468_v52  ;;  %v3889_v24 = vld [vmem:[%s3382_s6 + $0x70] sm:$0xff] }
  0x79   : > { %1951 = vmatpush1.msra.mxu1 %v2729_v20  ;;  %1247 = vmatprep.mubr.f32.mxu1 %v1034_v23  ;;  %v2708_v20 = vld [vmem:[%s5112_s1 + $0x2d0] sm:$0xff] }
  0x7a   : > { %1952 = vmatprep.subr.mxu1 %v3229_v3  ;;  %2991 = vmatprep.subr.mxu0 %v2712_v32 }
  0x7b   : > { %514 = vmatmul.mubr.f32.gmra.mxu0 %v3444_v46  ;;  %1248 = vmatmul.mubr.f32.gmra.mxu1 %v1033_v28  ;;  %v2723_v28 = vld [vmem:[%s5112_s1 + $0x348] sm:$0xff]  ;;  %v2722_v46 = vld [vmem:[%s5112_s1 + $0x340] sm:$0xff] }
  0x7c   : > { %1953 = vmatpush1.msra.mxu1 %v2728_v44  ;;  %518 = vmatprep.mubr.f32.mxu0 %v3484_v56 }
  0x7d   : > { %1252 = vmatprep.mubr.f32.mxu1 %v3609_v27  ;;  %2992 = vmatpush3.msra.mxu0 %v2712_v32  ;;  %v981_v32 = vrot.slane %v3782_v38, 1 }
  0x7e   : > { %1954 = vmatprep.subr.mxu1 %v3229_v3  ;;  %2993 = vmatprep.subr.mxu0 %v2711_v57 }
  0x7f   : > { %519 = vmatmul.mubr.f32.gmra.mxu0 %v3460_v50  ;;  %1253 = vmatmul.mubr.f32.gmra.mxu1 %v1082_v19  ;;  %v2710_v50 = vld [vmem:[%s5112_s1 + $0x2e0] sm:$0xff]  ;;  %v3886_v19 = vsel %vm1032_vm0, %v939_v31, %v989_v34  ;;  %v992_v31 = vrot.slane %v3889_v24, 1  ;;  %v2721_v34 = vld [vmem:[%s5112_s1 + $0x338] sm:$0xff] }
  0x80   : > { %1955 = vmatpush1.msra.mxu1 %v2727_v47  ;;  %523 = vmatprep.mubr.f32.mxu0 %v3492_v58  ;;  %v995_v47 = vrot.slane %v3923_v51, 1 }
  0x81   : > { %1257 = vmatprep.mubr.f32.mxu1 %v3859_v1  ;;  %1956 = vmatprep.subr.mxu1 %v3229_v3  ;;  %v3920_v44 = vsel %vm1032_vm0, %v942_v43, %v992_v31  ;;  %v2705_v31 = vld [vmem:[%s5112_s1 + $0x2b8] sm:$0xff] }
  0x82   : > { %1957 = vmatpush1.msra.mxu1 %v2726_v33  ;;  %2994 = vmatpush3.msra.mxu0 %v2711_v57  ;;  %v2707_v57 = vld [vmem:[%s5112_s1 + $0x2c8] sm:$0xff]  ;;  %v2706_v33 = vld [vmem:[%s5112_s1 + $0x2c0] sm:$0xff] }
  0x83   : > { %524 = vmatmul.mubr.f32.gmra.mxu0 %v3468_v52  ;;  %1258 = vmatmul.mubr.f32.gmra.mxu1 %v1034_v23  ;;  %v933_v23 = vrot.slane %v3768_v30, 1  ;;  %v2720_v52 = vld [vmem:[%s5112_s1 + $0x330] sm:$0xff] }
  0x84   : > { %528 = vmatprep.mubr.f32.mxu0 %v3508_v62  ;;  %1262 = vmatprep.mubr.f32.mxu1 %v3643_v39 }
  0x85   : > { %1958 = vmatprep.subr.mxu1 %v3229_v3  ;;  %2995 = vmatprep.subr.mxu0 %v2710_v50  ;;  %v3937_v43 = vsel %vm1032_vm0, %v933_v23, %v981_v32  ;;  %v951_v23 = vrot.slane %v3516_v0, 1 }
  0x86   : > { %1959 = vmatpush1.msra.mxu1 %v2725_v21  ;;  %2996 = vmatpush3.msra.mxu0 %v2710_v50  ;;  %v900_v50 = vrot.slane %v3484_v56, 1  ;;  %v948_v21 = vrot.slane %v3492_v58, 1 }
  0x87   : > { %529 = vmatmul.mubr.f32.gmra.mxu0 %v3484_v56  ;;  %1263 = vmatmul.mubr.f32.gmra.mxu1 %v3609_v27 }
  0x88   : > { %533 = vmatprep.mubr.f32.mxu0 %v3516_v0  ;;  %1267 = vmatprep.mubr.f32.mxu1 %v3886_v19  ;;  %v3978_v56 = vsel %vm1032_vm0, %v900_v50, %v948_v21 }
  0x89   : > { %1960 = vmatprep.subr.mxu1 %v3229_v3  ;;  %2997 = vmatprep.subr.mxu0 %v2709_v10 }
  0x8a   : > { %1961 = vmatpush1.msra.mxu1 %v2724_v40  ;;  %2998 = vmatpush3.msra.mxu0 %v2709_v10  ;;  %v3960_v10 = vsel %vm1032_vm0, %v945_v54, %v995_v47  ;;  %v3963_v40 = vld [vmem:[%s3382_s6 + $0xa0] sm:$0xff]  ;;  %v2719_v54 = vld [vmem:[%s5112_s1 + $0x328] sm:$0xff] }
  0x8b   : > { %534 = vmatmul.mubr.f32.gmra.mxu0 %v3492_v58  ;;  %1268 = vmatmul.mubr.f32.gmra.mxu1 %v3859_v1  ;;  %v998_v58 = vrot.slane %v3963_v40, 1 }
  0x8c   : > { %538 = vmatprep.mubr.f32.mxu0 %v3532_v5  ;;  %1272 = vmatprep.mubr.f32.mxu1 %v3669_v49 }
  0x8d   : > { %1962 = vmatprep.subr.mxu1 %v3229_v3  ;;  %2999 = vmatprep.subr.mxu0 %v2708_v20 }
  0x8e   : > { %1963 = vmatpush1.msra.mxu1 %v2723_v28  ;;  %3000 = vmatpush3.msra.mxu0 %v2708_v20  ;;  %v903_v20 = vrot.slane %v3508_v62, 1  ;;  %v3996_v28 = vsel %vm1032_vm0, %v948_v21, %v998_v58  ;;  %v4033_v21 = vld [vmem:[%s3382_s6 + $0xd0] sm:$0xff] }
  0x8f   : > { %539 = vmatmul.mubr.f32.gmra.mxu0 %v3508_v62  ;;  %1273 = vmatmul.mubr.f32.gmra.mxu1 %v3643_v39  ;;  %v2718_v62 = vld [vmem:[%s5112_s1 + $0x320] sm:$0xff]  ;;  %v1004_v58 = vrot.slane %v4033_v21, 1 }
  0x90   : > { %543 = vmatprep.mubr.f32.mxu0 %v3540_v7  ;;  %1277 = vmatprep.mubr.f32.mxu1 %v3920_v44 }
  0x91   : > { %1964 = vmatprep.subr.mxu1 %v3229_v3  ;;  %3001 = vmatprep.subr.mxu0 %v2707_v57 }
  0x92   : > { %1965 = vmatpush1.msra.mxu1 %v2722_v46  ;;  %3002 = vmatpush3.msra.mxu0 %v2707_v57  ;;  %v3999_v57 = vld [vmem:[%s3382_s6 + $0xb8] sm:$0xff]  ;;  %v2703_v46 = vld [vmem:[%s5112_s1 + $0x2a8] sm:$0xff] }
  0x93   : > { %544 = vmatmul.mubr.f32.gmra.mxu0 %v3516_v0  ;;  %1278 = vmatmul.mubr.f32.gmra.mxu1 %v3886_v19  ;;  %v4014_v0 = vsel %vm1032_vm0, %v903_v20, %v951_v23  ;;  %v1001_v47 = vrot.slane %v3999_v57, 1  ;;  %v909_v20 = vrot.slane %v3556_v12, 1 }
  0x94   : > { %548 = vmatprep.mubr.f32.mxu0 %v3556_v12  ;;  %1282 = vmatprep.mubr.f32.mxu1 %v3695_v60 }
  0x95   : > { %1966 = vmatprep.subr.mxu1 %v3229_v3  ;;  %3003 = vmatprep.subr.mxu0 %v2706_v33  ;;  %v4030_v50 = vsel %vm1032_vm0, %v951_v23, %v1001_v47  ;;  %v957_v23 = vrot.slane %v3564_v14, 1  ;;  %v2699_v47 = vld [vmem:[%s5112_s1 + $0x288] sm:$0xff] }
  0x96   : > { %1967 = vmatpush1.msra.mxu1 %v2721_v34  ;;  %3004 = vmatpush3.msra.mxu0 %v2706_v33  ;;  %v2702_v33 = vld [vmem:[%s5112_s1 + $0x2a0] sm:$0xff]  ;;  %v2717_v34 = vld [vmem:[%s5112_s1 + $0x318] sm:$0xff] }
  0x97   : > { %549 = vmatmul.mubr.f32.gmra.mxu0 %v3532_v5  ;;  %1283 = vmatmul.mubr.f32.gmra.mxu1 %v3669_v49  ;;  %v2704_v5 = vld [vmem:[%s5112_s1 + $0x2b0] sm:$0xff] }
  0x98   : > { %553 = vmatprep.mubr.f32.mxu0 %v3564_v14  ;;  %1287 = vmatprep.mubr.f32.mxu1 %v3960_v10 }
  0x99   : > { %1968 = vmatprep.subr.mxu1 %v3229_v3  ;;  %3005 = vmatprep.subr.mxu0 %v2705_v31 }
  0x9a   : > { %1969 = vmatpush1.msra.mxu1 %v2720_v52  ;;  %3006 = vmatpush3.msra.mxu0 %v2705_v31  ;;  %v2701_v31 = vld [vmem:[%s5112_s1 + $0x298] sm:$0xff]  ;;  %v2716_v52 = vld [vmem:[%s5112_s1 + $0x310] sm:$0xff] }
  0x9b   : > { %554 = vmatmul.mubr.f32.gmra.mxu0 %v3540_v7  ;;  %1288 = vmatmul.mubr.f32.gmra.mxu1 %v3920_v44  ;;  %v2714_v7 = vld [vmem:[%s5112_s1 + $0x300] sm:$0xff] }
  0x9c   : > { %558 = vmatprep.mubr.f32.mxu0 %v3587_v22  ;;  %1292 = vmatprep.mubr.f32.mxu1 %v3978_v56 }
  0x9d   : > { %1970 = vmatprep.subr.mxu1 %v3229_v3  ;;  %3007 = vmatprep.subr.mxu0 %v2704_v5 }
  0x9e   : > { %1971 = vmatpush1.msra.mxu1 %v2719_v54  ;;  %3008 = vmatpush3.msra.mxu0 %v2704_v5  ;;  %v2700_v5 = vld [vmem:[%s5112_s1 + $0x290] sm:$0xff]  ;;  %v2715_v54 = vld [vmem:[%s5112_s1 + $0x308] sm:$0xff] }
  0x9f   : > { %559 = vmatmul.mubr.f32.gmra.mxu0 %v3556_v12  ;;  %1293 = vmatmul.mubr.f32.gmra.mxu1 %v3695_v60  ;;  %v4082_v12 = vsel %vm1032_vm0, %v909_v20, %v957_v23  ;;  %v2743_v20 = vld [vmem:[%s5112_s1 + $0x3e8] sm:$0xff] }
  0xa0   : > { %563 = vmatprep.mubr.f32.mxu0 %v3598_v25  ;;  %1297 = vmatprep.mubr.f32.mxu1 %v3996_v28 }
  0xa1   : > { %1972 = vmatprep.subr.mxu1 %v3229_v3  ;;  %3009 = vmatprep.subr.mxu0 %v2703_v46 }
  0xa2   : > { %1973 = vmatpush1.msra.mxu1 %v2718_v62  ;;  %3010 = vmatpush3.msra.mxu0 %v2703_v46  ;;  %v4064_v46 = vsel %vm1032_vm0, %v954_v11, %v1004_v58  ;;  %v4067_v62 = vld [vmem:[%s3382_s6 + $0xe8] sm:$0xff]  ;;  %v2698_v11 = vld [vmem:[%s5112_s1 + $0x280] sm:$0xff] }
  0xa3   : > { %564 = vmatmul.mubr.f32.gmra.mxu0 %v3564_v14  ;;  %1298 = vmatmul.mubr.f32.gmra.mxu1 %v3960_v10  ;;  %v1007_v14 = vrot.slane %v4067_v62, 1  ;;  %v4103_v58 = vld [vmem:[%s3382_s6 + $0x100] sm:$0xff] }
  0xa4   : > { %568 = vmatprep.mubr.f32.mxu0 %v3616_v29  ;;  %1302 = vmatprep.mubr.f32.mxu1 %v4014_v0 }
  0xa5   : > { %1974 = vmatprep.subr.mxu1 %v3229_v3  ;;  %3011 = vmatprep.subr.mxu0 %v2702_v33 }
  0xa6   : > { %1975 = vmatpush1.msra.mxu1 %v2717_v34  ;;  %3012 = vmatpush3.msra.mxu0 %v2702_v33  ;;  %v2745_v33 = vld [vmem:[%s5112_s1 + $0x3f8] sm:$0xff]  ;;  %v912_v34 = vrot.slane %v3587_v22, 1 }
  0xa7   : > { %569 = vmatmul.mubr.f32.gmra.mxu0 %v3587_v22  ;;  %1303 = vmatmul.mubr.f32.gmra.mxu1 %v3978_v56  ;;  %v2744_v22 = vld [vmem:[%s5112_s1 + $0x3f0] sm:$0xff] }
  0xa8   : > { %573 = vmatprep.mubr.f32.mxu0 %v3637_v37  ;;  %1307 = vmatprep.mubr.f32.mxu1 %v4030_v50 }
  0xa9   : > { %1976 = vmatprep.subr.mxu1 %v3229_v3  ;;  %3013 = vmatprep.subr.mxu0 %v2701_v31 }
  0xaa   : > { %1977 = vmatpush1.msra.mxu1 %v2716_v52  ;;  %3014 = vmatpush3.msra.mxu0 %v2701_v31  ;;  %v960_v31 = vrot.slane %v3598_v25, 1  ;;  %v4100_v52 = vsel %vm1032_vm0, %v957_v23, %v1007_v14  ;;  %v915_v23 = vrot.slane %v3616_v29, 1  ;;  %v4139_v14 = vld [vmem:[%s3382_s6 + $0x118] sm:$0xff] }
  0xab   : > { %574 = vmatmul.mubr.f32.gmra.mxu0 %v3598_v25  ;;  %1308 = vmatmul.mubr.f32.gmra.mxu1 %v3996_v28 }
  0xac   : > { %578 = vmatprep.mubr.f32.mxu0 %v3654_v45  ;;  %1312 = vmatprep.mubr.f32.mxu1 %v3757_v18  ;;  %v4120_v25 = vsel %vm1032_vm0, %v912_v34, %v960_v31  ;;  %v918_v34 = vrot.slane %v3654_v45, 1 }
  0xad   : > { %1978 = vmatprep.subr.mxu1 %v3229_v3  ;;  %3015 = vmatprep.subr.mxu0 %v2700_v5 }
  0xae   : > { %1979 = vmatpush1.msra.mxu1 %v2715_v54  ;;  %3016 = vmatpush3.msra.mxu0 %v2700_v5  ;;  %v4108_v5 = vld [vmem:[%s5112_s1 + $0x478] sm:$0xff]  ;;  %v1010_v54 = vrot.slane %v4103_v58, 1 }
  0xaf   : > { %579 = vmatmul.mubr.f32.gmra.mxu0 %v3616_v29  ;;  %1313 = vmatmul.mubr.f32.gmra.mxu1 %v4014_v0 }
  0xb0   : > { %583 = vmatprep.mubr.f32.mxu0 %v3663_v48  ;;  %1317 = vmatprep.mubr.f32.mxu1 %v4064_v46 }
  0xb1   : > { %1980 = vmatprep.subr.mxu1 %v3229_v3  ;;  %3017 = vmatprep.subr.mxu0 %v2699_v47 }
  0xb2   : > { %1981 = vmatpush1.msra.mxu1 %v2714_v7  ;;  %3018 = vmatpush3.msra.mxu0 %v2699_v47  ;;  %v963_v47 = vrot.slane %v3637_v37, 1  ;;  %v4136_v7 = vsel %vm1032_vm0, %v960_v31, %v1010_v54  ;;  %v966_v31 = vrot.slane %v3663_v48, 1  ;;  %v4169_v54 = vld [vmem:[%s3382_s6 + $0x130] sm:$0xff] }
  0xb3   : > { %584 = vmatmul.mubr.f32.gmra.mxu0 %v3637_v37  ;;  %1318 = vmatmul.mubr.f32.gmra.mxu1 %v4030_v50  ;;  %v1013_v37 = vrot.slane %v4139_v14, 1 }
  0xb4   : > { %588 = vmatprep.mubr.f32.mxu0 %v3680_v55  ;;  %1322 = vmatprep.mubr.f32.mxu1 %v4082_v12  ;;  %v4151_v29 = vsel %vm1032_vm0, %v915_v23, %v963_v47  ;;  %v2739_v23 = vld [vmem:[%s5112_s1 + $0x3c8] sm:$0xff] }
  0xb5   : > { %1982 = vmatprep.subr.mxu1 %v3229_v3  ;;  %3019 = vmatprep.subr.mxu0 %v2698_v11 }
  0xb6   : > { %1983 = vmatpush2.msra.mxu1 %v2745_v33  ;;  %3020 = vmatpush3.msra.mxu0 %v2698_v11  ;;  %v2742_v11 = vld [vmem:[%s5112_s1 + $0x3e0] sm:$0xff]  ;;  %v2741_v33 = vld [vmem:[%s5112_s1 + $0x3d8] sm:$0xff] }
  0xb7   : > { %589 = vmatmul.mubr.f32.gmra.mxu0 %v3654_v45  ;;  %1323 = vmatmul.mubr.f32.gmra.mxu1 %v3757_v18  ;;  %v4181_v45 = vsel %vm1032_vm0, %v918_v34, %v966_v31  ;;  %v2738_v34 = vld [vmem:[%s5112_s1 + $0x3c0] sm:$0xff] }
  0xb8   : > { %593 = vmatprep.mubr.f32.mxu0 %v3689_v59  ;;  %1327 = vmatprep.mubr.f32.mxu1 %v4100_v52 }
  0xb9   : > { %1984 = vmatprep.subr.mxu1 %v3229_v3  ;;  %3069 = vmatprep.subr.mxu0 %v4108_v5 }
  0xba   : > { %1985 = vmatpush2.msra.mxu1 %v2744_v22  ;;  %v4166_v22 = vsel %vm1032_vm0, %v963_v47, %v1013_v37  ;;  %v921_v47 = vrot.slane %v3680_v55, 1 }
  0xbb   : > { %594 = vmatmul.mubr.f32.gmra.mxu0 %v3663_v48  ;;  %1328 = vmatmul.mubr.f32.gmra.mxu1 %v4064_v46  ;;  %v1016_v48 = vrot.slane %v4169_v54, 1 }
  0xbc   : > { %598 = vmatprep.mubr.f32.mxu0 %v3704_v63  ;;  %1332 = vmatprep.mubr.f32.mxu1 %v4120_v25 }
  0xbd   : > { %1986 = vmatprep.subr.mxu1 %v3229_v3  ;;  %v4196_v37 = vsel %vm1032_vm0, %v966_v31, %v1016_v48  ;;  %v2737_v31 = vld [vmem:[%s5112_s1 + $0x3b8] sm:$0xff]  ;;  %v972_v48 = vrot.slane %v3713_v2, 1 }
  0xbe   : > { %1987 = vmatpush2.msra.mxu1 %v2743_v20  ;;  %v2740_v20 = vld [vmem:[%s5112_s1 + $0x3d0] sm:$0xff] }
  0xbf   : > { %599 = vmatmul.mubr.f32.gmra.mxu0 %v3680_v55  ;;  %1333 = vmatmul.mubr.f32.gmra.mxu1 %v4082_v12 }
  0xc0   : > { %603 = vmatprep.mubr.f32.mxu0 %v3713_v2  ;;  %1337 = vmatprep.mubr.f32.mxu1 %v4136_v7 }
  0xc1   : > { %1988 = vmatprep.subr.mxu1 %v3229_v3 }
  0xc2   : > { %1989 = vmatpush2.msra.mxu1 %v2742_v11  ;;  %v969_v11 = vrot.slane %v3689_v59, 1 }
  0xc3   : > { %604 = vmatmul.mubr.f32.gmra.mxu0 %v3689_v59  ;;  %1338 = vmatmul.mubr.f32.gmra.mxu1 %v4100_v52 }
  0xc4   : > { %608 = vmatprep.mubr.f32.mxu0 %v3722_v6  ;;  %1342 = vmatprep.mubr.f32.mxu1 %v4151_v29  ;;  %v4211_v55 = vsel %vm1032_vm0, %v921_v47, %v969_v11  ;;  %v4229_v47 = vld [vmem:[%s3382_s6 + $0x160] sm:$0xff] }
  0xc5   : > { %1990 = vmatprep.subr.mxu1 %v3229_v3 }
  0xc6   : > { %1991 = vmatpush2.msra.mxu1 %v2741_v33  ;;  %v4199_v33 = vld [vmem:[%s3382_s6 + $0x148] sm:$0xff] }
  0xc7   : > { %609 = vmatmul.mubr.f32.gmra.mxu0 %v3704_v63  ;;  %1343 = vmatmul.mubr.f32.gmra.mxu1 %v4120_v25  ;;  %v1019_v59 = vrot.slane %v4199_v33, 1 }
  0xc8   : > { %613 = vmatprep.mubr.f32.mxu0 %v3731_v9  ;;  %1347 = vmatprep.mubr.f32.mxu1 %v4166_v22 }
  0xc9   : > { %1992 = vmatprep.subr.mxu1 %v3229_v3 }
  0xca   : > { %1993 = vmatpush2.msra.mxu1 %v2740_v20  ;;  %v924_v20 = vrot.slane %v3704_v63, 1  ;;  %v2760_v63 = vld [vmem:[%s5112_s1 + $0x470] sm:$0xff] }
  0xcb   : > { %614 = vmatmul.mubr.f32.gmra.mxu0 %v3713_v2  ;;  %1348 = vmatmul.mubr.f32.gmra.mxu1 %v4136_v7 }
  0xcc   : > { %618 = vmatprep.mubr.f32.mxu0 %v3742_v13  ;;  %1352 = vmatprep.mubr.f32.mxu1 %v4181_v45  ;;  %v4244_v2 = vsel %vm1032_vm0, %v924_v20, %v972_v48  ;;  %v930_v20 = vrot.slane %v3742_v13, 1  ;;  %v2732_v13 = vld [vmem:[%s5112_s1 + $0x390] sm:$0xff] }
  0xcd   : > { %1994 = vmatprep.subr.mxu1 %v3229_v3 }
  0xce   : > { %1995 = vmatpush2.msra.mxu1 %v2739_v23  ;;  %v4226_v23 = vsel %vm1032_vm0, %v969_v11, %v1019_v59  ;;  %v2759_v11 = vld [vmem:[%s5112_s1 + $0x468] sm:$0xff]  ;;  %v4266_v59 = vld [vmem:[%s3382_s6 + $0x178] sm:$0xff] }
  0xcf   : > { %619 = vmatmul.mubr.f32.gmra.mxu0 %v3722_v6  ;;  %1353 = vmatmul.mubr.f32.gmra.mxu1 %v4151_v29 }
  0xd0   : > { %623 = vmatprep.mubr.f32.mxu0 %v3751_v16  ;;  %1357 = vmatprep.mubr.f32.mxu1 %v4196_v37 }
  0xd1   : > { %1996 = vmatprep.subr.mxu1 %v3229_v3 }
  0xd2   : > { %1997 = vmatpush2.msra.mxu1 %v2738_v34  ;;  %v975_v34 = vrot.slane %v3731_v9, 1 }
  0xd3   : > { %624 = vmatmul.mubr.f32.gmra.mxu0 %v3731_v9  ;;  %1358 = vmatmul.mubr.f32.gmra.mxu1 %v4166_v22 }
  0xd4   : > { %1362 = vmatprep.mubr.f32.mxu1 %v4211_v55  ;;  %3021 = vmatprep.mubr.f32.mxu0 %v3609_v27  ;;  %v2736_v27 = vld [vmem:[%s5112_s1 + $0x3b0] sm:$0xff] }
  0xd5   : > { %1998 = vmatprep.subr.mxu1 %v3229_v3 }
  0xd6   : > { %1999 = vmatpush2.msra.mxu1 %v2737_v31  ;;  %v2757_v31 = vld [vmem:[%s5112_s1 + $0x458] sm:$0xff] }
  0xd7   : > { %1363 = vmatmul.mubr.f32.gmra.mxu1 %v4181_v45  ;;  %3022 = vmatmul.mubr.f32.vlgmr.msra.gmra.mxu0 %v3859_v1  ;;  %v1022_v1 = vrot.slane %v4229_v47, 1 }
  0xd8   : > { %1367 = vmatprep.mubr.f32.mxu1 %v4226_v23  ;;  %3024 = vmatprep.mubr.f32.mxu0 %v3643_v39  ;;  %v2735_v39 = vld [vmem:[%s5112_s1 + $0x3a8] sm:$0xff] }
  0xd9   : > { %2000 = vmatprep.subr.mxu1 %v3229_v3  ;;  %3070 = vmatpush3.msra.mxu0 %v4108_v5  ;;  %v927_v5 = vrot.slane %v3722_v6, 1  ;;  %v2758_v6 = vld [vmem:[%s5112_s1 + $0x460] sm:$0xff] }
  0xda   : > { %2001 = vmatpush2.msra.mxu1 %v2736_v27  ;;  %3071 = vmatprep.subr.mxu0 %v2760_v63  ;;  %v4302_v27 = vld [vmem:[%s3382_s6 + $0x190] sm:$0xff] }
  0xdb   : > { %1368 = vmatmul.mubr.f32.gmra.mxu1 %v4196_v37  ;;  %3025 = vmatmul.mubr.f32.gmra.mxu0 %v3886_v19  ;;  %v4263_v19 = vsel %vm1032_vm0, %v972_v48, %v1022_v1  ;;  %v4281_v9 = vsel %vm1032_vm0, %v927_v5, %v975_v34  ;;  %v978_v48 = vrot.slane %v3751_v16, 1  ;;  %v2756_v16 = vld [vmem:[%s5112_s1 + $0x450] sm:$0xff]  ;;  %v4323_v1 = vld [vmem:[%s3382_s6 + $0x1a8] sm:$0xff] }
  0xdc   : > { %1372 = vmatprep.mubr.f32.mxu1 %v4244_v2  ;;  %3027 = vmatprep.mubr.f32.mxu0 %v3669_v49  ;;  %v2734_v49 = vld [vmem:[%s5112_s1 + $0x3a0] sm:$0xff] }
  0xdd   : > { %2002 = vmatprep.subr.mxu1 %v3229_v3  ;;  %3072 = vmatpush3.msra.mxu0 %v2760_v63  ;;  %v1707_v63 = vrot.slane %v3768_v30, 2  ;;  %v4319_v30 = vsel %vm1032_vm0, %v930_v20, %v978_v48  ;;  %v3176_v20 = vld [vmem:[%s3382_s6 + $0x38] sm:$0xff] }
  0xde   : > { %2003 = vmatpush2.msra.mxu1 %v2735_v39  ;;  %3073 = vmatprep.subr.mxu0 %v2759_v11  ;;  %v1803_v39 = vrot.slane %v4323_v1, 2 }
  0xdf   : > { %1373 = vmatmul.mubr.f32.gmra.mxu1 %v4211_v55  ;;  %3028 = vmatmul.mubr.f32.gmra.mxu0 %v3920_v44  ;;  %v1025_v44 = vrot.slane %v4266_v59, 1 }
  0xe0   : > { %1377 = vmatprep.mubr.f32.mxu1 %v4263_v19  ;;  %3030 = vmatprep.mubr.f32.mxu0 %v3695_v60  ;;  %v2733_v60 = vld [vmem:[%s5112_s1 + $0x398] sm:$0xff] }
  0xe1   : > { %2004 = vmatprep.subr.mxu1 %v3229_v3  ;;  %3074 = vmatpush3.msra.mxu0 %v2759_v11  ;;  %v2755_v11 = vld [vmem:[%s5112_s1 + $0x448] sm:$0xff] }
  0xe2   : > { %2005 = vmatpush2.msra.mxu1 %v2734_v49  ;;  %3075 = vmatprep.subr.mxu0 %v2758_v6 }
  0xe3   : > { %1378 = vmatmul.mubr.f32.gmra.mxu1 %v4226_v23  ;;  %3031 = vmatmul.mubr.f32.gmra.mxu0 %v3960_v10  ;;  %v4299_v10 = vsel %vm1032_vm0, %v975_v34, %v1025_v44 }
  0xe4   : > { %1382 = vmatprep.mubr.f32.mxu1 %v4281_v9  ;;  %3033 = vmatprep.mubr.f32.mxu0 %v3978_v56  ;;  %v1755_v56 = vrot.slane %v3782_v38, 2  ;;  %v3183_v38 = vld [vmem:[%s3382_s6 + $0x90] sm:$0xff] }
  0xe5   : > { %2006 = vmatprep.subr.mxu1 %v3229_v3  ;;  %3076 = vmatpush3.msra.mxu0 %v2758_v6  ;;  %v2754_v6 = vld [vmem:[%s5112_s1 + $0x440] sm:$0xff] }
  0xe6   : > { %2007 = vmatpush2.msra.mxu1 %v2733_v60  ;;  %3077 = vmatprep.subr.mxu0 %v2757_v31  ;;  %v4336_v5 = vsel %vm1804_vm1, %v1707_v63, %v1755_v56  ;;  %v4342_v34 = vsel %vm1804_vm1, %v1755_v56, %v1803_v39  ;;  %v3178_v56 = vld [vmem:[%s3382_s6 + $0x50] sm:$0xff]  ;;  %v2749_v39 = vld [vmem:[%s5112_s1 + $0x418] sm:$0xff] }
  0xe7   : > { %1383 = vmatmul.mubr.f32.gmra.mxu1 %v4244_v2  ;;  %3034 = vmatmul.mubr.f32.gmra.mxu0 %v3996_v28  ;;  %v1028_v28 = vrot.slane %v4302_v27, 1 }
  0xe8   : > { %1387 = vmatprep.mubr.f32.mxu1 %v4299_v10  ;;  %3036 = vmatprep.mubr.f32.mxu0 %v4014_v0  ;;  %v2731_v0 = vld [vmem:[%s5112_s1 + $0x388] sm:$0xff] }
  0xe9   : > { %2008 = vmatprep.subr.mxu1 %v3229_v3  ;;  %3078 = vmatpush3.msra.mxu0 %v2757_v31 }
  0xea   : > { %2009 = vmatpush2.msra.mxu1 %v2732_v13  ;;  %3079 = vmatprep.subr.mxu0 %v2756_v16  ;;  %v1713_v13 = vrot.slane %v3178_v56, 2 }
  0xeb   : > { %1388 = vmatmul.mubr.f32.gmra.mxu1 %v4263_v19  ;;  %3037 = vmatmul.mubr.f32.gmra.mxu0 %v4030_v50  ;;  %v4347_v50 = vsel %vm1032_vm0, %v978_v48, %v1028_v28  ;;  %v1710_v48 = vrot.slane %v3176_v20, 2 }
  0xec   : > { %1392 = vmatprep.mubr.f32.mxu1 %v4319_v30  ;;  %3039 = vmatprep.mubr.f32.mxu0 %v3757_v18  ;;  %v2730_v18 = vld [vmem:[%s5112_s1 + $0x380] sm:$0xff] }
  0xed   : > { %2010 = vmatprep.subr.mxu1 %v3229_v3  ;;  %3080 = vmatpush3.msra.mxu0 %v2756_v16 }
  0xee   : > { %2011 = vmatpush2.msra.mxu1 %v2731_v0  ;;  %v4349_v49 = vpop.f32.mrf.mxu1  ;;  %3081 = vmatprep.subr.mxu0 %v2755_v11  ;;  %v3179_v0 = vld [vmem:[%s3382_s6 + $0x60] sm:$0xff] }
  0xef   : > { %1393 = vmatmul.mubr.f32.gmra.mxu1 %v4281_v9  ;;  %3040 = vmatmul.mubr.f32.gmra.mxu0 %v4064_v46  ;;  %v1757_v46 = vrot.slane %v3776_v41, 2  ;;  %v3175_v41 = vld [vmem:[%s3382_s6 + $0x30] sm:$0xff] }
  0xf0   : > { %1397 = vmatprep.mubr.f32.mxu1 %v4347_v50  ;;  %3042 = vmatprep.mubr.f32.mxu0 %v4082_v12  ;;  %v4361_v44 = vpop.f32.mrf.mxu1  ;;  %v2753_v12 = vld [vmem:[%s5112_s1 + $0x438] sm:$0xff]  ;;  %v1662_v31 = vrot.slane %v3175_v41, 2  ;;  %v1029_v41 = vrot.slane %v4323_v1, 1 }
  0xf1   : > { %2012 = vmatprep.subr.mxu1 %v3229_v3  ;;  %3082 = vmatpush3.msra.mxu0 %v2755_v11  ;;  %v1756_v3 = vrot.slane %v3792_v61, 2  ;;  %v2752_v61 = vld [vmem:[%s5112_s1 + $0x430] sm:$0xff]  ;;  %v1668_v11 = vrot.slane %v3179_v0, 2 }
  0xf2   : > { %2013 = vmatpush2.msra.mxu1 %v2730_v18  ;;  %3083 = vmatprep.subr.mxu0 %v2754_v6  ;;  %v1080_v1 = vsel %vm1032_vm0, %v981_v32, %v1029_v41 }
  0xf3   : > { %1398 = vmatmul.mubr.f32.gmra.mxu1 %v4299_v10  ;;  %3043 = vmatmul.mubr.f32.gmra.mxu0 %v4100_v52  ;;  %v4367_v60 = vpop.f32.mrf.mxu1  ;;  %v1806_v52 = vsel %vm1804_vm1, %v1709_v53, %v1757_v46  ;;  %v1805_v26 = vsel %vm1804_vm1, %v1708_v4, %v1756_v3  ;;  %v3177_v4 = vld [vmem:[%s3382_s6 + $0x48] sm:$0xff] }
  0xf4   : > { %3045 = vmatprep.mubr.f32.mxu0 %v4120_v25  ;;  %2014 = vmatprep.mubr.f32.mxu1 %v3815_v15  ;;  %v4397_v25 = vsel %vm1804_vm1, %v1662_v31, %v1710_v48  ;;  %v3181_v31 = vld [vmem:[%s3382_s6 + $0x78] sm:$0xff] }
  0xf5   : > { %v4381_v63 = vpop.f32.mrf.mxu1  ;;  %3084 = vmatpush3.msra.mxu0 %v2754_v6  ;;  %v1671_v20 = vrot.slane %v3181_v31, 2  ;;  %v1775_v31 = vrot.slane %v3999_v57, 2 }
  0xf6   : > { %3085 = vmatprep.subr.mxu0 %v2753_v12 }
  0xf7   : > { %3046 = vmatmul.mubr.f32.gmra.mxu0 %v4136_v7  ;;  %2015 = vmatmul.mubr.f32.vlgmr.msra.gmra.mxu1 %v3827_v35  ;;  %v1760_v35 = vrot.slane %v3834_v42, 2 }
  0xf8   : > { %3048 = vmatprep.mubr.f32.mxu0 %v4151_v29  ;;  %2019 = vmatprep.mubr.f32.mxu1 %v1806_v52  ;;  %v4393_v53 = vpop.f32.mrf.mxu1  ;;  %v1665_v29 = vrot.slane %v3177_v4, 2 }
  0xf9   : > { %3086 = vmatpush3.msra.mxu0 %v2753_v12  ;;  %v4412_v42 = vsel %vm1804_vm1, %v1710_v48, %v1760_v35  ;;  %v3182_v48 = vld [vmem:[%s3382_s6 + $0x80] sm:$0xff] }
  0xfa   : > { %v4400_v7 = vpop.f32.mrf.mxu1  ;;  %3087 = vmatprep.subr.mxu0 %v2752_v61  ;;  %v4427_v28 = vsel %vm1804_vm1, %v1665_v29, %v1713_v13 }
  0xfb   : > { %3049 = vmatmul.mubr.f32.gmra.mxu0 %v4166_v22  ;;  %2020 = vmatmul.mubr.f32.gmra.mxu1 %v1805_v26  ;;  %v1769_v26 = vrot.slane %v3923_v51, 2 }
  0xfc   : > { %3051 = vmatprep.mubr.f32.mxu0 %v4181_v45  ;;  %2024 = vmatprep.mubr.f32.mxu1 %v4397_v25  ;;  %v2750_v45 = vld [vmem:[%s5112_s1 + $0x420] sm:$0xff] }
  0xfd   : > { %v4414_v16 = vpop.f32.mrf.mxu1  ;;  %3088 = vmatpush3.msra.mxu0 %v2752_v61 }
  0xfe   : > { %3089 = vmatprep.subr.mxu0 %v2751_v36 }
  0xff   : > { %3052 = vmatmul.mubr.f32.gmra.mxu0 %v4196_v37  ;;  %2025 = vmatmul.mubr.f32.gmra.mxu1 %v3815_v15  ;;  %v4418_v22 = vpop.f32.mrf.mxu1  ;;  %v1763_v37 = vrot.slane %v3862_v8, 2  ;;  %v3180_v8 = vld [vmem:[%s3382_s6 + $0x68] sm:$0xff] }
 0x100   : > { %3054 = vmatprep.mubr.f32.mxu0 %v4211_v55  ;;  %2029 = vmatprep.mubr.f32.mxu1 %v4412_v42  ;;  %v1716_v18 = vrot.slane %v3180_v8, 2 }
 0x101   : > { %3090 = vmatpush3.msra.mxu0 %v2751_v36  ;;  %v4444_v6 = vsel %vm1804_vm1, %v1713_v13, %v1763_v37  ;;  %v3184_v36 = vld [vmem:[%s3382_s6 + $0x98] sm:$0xff]  ;;  %v1772_v37 = vrot.slane %v3963_v40, 2 }
 0x102   : > { %v4430_v15 = vpop.f32.mrf.mxu1  ;;  %3091 = vmatprep.subr.mxu0 %v2750_v45  ;;  %v1863_v12 = vsel %vm1804_vm1, %v1668_v11, %v1716_v18  ;;  %v1722_v32 = vrot.slane %v3184_v36, 2  ;;  %v3185_v11 = vld [vmem:[%s3382_s6 + $0xa8] sm:$0xff] }
 0x103   : > { %3055 = vmatmul.mubr.f32.gmra.mxu0 %v4226_v23  ;;  %2030 = vmatmul.mubr.f32.gmra.mxu1 %v1806_v52  ;;  %v1677_v8 = vrot.slane %v3185_v11, 2 }
 0x104   : > { %3057 = vmatprep.mubr.f32.mxu0 %v4244_v2  ;;  %2034 = vmatprep.mubr.f32.mxu1 %v4427_v28  ;;  %v4438_v55 = vpop.f32.mrf.mxu1  ;;  %v2748_v2 = vld [vmem:[%s5112_s1 + $0x410] sm:$0xff]  ;;  %v1821_v40 = vsel %vm1804_vm1, %v1722_v32, %v1772_v37 }
 0x105   : > { %3092 = vmatpush3.msra.mxu0 %v2750_v45 }
 0x106   : > { %3093 = vmatprep.subr.mxu0 %v2749_v39 }
 0x107   : > { %3058 = vmatmul.mubr.f32.gmra.mxu0 %v4263_v19  ;;  %2035 = vmatmul.mubr.f32.gmra.mxu1 %v4397_v25  ;;  %v4448_v23 = vpop.f32.mrf.mxu1  ;;  %v1766_v19 = vrot.slane %v3889_v24, 2  ;;  %v1719_v24 = vrot.slane %v3182_v48, 2 }
 0x108   : > { %3060 = vmatprep.mubr.f32.mxu0 %v4281_v9  ;;  %2039 = vmatprep.mubr.f32.mxu1 %v4444_v6  ;;  %v2747_v9 = vld [vmem:[%s5112_s1 + $0x408] sm:$0xff] }
 0x109   : > { %v4455_v46 = vpop.f32.mrf.mxu1  ;;  %3094 = vmatpush3.msra.mxu0 %v2749_v39  ;;  %v1818_v4 = vsel %vm1804_vm1, %v1719_v24, %v1769_v26 }
 0x10a   : > { %3095 = vmatprep.subr.mxu0 %v2748_v2 }
 0x10b   : > { %3061 = vmatmul.mubr.f32.gmra.mxu0 %v4299_v10  ;;  %2040 = vmatmul.mubr.f32.gmra.mxu1 %v4412_v42  ;;  %v1815_v10 = vsel %vm1804_vm1, %v1716_v18, %v1766_v19 }
 0x10c   : > { %3063 = vmatprep.mubr.f32.mxu0 %v4319_v30  ;;  %2044 = vmatprep.mubr.f32.mxu1 %v1863_v12  ;;  %v4466_v3 = vpop.f32.mrf.mxu1  ;;  %v2746_v30 = vld [vmem:[%s5112_s1 + $0x400] sm:$0xff] }
 0x10d   : > { %3096 = vmatpush3.msra.mxu0 %v2748_v2 }
 0x10e   : > { %v4473_v52 = vpop.f32.mrf.mxu1  ;;  %3097 = vmatprep.subr.mxu0 %v2747_v9 }
 0x10f   : > { %3064 = vmatmul.mubr.f32.gmra.mxu0 %v4347_v50  ;;  %2045 = vmatmul.mubr.f32.gmra.mxu1 %v4427_v28  ;;  %v1866_v50 = vsel %vm1804_vm1, %v1671_v20, %v1719_v24 }
 0x110   : > { %3066 = vmatprep.mubr.f32.mxu0 %v3937_v43  ;;  %2049 = vmatprep.mubr.f32.mxu1 %v1815_v10  ;;  %v1674_v43 = vrot.slane %v3183_v38, 2 }
 0x111   : > { %v4485_v61 = vpop.f32.mrf.mxu1  ;;  %3098 = vmatpush3.msra.mxu0 %v2747_v9 }
 0x112   : > { %3099 = vmatprep.subr.mxu0 %v2746_v30 }
 0x113   : > { %3067 = vmatmul.mubr.f32.gmra.mxu0 %v1080_v1  ;;  %2050 = vmatmul.mubr.f32.gmra.mxu1 %v4444_v6  ;;  %v4491_v35 = vpop.f32.mrf.mxu1  ;;  %v3188_v1 = vld [vmem:[%s3382_s6 + $0xc8] sm:$0xff] }
 0x114   : > { %2054 = vmatprep.mubr.f32.mxu1 %v1866_v50  ;;  %3100 = vmatpush3.msra.mxu0 %v2746_v30 }
 0x115   : > { %3101 = vmatprep.mubr.f32.mxu0 %v4397_v25  ;;  %v1869_v25 = vsel %vm1804_vm1, %v1674_v43, %v1722_v32  ;;  %v1776_v32 = vrot.slane %v4033_v21, 2 }
 0x116   : > { %v470_v29 = vpop.f32.mrf.mxu0  ;;  %v4498_v56 = vpop.f32.mrf.mxu1 }
 0x117   : > { %v4501_v51 = vadd.f32 %v4361_v44, %v470_v29  ;;  %2055 = vmatmul.mubr.f32.gmra.mxu1 %v1863_v12  ;;  %3102 = vmatmul.mubr.f32.vlgmr.msra.gmra.mxu0 %v4412_v42 }
 0x118   : > { %v472_v13 = vpop.f32.mrf.mxu0  ;;  %v4504_v45 = vpop.f32.mrf.mxu1  ;;  %2059 = vmatprep.mubr.f32.mxu1 %v1818_v4  ;;  %3104 = vmatprep.mubr.f32.mxu0 %v4427_v28  ;;  %v3186_v28 = vld [vmem:[%s3382_s6 + $0xb0] sm:$0xff] }
 0x119   : > { %5115 = vst [vmem:[#allocation2_spill] sm:$0xff] %v4501_v51  ;;  %v1725_v18 = vrot.slane %v3186_v28, 2  ;;  %v3190_v13 = vld [vmem:[%s3382_s6 + $0xe0] sm:$0xff]  ;;  %v1779_v28 = vrot.slane %v4067_v62, 2 }
 0x11a   : > { %v475_v39 = vpop.f32.mrf.mxu0  ;;  %v1731_v37 = vrot.slane %v3190_v13, 2 }
 0x11b   : > { %v4511_v44 = vadd.f32 %v4349_v49, %v475_v39  ;;  %v4513_v0 = vpop.f32.mrf.mxu1  ;;  %2060 = vmatmul.mubr.f32.gmra.mxu1 %v1815_v10  ;;  %3105 = vmatmul.mubr.f32.gmra.mxu0 %v4444_v6  ;;  %v1872_v41 = vsel %vm1804_vm1, %v1677_v8, %v1725_v18  ;;  %v1824_v57 = vsel %vm1804_vm1, %v1725_v18, %v1775_v31  ;;  %v3191_v18 = vld [vmem:[%s3382_s6 + $0xf0] sm:$0xff] }
 0x11c   : > { %v477_v42 = vpop.f32.mrf.mxu0  ;;  %2064 = vmatprep.mubr.f32.mxu1 %v1869_v25  ;;  %3107 = vmatprep.mubr.f32.mxu0 %v1863_v12 }
 0x11d   : > { %v4518_v2 = vpop.f32.mrf.mxu1 }
 0x11e   : > { %v480_v19 = vpop.f32.mrf.mxu0 }
 0x11f   : > { %v4523_v49 = vadd.f32 %v4381_v63, %v480_v19  ;;  %v4525_v9 = vpop.f32.mrf.mxu1  ;;  %2065 = vmatmul.mubr.f32.gmra.mxu1 %v1866_v50  ;;  %3108 = vmatmul.mubr.f32.gmra.mxu0 %v1815_v10  ;;  %v3187_v10 = vld [vmem:[%s3382_s6 + $0xc0] sm:$0xff]  ;;  %v1686_v19 = vrot.slane %v3191_v18, 2 }
 0x120   : > { %v482_v6 = vpop.f32.mrf.mxu0  ;;  %2069 = vmatprep.mubr.f32.mxu1 %v1821_v40  ;;  %3110 = vmatprep.mubr.f32.mxu0 %v1866_v50  ;;  %v1680_v30 = vrot.slane %v3187_v10, 2  ;;  %v1728_v50 = vrot.slane %v3188_v1, 2  ;;  %v1782_v1 = vrot.slane %v4103_v58, 2 }
 0x121   : > { %5116 = vst [vmem:[#allocation3_spill] sm:$0xff] %v4523_v49  ;;  %v4527_v12 = vpop.f32.mrf.mxu1  ;;  %v3192_v6 = vld [vmem:[%s3382_s6 + $0xf8] sm:$0xff] }
 0x122   : > { %v485_v20 = vpop.f32.mrf.mxu0  ;;  %v1825_v8 = vsel %vm1804_vm1, %v1728_v50, %v1776_v32  ;;  %v1734_v31 = vrot.slane %v3192_v6, 2 }
 0x123   : > { %v4533_v63 = vadd.f32 %v4367_v60, %v485_v20  ;;  %v4535_v48 = vpop.f32.mrf.mxu1  ;;  %2070 = vmatmul.mubr.f32.gmra.mxu1 %v1818_v4  ;;  %3111 = vmatmul.mubr.f32.gmra.mxu0 %v1818_v4  ;;  %v3189_v4 = vld [vmem:[%s3382_s6 + $0xd8] sm:$0xff] }
 0x124   : > { %v487_v24 = vpop.f32.mrf.mxu0  ;;  %2074 = vmatprep.mubr.f32.mxu1 %v1872_v41  ;;  %3113 = vmatprep.mubr.f32.mxu0 %v1869_v25  ;;  %v1683_v29 = vrot.slane %v3189_v4, 2 }
 0x125   : > { %5117 = vst [vmem:[#allocation4_spill] sm:$0xff] %v4533_v63  ;;  %v4539_v26 = vpop.f32.mrf.mxu1 }
 0x126   : > { %v490_v60 = vpop.f32.mrf.mxu0 }
 0x127   : > { %v4544_v38 = vadd.f32 %v4400_v7, %v490_v60  ;;  %v4546_v43 = vpop.f32.mrf.mxu1  ;;  %2075 = vmatmul.mubr.f32.gmra.mxu1 %v1869_v25  ;;  %3114 = vmatmul.mubr.f32.gmra.mxu0 %v1821_v40  ;;  %v1875_v7 = vsel %vm1804_vm1, %v1680_v30, %v1728_v50  ;;  %v4579_v30 = vsel %vm1804_vm1, %v1731_v37, %v1779_v28  ;;  %v3193_v50 = vld [vmem:[%s3382_s6 + $0x108] sm:$0xff] }
 0x128   : > { %v492_v36 = vpop.f32.mrf.mxu0  ;;  %2079 = vmatprep.mubr.f32.mxu1 %v1824_v57  ;;  %3116 = vmatprep.mubr.f32.mxu0 %v1872_v41  ;;  %v1689_v60 = vrot.slane %v3193_v50, 2  ;;  %v3196_v28 = vld [vmem:[%s3382_s6 + $0x128] sm:$0xff] }
 0x129   : > { %5118 = vst [vmem:[#allocation5_spill] sm:$0xff] %v4544_v38  ;;  %v4551_v39 = vpop.f32.mrf.mxu1  ;;  %v3194_v36 = vld [vmem:[%s3382_s6 + $0x110] sm:$0xff]  ;;  %v1740_v18 = vrot.slane %v3196_v28, 2 }
 0x12a   : > { %v495_v42 = vpop.f32.mrf.mxu0 }
 0x12b   : > { %v4556_v25 = vadd.f32 %v4393_v53, %v495_v42  ;;  %v4558_v11 = vpop.f32.mrf.mxu1  ;;  %2080 = vmatmul.mubr.f32.gmra.mxu1 %v1821_v40  ;;  %3117 = vmatmul.mubr.f32.gmra.mxu0 %v1824_v57  ;;  %v4569_v40 = vsel %vm1804_vm1, %v1683_v29, %v1731_v37  ;;  %v4600_v37 = vsel %vm1804_vm1, %v1734_v31, %v1782_v1  ;;  %v1785_v42 = vrot.slane %v4139_v14, 2  ;;  %v3197_v1 = vld [vmem:[%s3382_s6 + $0x138] sm:$0xff] }
 0x12c   : > { %v497_v21 = vpop.f32.mrf.mxu0  ;;  %2084 = vmatprep.mubr.f32.mxu1 %v1875_v7  ;;  %3119 = vmatprep.mubr.f32.mxu0 %v1875_v7  ;;  %v1695_v50 = vrot.slane %v3197_v1, 2 }
 0x12d   : > { %5119 = vst [vmem:[#allocation6_spill] sm:$0xff] %v4556_v25  ;;  %v4565_v53 = vpop.f32.mrf.mxu1  ;;  %v3195_v21 = vld [vmem:[%s3382_s6 + $0x120] sm:$0xff] }
 0x12e   : > { %v500_v20 = vpop.f32.mrf.mxu0 }
 0x12f   : > { %v4572_v24 = vadd.f32 %v4418_v22, %v500_v20  ;;  %v4574_v10 = vpop.f32.mrf.mxu1  ;;  %2085 = vmatmul.mubr.f32.gmra.mxu1 %v1872_v41  ;;  %3120 = vmatmul.mubr.f32.gmra.mxu0 %v1825_v8  ;;  %v1737_v22 = vrot.slane %v3194_v36, 2  ;;  %v4588_v41 = vsel %vm1804_vm1, %v1686_v19, %v1734_v31 }
 0x130   : > { %v502_v62 = vpop.f32.mrf.mxu0  ;;  %2089 = vmatprep.mubr.f32.mxu1 %v1825_v8  ;;  %3122 = vmatprep.mubr.f32.mxu0 %v4569_v40 }
 0x131   : > { %5120 = vst [vmem:[#allocation7_spill] sm:$0xff] %v4572_v24  ;;  %v4584_v32 = vpop.f32.mrf.mxu1  ;;  %v4609_v19 = vsel %vm1804_vm1, %v1689_v60, %v1737_v22  ;;  %v4621_v31 = vsel %vm1804_vm1, %v1737_v22, %v1785_v42  ;;  %v1788_v62 = vrot.slane %v4169_v54, 2  ;;  %v3198_v60 = vld [vmem:[%s3382_s6 + $0x140] sm:$0xff]  ;;  %v1791_v42 = vrot.slane %v4199_v33, 2 }
 0x132   : > { %v505_v4 = vpop.f32.mrf.mxu0 }
 0x133   : > { %v4591_v29 = vadd.f32 %v4414_v16, %v505_v4  ;;  %v4593_v13 = vpop.f32.mrf.mxu1  ;;  %2090 = vmatmul.mubr.f32.gmra.mxu1 %v1824_v57  ;;  %3123 = vmatmul.mubr.f32.gmra.mxu0 %v4579_v30  ;;  %v1692_v16 = vrot.slane %v3195_v21, 2  ;;  %v4640_v22 = vsel %vm1804_vm1, %v1740_v18, %v1788_v62  ;;  %v1794_v62 = vrot.slane %v4229_v47, 2 }
 0x134   : > { %v507_v58 = vpop.f32.mrf.mxu0  ;;  %2094 = vmatprep.mubr.f32.mxu1 %v4569_v40  ;;  %3125 = vmatprep.mubr.f32.mxu0 %v4588_v41 }
 0x135   : > { %5121 = vst [vmem:[#allocation8_spill] sm:$0xff] %v4591_v29  ;;  %v4605_v57 = vpop.f32.mrf.mxu1 }
 0x137   : > { %v510_v6 = vpop.f32.mrf.mxu0  ;;  %v4611_v20 = vpop.f32.mrf.mxu1  ;;  %2095 = vmatmul.mubr.f32.gmra.mxu1 %v1875_v7  ;;  %3126 = vmatmul.mubr.f32.gmra.mxu0 %v4600_v37  ;;  %v1743_v7 = vrot.slane %v3198_v60, 2 }
 0x138   : > { %v4615_v14 = vadd.f32 %v4438_v55, %v510_v6  ;;  %2099 = vmatprep.mubr.f32.mxu1 %v4579_v30  ;;  %3128 = vmatprep.mubr.f32.mxu0 %v4609_v19  ;;  %v4628_v55 = vsel %vm1804_vm1, %v1692_v16, %v1740_v18  ;;  %v3199_v16 = vld [vmem:[%s3382_s6 + $0x150] sm:$0xff]  ;;  %v3200_v6 = vld [vmem:[%s3382_s6 + $0x158] sm:$0xff] }
 0x139   : > { %v512_v36 = vpop.f32.mrf.mxu0  ;;  %v1246_v4 = vpop.f32.mrf.mxu1  ;;  %v1698_v28 = vrot.slane %v3199_v16, 2  ;;  %v4660_v18 = vsel %vm1804_vm1, %v1743_v7, %v1791_v42  ;;  %v3202_v16 = vld [vmem:[%s3382_s6 + $0x170] sm:$0xff]  ;;  %v1797_v42 = vrot.slane %v4266_v59, 2 }
 0x13a   : > { %5122 = vst [vmem:[#allocation9_spill] sm:$0xff] %v4615_v14 }
 0x13b   : > { %v515_v58 = vpop.f32.mrf.mxu0  ;;  %v4630_v21 = vpop.f32.mrf.mxu1  ;;  %2100 = vmatmul.mubr.f32.gmra.mxu1 %v1825_v8  ;;  %3129 = vmatmul.mubr.f32.gmra.mxu0 %v4621_v31  ;;  %v1746_v8 = vrot.slane %v3200_v6, 2 }
 0x13c   : > { %v4634_v54 = vadd.f32 %v4430_v15, %v515_v58  ;;  %2104 = vmatprep.mubr.f32.mxu1 %v4588_v41  ;;  %3131 = vmatprep.mubr.f32.mxu0 %v4628_v55  ;;  %v4647_v15 = vsel %vm1804_vm1, %v1695_v50, %v1743_v7  ;;  %v3201_v50 = vld [vmem:[%s3382_s6 + $0x168] sm:$0xff] }
 0x13d   : > { %v517_v1 = vpop.f32.mrf.mxu0  ;;  %v1251_v60 = vpop.f32.mrf.mxu1  ;;  %v1701_v58 = vrot.slane %v3201_v50, 2  ;;  %v4680_v7 = vsel %vm1804_vm1, %v1746_v8, %v1794_v62  ;;  %v1800_v62 = vrot.slane %v4302_v27, 2 }
 0x13e   : > { %5123 = vst [vmem:[#allocation10_spill] sm:$0xff] %v4634_v54 }
 0x13f   : > { %v520_v36 = vpop.f32.mrf.mxu0  ;;  %v4649_v4 = vpop.f32.mrf.mxu1  ;;  %2105 = vmatmul.mubr.f32.gmra.mxu1 %v4569_v40  ;;  %3132 = vmatmul.mubr.f32.gmra.mxu0 %v4640_v22  ;;  %v1749_v40 = vrot.slane %v3202_v16, 2  ;;  %v3204_v16 = vld [vmem:[%s3382_s6 + $0x188] sm:$0xff] }
 0x140   : > { %5124 = vst [vmem:[#allocation11_spill] sm:$0xff] %v4649_v4  ;;  %v4654_v33 = vadd.f32 %v4455_v46, %v520_v36  ;;  %2109 = vmatprep.mubr.f32.mxu1 %v4600_v37  ;;  %3134 = vmatprep.mubr.f32.mxu0 %v4647_v15  ;;  %v4667_v46 = vsel %vm1804_vm1, %v1698_v28, %v1746_v8  ;;  %v3203_v28 = vld [vmem:[%s3382_s6 + $0x180] sm:$0xff] }
 0x141   : > { %v522_v6 = vpop.f32.mrf.mxu0  ;;  %v1256_v1 = vpop.f32.mrf.mxu1  ;;  %v1704_v50 = vrot.slane %v3203_v28, 2  ;;  %v4700_v59 = vsel %vm1804_vm1, %v1749_v40, %v1797_v42 }
 0x142   : > { %5125 = vst [vmem:[#allocation12_spill] sm:$0xff] %v4654_v33  ;;  %v1752_v6 = vrot.slane %v3204_v16, 2 }
 0x143   : > { %v525_v60 = vpop.f32.mrf.mxu0  ;;  %v4669_v36 = vpop.f32.mrf.mxu1  ;;  %2110 = vmatmul.mubr.f32.gmra.mxu1 %v4579_v30  ;;  %3135 = vmatmul.mubr.f32.gmra.mxu0 %v4660_v18 }
 0x144   : > { %5126 = vst [vmem:[#allocation13_spill] sm:$0xff] %v4669_v36  ;;  %v4674_v47 = vadd.f32 %v4448_v23, %v525_v60  ;;  %2114 = vmatprep.mubr.f32.mxu1 %v4609_v19  ;;  %3137 = vmatprep.mubr.f32.mxu0 %v4667_v46  ;;  %v4687_v23 = vsel %vm1804_vm1, %v1701_v58, %v1749_v40 }
 0x145   : > { %v527_v30 = vpop.f32.mrf.mxu0  ;;  %v1261_v1 = vpop.f32.mrf.mxu1  ;;  %v1849_v27 = vsel %vm1804_vm1, %v1752_v6, %v1800_v62 }
 0x146   : > { %5127 = vst [vmem:[#allocation14_spill] sm:$0xff] %v4674_v47 }
 0x147   : > { %v530_v60 = vpop.f32.mrf.mxu0  ;;  %v4689_v33 = vpop.f32.mrf.mxu1  ;;  %2115 = vmatmul.mubr.f32.gmra.mxu1 %v4588_v41  ;;  %3138 = vmatmul.mubr.f32.gmra.mxu0 %v4680_v7  ;;  %v1897_v41 = vsel %vm1804_vm1, %v1704_v50, %v1752_v6 }
 0x148   : > { %5128 = vst [vmem:[#allocation15_spill] sm:$0xff] %v4689_v33  ;;  %v4694_v8 = vadd.f32 %v4473_v52, %v530_v60  ;;  %2119 = vmatprep.mubr.f32.mxu1 %v4621_v31  ;;  %3140 = vmatprep.mubr.f32.mxu0 %v4687_v23 }
 0x149   : > { %v532_v58 = vpop.f32.mrf.mxu0  ;;  %v1266_v28 = vpop.f32.mrf.mxu1 }
 0x14a   : > { %5129 = vst [vmem:[#allocation16_spill] sm:$0xff] %v4694_v8 }
 0x14b   : > { %v535_v16 = vpop.f32.mrf.mxu0  ;;  %v4705_v30 = vpop.f32.mrf.mxu1  ;;  %2120 = vmatmul.mubr.f32.gmra.mxu1 %v4600_v37  ;;  %3141 = vmatmul.mubr.f32.gmra.mxu0 %v4700_v59 }
 0x14c   : > { %5130 = vst [vmem:[#allocation17_spill] sm:$0xff] %v4705_v30  ;;  %v4710_v52 = vadd.f32 %v4466_v3, %v535_v16  ;;  %2124 = vmatprep.mubr.f32.mxu1 %v4628_v55  ;;  %3143 = vmatprep.mubr.f32.mxu0 %v1897_v41 }
 0x14d   : > { %v537_v40 = vpop.f32.mrf.mxu0  ;;  %v1271_v42 = vpop.f32.mrf.mxu1 }
 0x14e   : > { %5131 = vst [vmem:[#allocation18_spill] sm:$0xff] %v4710_v52 }
 0x14f   : > { %v540_v1 = vpop.f32.mrf.mxu0  ;;  %v4715_v50 = vpop.f32.mrf.mxu1  ;;  %2125 = vmatmul.mubr.f32.gmra.mxu1 %v4609_v19  ;;  %3144 = vmatmul.mubr.f32.gmra.mxu0 %v1849_v27 }
 0x150   : > { %5132 = vst [vmem:[#allocation19_spill] sm:$0xff] %v4715_v50  ;;  %v4719_v37 = vadd.f32 %v4491_v35, %v540_v1  ;;  %2129 = vmatprep.mubr.f32.mxu1 %v4640_v22  ;;  %3146 = vmatprep.mubr.f32.mxu0 %v4336_v5 }
 0x151   : > { %v542_v3 = vpop.f32.mrf.mxu0  ;;  %v1276_v60 = vpop.f32.mrf.mxu1 }
 0x152   : > { %5133 = vst [vmem:[#allocation20_spill] sm:$0xff] %v4719_v37 }
 0x153   : > { %v4723_v58 = vpop.f32.mrf.mxu0  ;;  %v4725_v17 = vpop.f32.mrf.mxu1  ;;  %2130 = vmatmul.mubr.f32.gmra.mxu1 %v4621_v31  ;;  %3147 = vmatmul.mubr.f32.gmra.mxu0 %v4342_v34 }
 0x154   : > { %5134 = vst [vmem:[#allocation21_spill] sm:$0xff] %v4725_v17  ;;  %2134 = vmatprep.mubr.f32.mxu1 %v4647_v15 }
 0x155   : > { %v547_v19 = vpop.f32.mrf.mxu0  ;;  %v1281_v6 = vpop.f32.mrf.mxu1 }
 0x157   : > { %v550_v35 = vpop.f32.mrf.mxu0  ;;  %v4730_v62 = vpop.f32.mrf.mxu1  ;;  %2135 = vmatmul.mubr.f32.gmra.mxu1 %v4628_v55 }
 0x158   : > { %5135 = vst [vmem:[#allocation22_spill] sm:$0xff] %v4730_v62  ;;  %v4734_v5 = vadd.f32 %v4504_v45, %v550_v35  ;;  %2139 = vmatprep.mubr.f32.mxu1 %v4660_v18 }
 0x159   : > { %v552_v28 = vpop.f32.mrf.mxu0  ;;  %v1286_v16 = vpop.f32.mrf.mxu1 }
 0x15a   : > { %5136 = vst [vmem:[#allocation23_spill] sm:$0xff] %v4734_v5 }
 0x15b   : > { %v4737_v40 = vpop.f32.mrf.mxu0  ;;  %v4739_v31 = vpop.f32.mrf.mxu1  ;;  %2140 = vmatmul.mubr.f32.gmra.mxu1 %v4640_v22 }
 0x15c   : > { %5137 = vst [vmem:[#allocation24_spill] sm:$0xff] %v4739_v31  ;;  %2144 = vmatprep.mubr.f32.mxu1 %v4667_v46 }
 0x15d   : > { %v557_v34 = vpop.f32.mrf.mxu0  ;;  %v1291_v42 = vpop.f32.mrf.mxu1 }
 0x15f   : > { %v4743_v1 = vpop.f32.mrf.mxu0  ;;  %v4745_v55 = vpop.f32.mrf.mxu1  ;;  %2145 = vmatmul.mubr.f32.gmra.mxu1 %v4647_v15 }
 0x160   : > { %5138 = vst [vmem:[#allocation25_spill] sm:$0xff] %v4745_v55  ;;  %2149 = vmatprep.mubr.f32.mxu1 %v4680_v7 }
 0x161   : > { %v562_v45 = vpop.f32.mrf.mxu0  ;;  %v1296_v3 = vpop.f32.mrf.mxu1 }
 0x163   : > { %v4749_v60 = vpop.f32.mrf.mxu0  ;;  %v4751_v19 = vpop.f32.mrf.mxu1  ;;  %2150 = vmatmul.mubr.f32.gmra.mxu1 %v4660_v18 }
 0x164   : > { %5139 = vst [vmem:[#allocation26_spill] sm:$0xff] %v4751_v19  ;;  %2154 = vmatprep.mubr.f32.mxu1 %v4687_v23  ;;  %v791_v51 = vadd.f32 %v4513_v0, %v4749_v60 }
 0x165   : > { %v567_v22 = vpop.f32.mrf.mxu0  ;;  %v1301_v6 = vpop.f32.mrf.mxu1 }
 0x167   : > { %v4755_v35 = vpop.f32.mrf.mxu0  ;;  %v4757_v28 = vpop.f32.mrf.mxu1  ;;  %2155 = vmatmul.mubr.f32.gmra.mxu1 %v4667_v46 }
 0x168   : > { %5140 = vst [vmem:[#allocation27_spill] sm:$0xff] %v4757_v28  ;;  %2159 = vmatprep.mubr.f32.mxu1 %v4700_v59 }
 0x169   : > { %v572_v15 = vpop.f32.mrf.mxu0  ;;  %v1306_v16 = vpop.f32.mrf.mxu1 }
 0x16b   : > { %v4761_v34 = vpop.f32.mrf.mxu0  ;;  %v4763_v42 = vpop.f32.mrf.mxu1  ;;  %2160 = vmatmul.mubr.f32.gmra.mxu1 %v4680_v7 }
 0x16c   : > { %5141 = vst [vmem:[#allocation28_spill] sm:$0xff] %v4763_v42  ;;  %2164 = vmatprep.mubr.f32.mxu1 %v1897_v41 }
 0x16d   : > { %v577_v18 = vpop.f32.mrf.mxu0  ;;  %v1311_v45 = vpop.f32.mrf.mxu1 }
 0x16f   : > { %v4766_v3 = vpop.f32.mrf.mxu0  ;;  %v4768_v22 = vpop.f32.mrf.mxu1  ;;  %2165 = vmatmul.mubr.f32.gmra.mxu1 %v4687_v23 }
 0x170   : > { %5142 = vst [vmem:[#allocation29_spill] sm:$0xff] %v4768_v22  ;;  %2169 = vmatprep.mubr.f32.mxu1 %v1849_v27 }
 0x171   : > { %v582_v46 = vpop.f32.mrf.mxu0  ;;  %v1316_v6 = vpop.f32.mrf.mxu1 }
 0x173   : > { %v4771_v15 = vpop.f32.mrf.mxu0  ;;  %v4773_v16 = vpop.f32.mrf.mxu1  ;;  %2170 = vmatmul.mubr.f32.gmra.mxu1 %v4700_v59 }
 0x175   : > { %v587_v5 = vpop.f32.mrf.mxu0  ;;  %v1321_v7 = vpop.f32.mrf.mxu1 }
 0x177   : > { %v4776_v41 = vpop.f32.mrf.mxu0  ;;  %v4778_v18 = vpop.f32.mrf.mxu1 }
 0x178   : > { %5143 = vst [vmem:[#allocation30_spill] sm:$0xff] %v4778_v18 }
 0x179   : > { %v592_v45 = vpop.f32.mrf.mxu0  ;;  %v1326_v37 = vpop.f32.mrf.mxu1 }
 0x17b   : > { %v4780_v22 = vpop.f32.mrf.mxu0  ;;  %v4782_v23 = vpop.f32.mrf.mxu1 }
 0x17d   : > { %v597_v27 = vpop.f32.mrf.mxu0  ;;  %v1331_v46 = vpop.f32.mrf.mxu1 }
 0x17f   : > { %v4784_v6 = vpop.f32.mrf.mxu0  ;;  %v4786_v8 = vpop.f32.mrf.mxu1 }
 0x181   : > { %v602_v28 = vpop.f32.mrf.mxu0  ;;  %v1336_v59 = vpop.f32.mrf.mxu1 }
 0x183   : > { %v4788_v5 = vpop.f32.mrf.mxu0  ;;  %v4790_v7 = vpop.f32.mrf.mxu1 }
 0x185   : > { %v607_v52 = vpop.f32.mrf.mxu0  ;;  %v1341_v18 = vpop.f32.mrf.mxu1 }
 0x187   : > { %v4792_v45 = vpop.f32.mrf.mxu0  ;;  %v4794_v37 = vpop.f32.mrf.mxu1 }
 0x189   : > { %v612_v42 = vpop.f32.mrf.mxu0  ;;  %v1346_v55 = vpop.f32.mrf.mxu1 }
 0x18b   : > { %v4796_v27 = vpop.f32.mrf.mxu0  ;;  %v4798_v46 = vpop.f32.mrf.mxu1 }
 0x18d   : > { %v617_v47 = vpop.f32.mrf.mxu0  ;;  %v1351_v19 = vpop.f32.mrf.mxu1 }
 0x18f   : > { %v4800_v28 = vpop.f32.mrf.mxu0  ;;  %v4802_v59 = vpop.f32.mrf.mxu1 }
 0x191   : > { %v622_v14 = vpop.f32.mrf.mxu0  ;;  %v1356_v62 = vpop.f32.mrf.mxu1 }
 0x193   : > { %v4804_v52 = vpop.f32.mrf.mxu0  ;;  %v4806_v18 = vpop.f32.mrf.mxu1 }
 0x195   : > { %v627_v54 = vpop.f32.mrf.mxu0  ;;  %v1361_v31 = vpop.f32.mrf.mxu1 }
 0x197   : > { %v4808_v42 = vpop.f32.mrf.mxu1  ;;  %v4810_v55 = vpop.f32.mrf.mxu0 }
 0x199   : > { %v1366_v24 = vpop.f32.mrf.mxu1  ;;  %v4812_v50 = vpop.f32.mrf.mxu0 }
 0x19b   : > { %v4814_v47 = vpop.f32.mrf.mxu1  ;;  %v4816_v19 = vpop.f32.mrf.mxu0 }
 0x19c   : > { %5144 = vst [vmem:[#allocation31_spill] sm:$0xff] %v4816_v19 }
 0x19d   : > { %v1371_v29 = vpop.f32.mrf.mxu1  ;;  %v4818_v14 = vpop.f32.mrf.mxu0 }
 0x19e   : > { %5145 = vst [vmem:[#allocation32_spill] sm:$0xff] %v4818_v14 }
 0x19f   : > { %v4820_v62 = vpop.f32.mrf.mxu1  ;;  %v4822_v17 = vpop.f32.mrf.mxu0 }
 0x1a0   : > { %5146 = vst [vmem:[#allocation33_spill] sm:$0xff] %v4822_v17 }
 0x1a1   : > { %v1376_v54 = vpop.f32.mrf.mxu1  ;;  %v4824_v31 = vpop.f32.mrf.mxu0 }
 0x1a2   : > { %5147 = vst [vmem:[#allocation34_spill] sm:$0xff] %v4824_v31 }
 0x1a3   : > { %v4826_v38 = vpop.f32.mrf.mxu1  ;;  %v4828_v33 = vpop.f32.mrf.mxu0 }
 0x1a4   : > { %5148 = vst [vmem:[#allocation35_spill] sm:$0xff] %v4828_v33 }
 0x1a5   : > { %v1381_v24 = vpop.f32.mrf.mxu1  ;;  %v4830_v25 = vpop.f32.mrf.mxu0 }
 0x1a6   : > { %5149 = vst [vmem:[#allocation36_spill] sm:$0xff] %v4830_v25  ;;  %v771_v24 = vadd.f32 %v4485_v61, %v4723_v58 }
 0x1a7   : > { %v4832_v30 = vpop.f32.mrf.mxu1  ;;  %v4834_v49 = vpop.f32.mrf.mxu0 }
 0x1a8   : > { %5150 = vst [vmem:[#allocation37_spill] sm:$0xff] %v4834_v49 }
 0x1a9   : > { %v1386_v29 = vpop.f32.mrf.mxu1  ;;  %v4836_v14 = vpop.f32.mrf.mxu0 }
 0x1aa   : > { %5151 = vst [vmem:[#allocation38_spill] sm:$0xff] %v4836_v14  ;;  %v4855_v29 = vld [vmem:[%s5113_s2] ss:$0 sm:$0xff] }
 0x1ab   : > { %v4838_v4 = vpop.f32.mrf.mxu1  ;;  %v4840_v17 = vpop.f32.mrf.mxu0 }
 0x1ac   : > { %5152 = vst [vmem:[#allocation39_spill] sm:$0xff] %v4840_v17  ;;  %v781_v17 = vadd.f32 %v4498_v56, %v4737_v40 }
 0x1ad   : > { %v1391_v54 = vpop.f32.mrf.mxu1  ;;  %v4842_v31 = vpop.f32.mrf.mxu0 }
 0x1ae   : > { %5153 = vst [vmem:[#allocation40_spill] sm:$0xff] %v4842_v31  ;;  %v869_v31 = vadd.f32 %v4855_v29, %v771_v24  ;;  %v871_v36 = vadd.f32 %v4855_v29, %v781_v17  ;;  %v801_v17 = vadd.f32 %v4525_v9, %v4761_v34  ;;  %v811_v9 = vadd.f32 %v4535_v48, %v4771_v15 }
 0x1af   : > { %v4844_v63 = vpop.f32.mrf.mxu1  ;;  %v4846_v33 = vpop.f32.mrf.mxu0  ;;  %v821_v15 = vadd.f32 %v4546_v43, %v4780_v22  ;;  %v831_v22 = vadd.f32 %v4558_v11, %v4788_v5  ;;  %v841_v5 = vadd.f32 %v4574_v10, %v4796_v27  ;;  %v851_v27 = vadd.f32 %v4593_v13, %v4804_v52 }
 0x1b0   : > { %5154 = vst [vmem:[#allocation41_spill] sm:$0xff] %v4844_v63  ;;  %5155 = vst [vmem:[#allocation42_spill] sm:$0xff] %v4846_v33  ;;  %v877_v48 = vadd.f32 %v4855_v29, %v811_v9 }
 0x1b1   : > { %v1396_v25 = vpop.f32.mrf.mxu1  ;;  %v4850_v19 = vpop.f32.mrf.mxu0  ;;  %v879_v43 = vadd.f32 %v4855_v29, %v821_v15  ;;  %v881_v11 = vadd.f32 %v4855_v29, %v831_v22  ;;  %v883_v10 = vadd.f32 %v4855_v29, %v841_v5  ;;  %v885_v13 = vadd.f32 %v4855_v29, %v851_v27 }
 0x1b2   : > { %5156 = vst [vmem:[#allocation43_spill] sm:$0xff] %v4850_v19 }
 0x1b3   : > { %v4857_v14 = vpop.f32.mrf.mxu1  ;;  %v3044_v54 = vpop.f32.mrf.mxu0 }
 0x1b4   : > { %v1545_v33 = vadd.f32 %v3044_v54, %v4773_v16 }
 0x1b5   : > { %v1401_v49 = vpop.f32.mrf.mxu1  ;;  %v4863_v61 = vpop.f32.mrf.mxu0 }
 0x1b6   : > { %v4865_v25 = vadd.f32 %v1545_v33, %v869_v31  ;;  %v786_v49 = vadd.f32 %v4518_v2, %v4743_v1  ;;  %v873_v31 = vadd.f32 %v4855_v29, %v791_v51  ;;  %v875_v51 = vadd.f32 %v4855_v29, %v801_v17 }
 0x1b7   : > { %v3047_v58 = vpop.f32.mrf.mxu0  ;;  %v4867_v19 = vpop.f32.mrf.mxu1 }
 0x1b8   : > { %v1555_v24 = vadd.f32 %v3047_v58, %v4782_v23  ;;  %v872_v54 = vadd.f32 %v4855_v29, %v786_v49  ;;  %v796_v58 = vadd.f32 %v4527_v12, %v4755_v35  ;;  %v806_v35 = vadd.f32 %v4539_v26, %v4766_v3 }
 0x1b9   : > { %v4873_v63 = vpop.f32.mrf.mxu0  ;;  %v2018_v56 = vpop.f32.mrf.mxu1  ;;  %v816_v3 = vadd.f32 %v4551_v39, %v4776_v41  ;;  %v826_v41 = vadd.f32 %v4565_v53, %v4784_v6  ;;  %v836_v6 = vadd.f32 %v4584_v32, %v4792_v45  ;;  %v846_v45 = vadd.f32 %v4605_v57, %v4800_v28 }
 0x1ba   : > { %v4877_v40 = vadd.f32 %v1555_v24, %v871_v36  ;;  %v874_v12 = vadd.f32 %v4855_v29, %v796_v58  ;;  %v876_v26 = vadd.f32 %v4855_v29, %v806_v35  ;;  %v855_v57 = vadd.f32 %v4855_v29, %v4511_v44  ;;  %v5159_v44 = vld [vmem:[#allocation13_spill] sm:$0xff] }
 0x1bb   : > { %v3050_v33 = vpop.f32.mrf.mxu0  ;;  %v4879_v16 = vpop.f32.mrf.mxu1  ;;  %v878_v39 = vadd.f32 %v4855_v29, %v816_v3  ;;  %v880_v53 = vadd.f32 %v4855_v29, %v826_v41  ;;  %v882_v32 = vadd.f32 %v4855_v29, %v836_v6  ;;  %v884_v22 = vadd.f32 %v4855_v29, %v846_v45  ;;  %v5163_v6 = vld [vmem:[#allocation32_spill] sm:$0xff]  ;;  %v5166_v45 = vld [vmem:[#allocation33_spill] sm:$0xff] }
 0x1bc   : > { %v1565_v0 = vadd.f32 %v3050_v33, %v4790_v7 }
 0x1bd   : > { %v1559_v60 = vpop.f32.mrf.mxu0  ;;  %v2023_v23 = vpop.f32.mrf.mxu1 }
 0x1be   : > { %v4888_v2 = vadd.f32 %v1565_v0, %v873_v31  ;;  %v1560_v36 = vadd.f32 %v1559_v60, %v4786_v8 }
 0x1bf   : > { %v3053_v1 = vpop.f32.mrf.mxu0  ;;  %v4891_v24 = vpop.f32.mrf.mxu1 }
 0x1c0   : > { %v4896_v34 = vadd.f32 %v1560_v36, %v872_v54  ;;  %v1575_v7 = vadd.f32 %v3053_v1, %v4798_v46 }
 0x1c1   : > { %v1569_v56 = vpop.f32.mrf.mxu0  ;;  %v2028_v49 = vpop.f32.mrf.mxu1 }
 0x1c2   : > { %v4902_v8 = vadd.f32 %v1575_v7, %v875_v51  ;;  %v1570_v33 = vadd.f32 %v1569_v56, %v4794_v37 }
 0x1c3   : > { %v3056_v31 = vpop.f32.mrf.mxu0  ;;  %v4905_v17 = vpop.f32.mrf.mxu1 }
 0x1c4   : > { %v4910_v46 = vadd.f32 %v1570_v33, %v874_v12  ;;  %v1585_v0 = vadd.f32 %v3056_v31, %v4806_v18 }
 0x1c5   : > { %v1579_v60 = vpop.f32.mrf.mxu0  ;;  %v2033_v23 = vpop.f32.mrf.mxu1 }
 0x1c6   : > { %v4916_v37 = vadd.f32 %v1585_v0, %v877_v48  ;;  %v1580_v54 = vadd.f32 %v1579_v60, %v4802_v59 }
 0x1c7   : > { %v3059_v58 = vpop.f32.mrf.mxu0  ;;  %v4919_v36 = vpop.f32.mrf.mxu1 }
 0x1c8   : > { %v4924_v18 = vadd.f32 %v1580_v54, %v876_v26  ;;  %v1595_v1 = vadd.f32 %v3059_v58, %v4814_v47 }
 0x1c9   : > { %v1589_v51 = vpop.f32.mrf.mxu0  ;;  %v2038_v9 = vpop.f32.mrf.mxu1 }
 0x1ca   : > { %v4930_v59 = vadd.f32 %v1595_v1, %v879_v43  ;;  %v1590_v7 = vadd.f32 %v1589_v51, %v4808_v42  ;;  %v5157_v51 = vld [vmem:[#allocation41_spill] sm:$0xff] }
 0x1cb   : > { %v3062_v56 = vpop.f32.mrf.mxu0  ;;  %v4933_v49 = vpop.f32.mrf.mxu1 }
 0x1cc   : > { %v4938_v47 = vadd.f32 %v1590_v7, %v878_v39  ;;  %v1605_v12 = vadd.f32 %v3062_v56, %v4826_v38  ;;  %v5160_v7 = vld [vmem:[#allocation31_spill] sm:$0xff] }
 0x1cd   : > { %v1599_v35 = vpop.f32.mrf.mxu0  ;;  %v2043_v33 = vpop.f32.mrf.mxu1  ;;  %v1485_v56 = vadd.f32 %v5160_v7, %v5159_v44  ;;  %v5171_v44 = vld [vmem:[#allocation21_spill] sm:$0xff]  ;;  %v5172_v7 = vld [vmem:[#allocation35_spill] sm:$0xff] }
 0x1ce   : > { %v4944_v42 = vadd.f32 %v1605_v12, %v881_v11  ;;  %v1600_v31 = vadd.f32 %v1599_v35, %v4820_v62 }
 0x1cf   : > { %v3065_v48 = vpop.f32.mrf.mxu0  ;;  %v4947_v15 = vpop.f32.mrf.mxu1 }
 0x1d0   : > { %v4952_v38 = vadd.f32 %v1600_v31, %v880_v53  ;;  %v1615_v0 = vadd.f32 %v3065_v48, %v4838_v4  ;;  %v1475_v4 = vadd.f32 %v4810_v55, %v4630_v21  ;;  %v5158_v21 = vld [vmem:[#allocation2_spill] sm:$0xff]  ;;  %v5162_v53 = vld [vmem:[#allocation11_spill] sm:$0xff] }
 0x1d1   : > { %v1609_v60 = vpop.f32.mrf.mxu0  ;;  %v2048_v23 = vpop.f32.mrf.mxu1  ;;  %v854_v55 = vadd.f32 %v4855_v29, %v5158_v21  ;;  %v1480_v31 = vadd.f32 %v5163_v6, %v5162_v53  ;;  %v5170_v21 = vld [vmem:[#allocation5_spill] sm:$0xff]  ;;  %v5174_v53 = vld [vmem:[#allocation19_spill] sm:$0xff]  ;;  %v5175_v6 = vld [vmem:[#allocation36_spill] sm:$0xff] }
 0x1d2   : > { %v4958_v62 = vadd.f32 %v1615_v0, %v883_v10  ;;  %v1610_v26 = vadd.f32 %v1609_v60, %v4832_v30  ;;  %v1470_v30 = vadd.f32 %v4812_v50, %v4611_v20  ;;  %v1629_v41 = vadd.f32 %v1475_v4, %v855_v57  ;;  %v5161_v20 = vld [vmem:[#allocation4_spill] sm:$0xff]  ;;  %v5167_v4 = vld [vmem:[#allocation6_spill] sm:$0xff] }
 0x1d3   : > { %v3068_v3 = vpop.f32.mrf.mxu0  ;;  %v4961_v54 = vpop.f32.mrf.mxu1  ;;  %v857_v50 = vadd.f32 %v4855_v29, %v5161_v20 }
 0x1d4   : > { %v4966_v52 = vadd.f32 %v1610_v26, %v882_v32  ;;  %v1625_v58 = vadd.f32 %v3068_v3, %v4857_v14  ;;  %v1628_v33 = vadd.f32 %v1470_v30, %v854_v55  ;;  %v5165_v32 = vld [vmem:[#allocation17_spill] sm:$0xff]  ;;  %v858_v55 = vadd.f32 %v4855_v29, %v5170_v21 }
 0x1d5   : > { %v1619_v28 = vpop.f32.mrf.mxu0  ;;  %v2053_v43 = vpop.f32.mrf.mxu1  ;;  %v1631_v23 = vadd.f32 %v1485_v56, %v857_v50  ;;  %v1495_v26 = vadd.f32 %v5166_v45, %v5165_v32  ;;  %v1505_v56 = vadd.f32 %v5172_v7, %v5171_v44  ;;  %v5173_v50 = vld [vmem:[#allocation8_spill] sm:$0xff]  ;;  %v5178_v45 = vld [vmem:[#allocation37_spill] sm:$0xff]  ;;  %v5184_v44 = vld [vmem:[#allocation39_spill] sm:$0xff] }
 0x1d6   : > { %v4974_v1 = vadd.f32 %v1625_v58, %v885_v13  ;;  %v1620_v9 = vadd.f32 %v1619_v28, %v5157_v51  ;;  %v859_v58 = vadd.f32 %v4855_v29, %v5167_v4  ;;  %v5168_v43 = vld [vmem:[#allocation15_spill] sm:$0xff]  ;;  %v5177_v32 = vld [vmem:[#allocation24_spill] sm:$0xff]  ;;  %v5179_v4 = vld [vmem:[#allocation10_spill] sm:$0xff] }
 0x1d7   : > { %v4980_v39 = vpop.f32.mrf.mxu1  ;;  %v3103_v14 = vpop.f32.mrf.mxu0 }
 0x1d8   : > { %v4984_v11 = vadd.f32 %v1620_v9, %v884_v22  ;;  %v2247_v5 = vadd.f32 %v3103_v14, %v4879_v16  ;;  %v5164_v16 = vld [vmem:[#allocation3_spill] sm:$0xff]  ;;  %v5169_v22 = vld [vmem:[#allocation34_spill] sm:$0xff] }
 0x1d9   : > { %v2058_v12 = vpop.f32.mrf.mxu1  ;;  %v2241_v35 = vpop.f32.mrf.mxu0  ;;  %v856_v27 = vadd.f32 %v4855_v29, %v5164_v16  ;;  %v1490_v30 = vadd.f32 %v5169_v22, %v5168_v43  ;;  %v5176_v16 = vld [vmem:[#allocation7_spill] sm:$0xff]  ;;  %v5181_v43 = vld [vmem:[#allocation38_spill] sm:$0xff] }
 0x1da   : > { %v2401_v48 = vadd.f32 %v2247_v5, %v1629_v41  ;;  %v2242_v10 = vadd.f32 %v2241_v35, %v4867_v19  ;;  %v861_v12 = vadd.f32 %v4855_v29, %v5173_v50 }
 0x1db   : > { %v2061_v0 = vpop.f32.mrf.mxu1  ;;  %v3106_v60 = vpop.f32.mrf.mxu0  ;;  %v1630_v19 = vadd.f32 %v1480_v31, %v856_v27  ;;  %v1500_v31 = vadd.f32 %v5175_v6, %v5174_v53  ;;  %v860_v27 = vadd.f32 %v4855_v29, %v5176_v16 }
 0x1dc   : > { %2433 = vst [vmem:[%s4992_s12 + $0x8] sm:$0xff] %v2401_v48  ;;  %v2400_v3 = vadd.f32 %v2242_v10, %v1628_v33  ;;  %v2257_v13 = vadd.f32 %v3106_v60, %v4905_v17  ;;  %v1633_v17 = vadd.f32 %v1495_v26, %v859_v58  ;;  %v1515_v26 = vadd.f32 %v5178_v45, %v5177_v32 }
 0x1dd   : > { %v2063_v57 = vpop.f32.mrf.mxu1  ;;  %v2251_v28 = vpop.f32.mrf.mxu0  ;;  %v863_v58 = vadd.f32 %v4855_v29, %v5179_v4 }
 0x1de   : > { %2432 = vst [vmem:[%s4992_s12] sm:$0xff] %v2400_v3  ;;  %v2403_v51 = vadd.f32 %v2257_v13, %v1631_v23  ;;  %v2252_v9 = vadd.f32 %v2251_v28, %v4891_v24  ;;  %v1632_v24 = vadd.f32 %v1490_v30, %v858_v55 }
 0x1df   : > { %v2066_v14 = vpop.f32.mrf.mxu1  ;;  %v3109_v41 = vpop.f32.mrf.mxu0 }
 0x1e0   : > { %2435 = vst [vmem:[%s4992_s12 + $0x18] sm:$0xff] %v2403_v51  ;;  %v2402_v5 = vadd.f32 %v2252_v9, %v1630_v19  ;;  %v2267_v20 = vadd.f32 %v3109_v41, %v4933_v49  ;;  %v1635_v49 = vadd.f32 %v1505_v56, %v861_v12  ;;  %v5180_v19 = vld [vmem:[#allocation22_spill] sm:$0xff]  ;;  %v5182_v9 = vld [vmem:[#allocation9_spill] sm:$0xff] }
 0x1e1   : > { %v2068_v35 = vpop.f32.mrf.mxu1  ;;  %v2261_v33 = vpop.f32.mrf.mxu0  ;;  %v1510_v22 = vadd.f32 %v5181_v43, %v5180_v19  ;;  %v862_v21 = vadd.f32 %v4855_v29, %v5182_v9 }
 0x1e2   : > { %2434 = vst [vmem:[%s4992_s12 + $0x10] sm:$0xff] %v2402_v5  ;;  %v2405_v48 = vadd.f32 %v2267_v20, %v1633_v17  ;;  %v2262_v10 = vadd.f32 %v2261_v33, %v4919_v36  ;;  %v1634_v36 = vadd.f32 %v1500_v31, %v860_v27  ;;  %v5183_v17 = vld [vmem:[#allocation26_spill] sm:$0xff] }
 0x1e3   : > { %v2071_v60 = vpop.f32.mrf.mxu1  ;;  %v3112_v23 = vpop.f32.mrf.mxu0  ;;  %v1525_v7 = vadd.f32 %v5184_v44, %v5183_v17  ;;  %v5185_v20 = vld [vmem:[#allocation14_spill] sm:$0xff]  ;;  %v1636_v33 = vadd.f32 %v1510_v22, %v862_v21 }
 0x1e4   : > { %2437 = vst [vmem:[%s4992_s12 + $0x28] sm:$0xff] %v2405_v48  ;;  %v2404_v3 = vadd.f32 %v2262_v10, %v1632_v24  ;;  %v2277_v13 = vadd.f32 %v3112_v23, %v4961_v54  ;;  %v1637_v54 = vadd.f32 %v1515_v26, %v863_v58  ;;  %v865_v50 = vadd.f32 %v4855_v29, %v5185_v20  ;;  %v5187_v24 = vld [vmem:[#allocation40_spill] sm:$0xff] }
 0x1e5   : > { %v2073_v57 = vpop.f32.mrf.mxu1  ;;  %v2271_v28 = vpop.f32.mrf.mxu0  ;;  %v5188_v48 = vld [vmem:[#allocation12_spill] sm:$0xff] }
 0x1e6   : > { %2436 = vst [vmem:[%s4992_s12 + $0x20] sm:$0xff] %v2404_v3  ;;  %v2407_v30 = vadd.f32 %v2277_v13, %v1635_v49  ;;  %v2272_v51 = vadd.f32 %v2271_v28, %v4947_v15  ;;  %v5186_v15 = vld [vmem:[#allocation25_spill] sm:$0xff]  ;;  %v864_v10 = vadd.f32 %v4855_v29, %v5188_v48  ;;  %v5189_v23 = vld [vmem:[#allocation28_spill] sm:$0xff]  ;;  %v5190_v49 = vld [vmem:[#allocation42_spill] sm:$0xff] }
 0x1e7   : > { %v2076_v55 = vpop.f32.mrf.mxu1  ;;  %v3115_v41 = vpop.f32.mrf.mxu0  ;;  %v1520_v53 = vadd.f32 %v5187_v24, %v5186_v15  ;;  %v1535_v32 = vadd.f32 %v5190_v49, %v5189_v23  ;;  %v5191_v3 = vld [vmem:[#allocation18_spill] sm:$0xff]  ;;  %v5193_v28 = vld [vmem:[#allocation43_spill] sm:$0xff] }
 0x1e8   : > { %2439 = vst [vmem:[%s4992_s12 + $0x38] sm:$0xff] %v2407_v30  ;;  %v2406_v56 = vadd.f32 %v2272_v51, %v1634_v36  ;;  %v2287_v5 = vadd.f32 %v3115_v41, %v2061_v0  ;;  %v1639_v0 = vadd.f32 %v1525_v7, %v865_v50  ;;  %v867_v13 = vadd.f32 %v4855_v29, %v5191_v3  ;;  %v5194_v51 = vld [vmem:[#allocation16_spill] sm:$0xff]  ;;  %v5195_v7 = vld [vmem:[#allocation29_spill] sm:$0xff] }
 0x1e9   : > { %v2078_v12 = vpop.f32.mrf.mxu1  ;;  %v2281_v35 = vpop.f32.mrf.mxu0  ;;  %v1638_v57 = vadd.f32 %v1520_v53, %v864_v10  ;;  %v866_v9 = vadd.f32 %v4855_v29, %v5194_v51 }
 0x1ea   : > { %2438 = vst [vmem:[%s4992_s12 + $0x30] sm:$0xff] %v2406_v56  ;;  %v2409_v6 = vadd.f32 %v2287_v5, %v1637_v54  ;;  %v2282_v31 = vadd.f32 %v2281_v35, %v4980_v39  ;;  %v5192_v39 = vld [vmem:[#allocation27_spill] sm:$0xff]  ;;  %v1540_v56 = vadd.f32 %v4863_v61, %v5195_v7  ;;  %v5196_v12 = vld [vmem:[#allocation20_spill] sm:$0xff] }
 0x1eb   : > { %v2081_v16 = vpop.f32.mrf.mxu1  ;;  %v3118_v27 = vpop.f32.mrf.mxu0  ;;  %v1530_v36 = vadd.f32 %v5193_v28, %v5192_v39  ;;  %v868_v35 = vadd.f32 %v4855_v29, %v5196_v12 }
 0x1ec   : > { %2441 = vst [vmem:[%s4992_s12 + $0x48] sm:$0xff] %v2409_v6  ;;  %v2408_v45 = vadd.f32 %v2282_v31, %v1636_v33  ;;  %v2297_v26 = vadd.f32 %v3118_v27, %v2071_v60  ;;  %v1641_v60 = vadd.f32 %v1535_v32, %v867_v13  ;;  %v5197_v31 = vld [vmem:[#allocation30_spill] sm:$0xff]  ;;  %v5198_v27 = vld [vmem:[#allocation23_spill] sm:$0xff] }
 0x1ed   : > { %v2083_v4 = vpop.f32.mrf.mxu1  ;;  %v2291_v58 = vpop.f32.mrf.mxu0  ;;  %v1640_v44 = vadd.f32 %v1530_v36, %v866_v9  ;;  %v1642_v6 = vadd.f32 %v1540_v56, %v868_v35  ;;  %v1550_v48 = vadd.f32 %v4873_v63, %v5197_v31 }
 0x1ee   : > { %2440 = vst [vmem:[%s4992_s12 + $0x40] sm:$0xff] %v2408_v45  ;;  %v2411_v19 = vadd.f32 %v2297_v26, %v1639_v0  ;;  %v2292_v43 = vadd.f32 %v2291_v58, %v2066_v14  ;;  %v870_v0 = vadd.f32 %v4855_v29, %v5198_v27 }
 0x1ef   : > { %v2086_v22 = vpop.f32.mrf.mxu1  ;;  %v3121_v30 = vpop.f32.mrf.mxu0 }
 0x1f0   : > { %2443 = vst [vmem:[%s4992_s12 + $0x58] sm:$0xff] %v2411_v19  ;;  %v2410_v21 = vadd.f32 %v2292_v43, %v1638_v57  ;;  %v2307_v41 = vadd.f32 %v3121_v30, %v2081_v16  ;;  %v1644_v45 = vadd.f32 %v1550_v48, %v870_v0 }
 0x1f1   : > { %v2088_v54 = vpop.f32.mrf.mxu1  ;;  %v2301_v17 = vpop.f32.mrf.mxu0 }
 0x1f2   : > { %2442 = vst [vmem:[%s4992_s12 + $0x50] sm:$0xff] %v2410_v21  ;;  %v2413_v5 = vadd.f32 %v2307_v41, %v1641_v60  ;;  %v2302_v14 = vadd.f32 %v2301_v17, %v2076_v55 }
 0x1f3   : > { %v2091_v20 = vpop.f32.mrf.mxu1  ;;  %v3124_v50 = vpop.f32.mrf.mxu0 }
 0x1f4   : > { %2445 = vst [vmem:[%s4992_s12 + $0x68] sm:$0xff] %v2413_v5  ;;  %v2412_v33 = vadd.f32 %v2302_v14, %v1640_v44  ;;  %v2317_v15 = vadd.f32 %v3124_v50, %v2091_v20 }
 0x1f5   : > { %v2093_v24 = vpop.f32.mrf.mxu1  ;;  %v2311_v53 = vpop.f32.mrf.mxu0 }
 0x1f6   : > { %2444 = vst [vmem:[%s4992_s12 + $0x60] sm:$0xff] %v2412_v33  ;;  %v2415_v61 = vadd.f32 %v2317_v15, %v4865_v25  ;;  %v2312_v55 = vadd.f32 %v2311_v53, %v2086_v22 }
 0x1f7   : > { %v2096_v10 = vpop.f32.mrf.mxu1  ;;  %v3127_v16 = vpop.f32.mrf.mxu0 }
 0x1f8   : > { %2447 = vst [vmem:[%s4992_s12 + $0x78] sm:$0xff] %v2415_v61  ;;  %v2414_v23 = vadd.f32 %v2312_v55, %v1642_v6 }
 0x1f9   : > { %v2098_v49 = vpop.f32.mrf.mxu1  ;;  %v2321_v32 = vpop.f32.mrf.mxu0 }
 0x1fa   : > { %2446 = vst [vmem:[%s4992_s12 + $0x70] sm:$0xff] %v2414_v23  ;;  %v2322_v26 = vadd.f32 %v2321_v32, %v2096_v10 }
 0x1fb   : > { %v2101_v63 = vpop.f32.mrf.mxu1  ;;  %v3130_v3 = vpop.f32.mrf.mxu0 }
 0x1fc   : > { %v2416_v13 = vadd.f32 %v2322_v26, %v1644_v45  ;;  %v2327_v25 = vadd.f32 %v3127_v16, %v2101_v63 }
 0x1fd   : > { %v2103_v4 = vpop.f32.mrf.mxu1  ;;  %v2331_v58 = vpop.f32.mrf.mxu0 }
 0x1fe   : > { %2448 = vst [vmem:[%s4992_s12 + $0x80] sm:$0xff] %v2416_v13  ;;  %v2417_v57 = vadd.f32 %v2327_v25, %v4877_v40 }
 0x1ff   : > { %v2106_v29 = vpop.f32.mrf.mxu1  ;;  %v3133_v36 = vpop.f32.mrf.mxu0 }
 0x200   : > { %2449 = vst [vmem:[%s4992_s12 + $0x88] sm:$0xff] %v2417_v57  ;;  %v2332_v39 = vadd.f32 %v2331_v58, %v2106_v29 }
 0x201   : > { %v2108_v28 = vpop.f32.mrf.mxu1  ;;  %v2341_v51 = vpop.f32.mrf.mxu0 }
 0x202   : > { %v2418_v19 = vadd.f32 %v2332_v39, %v4896_v34 }
 0x203   : > { %v2111_v43 = vpop.f32.mrf.mxu1  ;;  %v3136_v41 = vpop.f32.mrf.mxu0 }
 0x204   : > { %2450 = vst [vmem:[%s4992_s12 + $0x90] sm:$0xff] %v2418_v19  ;;  %v2337_v22 = vadd.f32 %v3130_v3, %v2111_v43 }
 0x205   : > { %v2113_v30 = vpop.f32.mrf.mxu1  ;;  %v2351_v7 = vpop.f32.mrf.mxu0 }
 0x206   : > { %v2419_v9 = vadd.f32 %v2337_v22, %v4888_v2 }
 0x207   : > { %v2116_v60 = vpop.f32.mrf.mxu1  ;;  %v3139_v20 = vpop.f32.mrf.mxu0 }
 0x208   : > { %2451 = vst [vmem:[%s4992_s12 + $0x98] sm:$0xff] %v2419_v9  ;;  %v2342_v21 = vadd.f32 %v2341_v51, %v2116_v60 }
 0x209   : > { %v2118_v40 = vpop.f32.mrf.mxu1  ;;  %v2361_v33 = vpop.f32.mrf.mxu0 }
 0x20a   : > { %v2420_v54 = vadd.f32 %v2342_v21, %v4910_v46 }
 0x20b   : > { %v2121_v17 = vpop.f32.mrf.mxu1  ;;  %v3142_v6 = vpop.f32.mrf.mxu0 }
 0x20c   : > { %2452 = vst [vmem:[%s4992_s12 + $0xa0] sm:$0xff] %v2420_v54  ;;  %v2347_v44 = vadd.f32 %v3133_v36, %v2121_v17 }
 0x20d   : > { %v2123_v34 = vpop.f32.mrf.mxu1  ;;  %v2371_v55 = vpop.f32.mrf.mxu0 }
 0x20e   : > { %v2421_v56 = vadd.f32 %v2347_v44, %v4902_v8 }
 0x20f   : > { %v2126_v5 = vpop.f32.mrf.mxu1  ;;  %v3145_v0 = vpop.f32.mrf.mxu0 }
 0x210   : > { %2453 = vst [vmem:[%s4992_s12 + $0xa8] sm:$0xff] %v2421_v56  ;;  %v2352_v14 = vadd.f32 %v2351_v7, %v2126_v5 }
 0x211   : > { %v2128_v2 = vpop.f32.mrf.mxu1  ;;  %v2381_v45 = vpop.f32.mrf.mxu0 }
 0x212   : > { %v2422_v50 = vadd.f32 %v2352_v14, %v4924_v18 }
 0x213   : > { %v2131_v12 = vpop.f32.mrf.mxu1  ;;  %v3148_v13 = vpop.f32.mrf.mxu0 }
 0x214   : > { %2454 = vst [vmem:[%s4992_s12 + $0xb0] sm:$0xff] %v2422_v50  ;;  %v2357_v35 = vadd.f32 %v3136_v41, %v2131_v12 }
 0x215   : > { %v2133_v46 = vpop.f32.mrf.mxu1  ;;  %v2391_v57 = vpop.f32.mrf.mxu0 }
 0x216   : > { %v2423_v15 = vadd.f32 %v2357_v35, %v4916_v37 }
 0x217   : > { %v2136_v24 = vpop.f32.mrf.mxu1 }
 0x218   : > { %2455 = vst [vmem:[%s4992_s12 + $0xb8] sm:$0xff] %v2423_v15  ;;  %v2362_v53 = vadd.f32 %v2361_v33, %v2136_v24 }
 0x219   : > { %v2138_v8 = vpop.f32.mrf.mxu1 }
 0x21a   : > { %v2424_v31 = vadd.f32 %v2362_v53, %v4938_v47 }
 0x21b   : > { %v2141_v48 = vpop.f32.mrf.mxu1 }
 0x21c   : > { %2456 = vst [vmem:[%s4992_s12 + $0xc0] sm:$0xff] %v2424_v31  ;;  %v2367_v61 = vadd.f32 %v3139_v20, %v2141_v48 }
 0x21d   : > { %v2143_v18 = vpop.f32.mrf.mxu1 }
 0x21e   : > { %v2425_v10 = vadd.f32 %v2367_v61, %v4930_v59 }
 0x21f   : > { %v2146_v16 = vpop.f32.mrf.mxu1 }
 0x220   : > { %2457 = vst [vmem:[%s4992_s12 + $0xc8] sm:$0xff] %v2425_v10  ;;  %v2372_v27 = vadd.f32 %v2371_v55, %v2146_v16 }
 0x221   : > { %v2148_v37 = vpop.f32.mrf.mxu1 }
 0x222   : > { %v2426_v23 = vadd.f32 %v2372_v27, %v4952_v38 }
 0x223   : > { %v2151_v49 = vpop.f32.mrf.mxu1 }
 0x224   : > { %2458 = vst [vmem:[%s4992_s12 + $0xd0] sm:$0xff] %v2426_v23  ;;  %v2377_v32 = vadd.f32 %v3142_v6, %v2151_v49 }
 0x225   : > { %v2153_v47 = vpop.f32.mrf.mxu1 }
 0x226   : > { %v2427_v26 = vadd.f32 %v2377_v32, %v4944_v42 }
 0x227   : > { %v2156_v63 = vpop.f32.mrf.mxu1 }
 0x228   : > { %2459 = vst [vmem:[%s4992_s12 + $0xd8] sm:$0xff] %v2427_v26  ;;  %v2382_v3 = vadd.f32 %v2381_v45, %v2156_v63 }
 0x229   : > { %v2158_v59 = vpop.f32.mrf.mxu1 }
 0x22a   : > { %v2428_v25 = vadd.f32 %v2382_v3, %v4966_v52 }
 0x22b   : > { %v2161_v4 = vpop.f32.mrf.mxu1 }
 0x22c   : > { %2460 = vst [vmem:[%s4992_s12 + $0xe0] sm:$0xff] %v2428_v25  ;;  %v2387_v38 = vadd.f32 %v3145_v0, %v2161_v4 }
 0x22d   : > { %v2163_v58 = vpop.f32.mrf.mxu1 }
 0x22e   : > { %v2429_v29 = vadd.f32 %v2387_v38, %v4958_v62 }
 0x22f   : > { %v2166_v39 = vpop.f32.mrf.mxu1 }
 0x230   : > { %2461 = vst [vmem:[%s4992_s12 + $0xe8] sm:$0xff] %v2429_v29  ;;  %v2392_v28 = vadd.f32 %v2391_v57, %v2166_v39 }
 0x231   : > { %v2168_v42 = vpop.f32.mrf.mxu1 }
 0x232   : > { %v2430_v36 = vadd.f32 %v2392_v28, %v4984_v11 }
 0x233   : > { %v2171_v19 = vpop.f32.mrf.mxu1 }
 0x234   : > { %2462 = vst [vmem:[%s4992_s12 + $0xf0] sm:$0xff] %v2430_v36  ;;  %v2397_v43 = vadd.f32 %v3148_v13, %v2171_v19 }
 0x235   : > { %v2173_v22 = vpop.f32.mrf.mxu1 }
 0x236   : > { %v2431_v52 = vadd.f32 %v2397_v43, %v4974_v1 }
 0x238   : > { %2463 = vst [vmem:[%s4992_s12 + $0xf8] sm:$0xff] %v2431_v52 }
 0x239 PF: > { %s13_s14 = sadd.s32 1, %s3227_s14   ;;  %s5199_s12 = smov %s3223_s13 }
 0x23a   : > { %p10_p5 = scmp.ge.s32.totalorder %s13_s14, 4   ;;  %s5200_s13 = smov %s5202_s15 }
 0x23c   :  { %12 = sbr.rel (!%p10_p5) target bundleno = 2 (0x2), region = 67 }

// kernel: momentum_net_stem_conv.1
= control target key start
LH: loop header
LB: loop body
LE: loop exit
PB: predicated region body
PF: predicated region fallthrough
CT: control target
= control target key end

     0   :  { %s3584_s12 = smov 0   ;;  %s3586_s13 = smov 0   ;;  %s5369_s0 = inlined_call_operand.vmem [shape: f32[2,18,24,128], index: 0, kind: input, shape index: {}]   ;;  %s5370_s1 = inlined_call_operand.vmem [shape: f32[3,384,128], index: 1, kind: input, shape index: {}]   ;;  %s5371_s2 = inlined_call_operand.vmem [shape: f32[1,128], index: 2, kind: input, shape index: {}]   ;;  %s5372_s3 = inlined_call_operand.vmem [shape: f32[2,16,16,128], index: 3, kind: output, shape index: {}]  }
   0x1   :  { %s3588_s14 = smov 0  }
   0x2 LB: > { %s25_s15 = sadd.s32 1, %s3557_s13  ;;  %p2899_p0 = scmp.ge.s32.totalorder %s3561_s14, 1  ;;  %s3561_s14 = sphi %s3588_s14, %s13_s14   ;;  %s3557_s13 = sphi %s3586_s13, %s5458_s13   ;;  %s3553_s12 = sphi %s3584_s12, %s5457_s12  }
   0x3   : > { %p27_p1 = scmp.ge.s32.totalorder %s25_s15, 2  ;;  %p151_p2 = scmp.lt.s32.totalorder %s3561_s14, 3 }
   0x5   : > { %s5460_s15 = smov (%p27_p1, %s25_s15), 0  ;;  %p152_p3 = pnand %p2899_p0, %p151_p2 }
   0x7   : > { %155 = sbr.rel (%p152_p3) target bundleno = 569 (0x239), region = 32 }
   0xc   : > { %v403_v0 = vld [vmem:[%s5370_s1 + $0x178] sm:$0xff]  ;;  %v402_v2 = vld [vmem:[%s5370_s1 + $0x170] sm:$0xff]  ;;  %v3563_v3 = vmov 0.0   ;;  %v401_v5 = vld [vmem:[%s5370_s1 + $0x168] sm:$0xff]  ;;  %p180_p4 = scmp.lt.s32.totalorder %s3553_s12, 1  ;;  %vm1030_vm0 = vcmask 1046528  }
   0xd   : > { %v371_v1 = vld [vmem:[%s5370_s1 + $0x78] sm:$0xff]  ;;  %404 = vmatprep.subr.mxu0 %v3563_v3  ;;  %3243 = vmatprep.subr.mxu1 %v403_v0  ;;  %v370_v4 = vld [vmem:[%s5370_s1 + $0x70] sm:$0xff]  ;;  %v369_v6 = vld [vmem:[%s5370_s1 + $0x68] sm:$0xff]  ;;  %vm1898_vm1 = vcmask 1045504  }
   0xe   : > { %405 = vmatpush1.msra.mxu0 %v371_v1  ;;  %3244 = vmatpush3.msra.mxu1 %v403_v0  ;;  %v400_v7 = vld [vmem:[%s5370_s1 + $0x160] sm:$0xff]  ;;  %v399_v9 = vld [vmem:[%s5370_s1 + $0x158] sm:$0xff]  ;;  %v398_v11 = vld [vmem:[%s5370_s1 + $0x150] sm:$0xff]  ;;  %s5462_s12 = smov (!%p180_p4, %s3553_s12), 1 }
   0xf   : > { %406 = vmatprep.subr.mxu0 %v3563_v3  ;;  %3245 = vmatprep.subr.mxu1 %v402_v2  ;;  %v368_v8 = vld [vmem:[%s5370_s1 + $0x60] sm:$0xff]  ;;  %v367_v10 = vld [vmem:[%s5370_s1 + $0x58] sm:$0xff]  ;;  %v366_v12 = vld [vmem:[%s5370_s1 + $0x50] sm:$0xff]  ;;  %s3483_s22 = smul.u32 432, %s5462_s12  ;;  %s3098_s20 = sshll.u32 %s5462_s12, 8 }
  0x10   : > { %407 = vmatpush1.msra.mxu0 %v370_v4  ;;  %3246 = vmatpush3.msra.mxu1 %v402_v2  ;;  %v397_v13 = vld [vmem:[%s5370_s1 + $0x148] sm:$0xff]  ;;  %v396_v15 = vld [vmem:[%s5370_s1 + $0x140] sm:$0xff]  ;;  %v395_v17 = vld [vmem:[%s5370_s1 + $0x138] sm:$0xff]  ;;  %s5250_s12 = scalar_lea.vmem %s5372_s3, %s3098_s20 }
  0x11   : > { %408 = vmatprep.subr.mxu0 %v3563_v3  ;;  %3247 = vmatprep.subr.mxu1 %v401_v5  ;;  %v365_v14 = vld [vmem:[%s5370_s1 + $0x48] sm:$0xff]  ;;  %v364_v16 = vld [vmem:[%s5370_s1 + $0x40] sm:$0xff]  ;;  %v363_v18 = vld [vmem:[%s5370_s1 + $0x38] sm:$0xff]  ;;  %s3716_s6 = scalar_lea.vmem %s5369_s0, %s3483_s22 }
  0x12   : > { %409 = vmatpush1.msra.mxu0 %v369_v6  ;;  %3248 = vmatpush3.msra.mxu1 %v401_v5  ;;  %v394_v19 = vld [vmem:[%s5370_s1 + $0x130] sm:$0xff]  ;;  %v393_v21 = vld [vmem:[%s5370_s1 + $0x128] sm:$0xff]  ;;  %v392_v23 = vld [vmem:[%s5370_s1 + $0x120] sm:$0xff] }
  0x13   : > { %410 = vmatprep.subr.mxu0 %v3563_v3  ;;  %3249 = vmatprep.subr.mxu1 %v400_v7  ;;  %v362_v20 = vld [vmem:[%s5370_s1 + $0x30] sm:$0xff]  ;;  %v361_v22 = vld [vmem:[%s5370_s1 + $0x28] sm:$0xff]  ;;  %v360_v24 = vld [vmem:[%s5370_s1 + $0x20] sm:$0xff] }
  0x14   : > { %411 = vmatpush1.msra.mxu0 %v368_v8  ;;  %3250 = vmatpush3.msra.mxu1 %v400_v7  ;;  %v391_v25 = vld [vmem:[%s5370_s1 + $0x118] sm:$0xff]  ;;  %v390_v27 = vld [vmem:[%s5370_s1 + $0x110] sm:$0xff]  ;;  %v389_v29 = vld [vmem:[%s5370_s1 + $0x108] sm:$0xff] }
  0x15   : > { %412 = vmatprep.subr.mxu0 %v3563_v3  ;;  %3251 = vmatprep.subr.mxu1 %v399_v9  ;;  %v359_v26 = vld [vmem:[%s5370_s1 + $0x18] sm:$0xff]  ;;  %v358_v28 = vld [vmem:[%s5370_s1 + $0x10] sm:$0xff]  ;;  %v357_v30 = vld [vmem:[%s5370_s1 + $0x8] sm:$0xff] }
  0x16   : > { %413 = vmatpush1.msra.mxu0 %v367_v10  ;;  %3252 = vmatpush3.msra.mxu1 %v399_v9  ;;  %v388_v31 = vld [vmem:[%s5370_s1 + $0x100] sm:$0xff]  ;;  %v3726_v33 = vld [vmem:[%s3716_s6 + $0x30] sm:$0xff]  ;;  %v3730_v34 = vld [vmem:[%s3716_s6 + $0x38] sm:$0xff] }
  0x17   : > { %414 = vmatprep.subr.mxu0 %v3563_v3  ;;  %3253 = vmatprep.subr.mxu1 %v398_v11  ;;  %v356_v32 = vld [vmem:[%s5370_s1] sm:$0xff]  ;;  %v387_v35 = vld [vmem:[%s5370_s1 + $0xf8] sm:$0xff]  ;;  %v386_v37 = vld [vmem:[%s5370_s1 + $0xf0] sm:$0xff] }
  0x18   : > { %415 = vmatpush1.msra.mxu0 %v366_v12  ;;  %3254 = vmatpush3.msra.mxu1 %v398_v11  ;;  %v3015_v36 = vld [vmem:[%s5370_s1 + $0x1f8] sm:$0xff]  ;;  %v3746_v38 = vld [vmem:[%s3716_s6 + $0x48] sm:$0xff]  ;;  %v3014_v39 = vld [vmem:[%s5370_s1 + $0x1f0] sm:$0xff] }
  0x19   : > { %416 = vmatprep.subr.mxu0 %v3563_v3  ;;  %3255 = vmatprep.subr.mxu1 %v397_v13  ;;  %v3754_v40 = vld [vmem:[%s3716_s6 + $0x50] sm:$0xff]  ;;  %v385_v41 = vld [vmem:[%s5370_s1 + $0xe8] sm:$0xff]  ;;  %v384_v43 = vld [vmem:[%s5370_s1 + $0xe0] sm:$0xff] }
  0x1a   : > { %417 = vmatpush1.msra.mxu0 %v365_v14  ;;  %3256 = vmatpush3.msra.mxu1 %v397_v13  ;;  %v3013_v42 = vld [vmem:[%s5370_s1 + $0x1e8] sm:$0xff]  ;;  %v3770_v44 = vld [vmem:[%s3716_s6 + $0x60] sm:$0xff]  ;;  %v383_v47 = vld [vmem:[%s5370_s1 + $0xd8] sm:$0xff] }
  0x1b   : > { %418 = vmatprep.subr.mxu0 %v3563_v3  ;;  %3257 = vmatprep.subr.mxu1 %v396_v15  ;;  %v3012_v45 = vld [vmem:[%s5370_s1 + $0x1e0] sm:$0xff]  ;;  %v3778_v46 = vld [vmem:[%s3716_s6 + $0x68] sm:$0xff]  ;;  %v3011_v48 = vld [vmem:[%s5370_s1 + $0x1d8] sm:$0xff] }
  0x1c   : > { %419 = vmatpush1.msra.mxu0 %v364_v16  ;;  %3258 = vmatpush3.msra.mxu1 %v396_v15  ;;  %v382_v49 = vld [vmem:[%s5370_s1 + $0xd0] sm:$0xff]  ;;  %v3794_v50 = vld [vmem:[%s3716_s6 + $0x78] sm:$0xff]  ;;  %v3802_v52 = vld [vmem:[%s3716_s6 + $0x80] sm:$0xff] }
  0x1d   : > { %420 = vmatprep.subr.mxu0 %v3563_v3  ;;  %3259 = vmatprep.subr.mxu1 %v395_v17  ;;  %v3010_v51 = vld [vmem:[%s5370_s1 + $0x1d0] sm:$0xff]  ;;  %v381_v53 = vld [vmem:[%s5370_s1 + $0xc8] sm:$0xff]  ;;  %v380_v55 = vld [vmem:[%s5370_s1 + $0xc0] sm:$0xff] }
  0x1e   : > { %421 = vmatpush1.msra.mxu0 %v363_v18  ;;  %3260 = vmatpush3.msra.mxu1 %v395_v17  ;;  %v3009_v54 = vld [vmem:[%s5370_s1 + $0x1c8] sm:$0xff]  ;;  %v3818_v56 = vld [vmem:[%s3716_s6 + $0x90] sm:$0xff]  ;;  %v3008_v57 = vld [vmem:[%s5370_s1 + $0x1c0] sm:$0xff]  ;;  %v1037_v18 = vrot.slane %v3726_v33, 1 }
  0x1f   : > { %422 = vmatprep.subr.mxu0 %v3563_v3  ;;  %3261 = vmatprep.subr.mxu1 %v394_v19  ;;  %v3826_v58 = vld [vmem:[%s3716_s6 + $0x98] sm:$0xff]  ;;  %v378_v61 = vld [vmem:[%s5370_s1 + $0xb0] sm:$0xff]  ;;  %v3842_v62 = vld [vmem:[%s3716_s6 + $0xa8] sm:$0xff] }
  0x20   : > { %423 = vmatpush1.msra.mxu0 %v362_v20  ;;  %3262 = vmatpush3.msra.mxu1 %v394_v19  ;;  %v379_v59 = vld [vmem:[%s5370_s1 + $0xb8] sm:$0xff]  ;;  %v3006_v63 = vld [vmem:[%s5370_s1 + $0x1b0] sm:$0xff]  ;;  %v377_v1 = vld [vmem:[%s5370_s1 + $0xa8] sm:$0xff]  ;;  %v1038_v19 = vrot.slane %v3730_v34, 1 }
  0x21   : > { %424 = vmatprep.subr.mxu0 %v3563_v3  ;;  %3263 = vmatprep.subr.mxu1 %v393_v21  ;;  %v3007_v60 = vld [vmem:[%s5370_s1 + $0x1b8] sm:$0xff]  ;;  %v3850_v0 = vld [vmem:[%s3716_s6 + $0xb0] sm:$0xff]  ;;  %v3005_v2 = vld [vmem:[%s5370_s1 + $0x1a8] sm:$0xff] }
  0x22   : > { %425 = vmatpush1.msra.mxu0 %v361_v22  ;;  %3264 = vmatpush3.msra.mxu1 %v393_v21  ;;  %v376_v4 = vld [vmem:[%s5370_s1 + $0xa0] sm:$0xff]  ;;  %v3874_v7 = vld [vmem:[%s3716_s6 + $0xc8] sm:$0xff]  ;;  %v375_v8 = vld [vmem:[%s5370_s1 + $0x98] sm:$0xff] }
  0x23   : > { %426 = vmatprep.subr.mxu0 %v3563_v3  ;;  %3265 = vmatprep.subr.mxu1 %v392_v23  ;;  %v3866_v5 = vld [vmem:[%s3716_s6 + $0xc0] sm:$0xff]  ;;  %v3003_v9 = vld [vmem:[%s5370_s1 + $0x198] sm:$0xff]  ;;  %v374_v10 = vld [vmem:[%s5370_s1 + $0x90] sm:$0xff] }
  0x24   : > { %427 = vmatpush1.msra.mxu0 %v360_v24  ;;  %3266 = vmatpush3.msra.mxu1 %v392_v23  ;;  %v3004_v6 = vld [vmem:[%s5370_s1 + $0x1a0] sm:$0xff]  ;;  %v3890_v11 = vld [vmem:[%s3716_s6 + $0xd8] sm:$0xff]  ;;  %v3002_v12 = vld [vmem:[%s5370_s1 + $0x190] sm:$0xff] }
  0x25   : > { %428 = vmatprep.subr.mxu0 %v3563_v3  ;;  %3267 = vmatprep.subr.mxu1 %v391_v25  ;;  %v3898_v13 = vld [vmem:[%s3716_s6 + $0xe0] sm:$0xff]  ;;  %v373_v14 = vld [vmem:[%s5370_s1 + $0x88] sm:$0xff]  ;;  %v3914_v17 = vld [vmem:[%s3716_s6 + $0x18] sm:$0xff] }
  0x26   : > { %429 = vmatpush1.msra.mxu0 %v359_v26  ;;  %3268 = vmatpush3.msra.mxu1 %v391_v25  ;;  %v3001_v15 = vld [vmem:[%s5370_s1 + $0x188] sm:$0xff]  ;;  %v372_v16 = vld [vmem:[%s5370_s1 + $0x80] sm:$0xff]  ;;  %v3919_v20 = vld [vmem:[%s3716_s6 + $0xf0] sm:$0xff]  ;;  %v3939_v25 = vsel %vm1030_vm0, %v1037_v18, %v1038_v19  ;;  %v1034_v18 = vrot.slane %v3914_v17, 1 }
  0x27   : > { %430 = vmatprep.subr.mxu0 %v3563_v3  ;;  %3269 = vmatprep.subr.mxu1 %v390_v27  ;;  %v3000_v21 = vld [vmem:[%s5370_s1 + $0x180] sm:$0xff]  ;;  %v3930_v23 = vld [vmem:[%s3716_s6 + $0xf8] sm:$0xff] }
  0x28   : > { %431 = vmatpush1.msra.mxu0 %v358_v28  ;;  %3270 = vmatpush3.msra.mxu1 %v390_v27  ;;  %v3927_v22 = vld [vmem:[%s3716_s6] sm:$0xff]  ;;  %v3031_v26 = vld [vmem:[%s5370_s1 + $0x278] sm:$0xff]  ;;  %v3946_v27 = vld [vmem:[%s3716_s6 + $0x108] sm:$0xff]  ;;  %v1052_v28 = vrot.slane %v3746_v38, 1 }
  0x29   : > { %432 = vmatprep.subr.mxu0 %v3563_v3  ;;  %3271 = vmatprep.subr.mxu1 %v389_v29  ;;  %v3934_v24 = vld [vmem:[%s3716_s6 + $0x20] sm:$0xff] }
  0x2a   : > { %433 = vmatpush1.msra.mxu0 %v357_v30  ;;  %3272 = vmatpush3.msra.mxu1 %v389_v29  ;;  %v1053_v29 = vrot.slane %v3754_v40, 1  ;;  %v3955_v30 = vld [vmem:[%s5370_s1 + $0x2f8] sm:$0xff] }
  0x2b   : > { %434 = vmatprep.subr.mxu0 %v3563_v3  ;;  %3273 = vmatprep.subr.mxu1 %v388_v31 }
  0x2c   : > { %435 = vmatpush1.msra.mxu0 %v356_v32  ;;  %3274 = vmatpush3.msra.mxu1 %v388_v31  ;;  %v3030_v31 = vld [vmem:[%s5370_s1 + $0x270] sm:$0xff]  ;;  %v3963_v32 = vld [vmem:[%s3716_s6 + $0x8] sm:$0xff] }
  0x2d   : > { %3275 = vmatprep.mubr.f32.mxu1 %v3726_v33  ;;  %436 = vmatprep.subr.mxu0 %v3563_v3 }
  0x2e   : > { %3276 = vmatmul.mubr.f32.vlgmr.msra.gmra.mxu1 %v3730_v34  ;;  %1416 = vmatprep.subr.mxu1 %v3563_v3 }
  0x2f   : > { %437 = vmatpush2.msra.mxu0 %v387_v35  ;;  %1417 = vmatpush1.msra.mxu1 %v3015_v36  ;;  %v3967_v35 = vld [vmem:[%s3716_s6 + $0x110] sm:$0xff]  ;;  %v3972_v36 = vsel %vm1030_vm0, %v1052_v28, %v1053_v29 }
  0x30   : > { %438 = vmatprep.subr.mxu0 %v3563_v3  ;;  %1418 = vmatprep.subr.mxu1 %v3563_v3  ;;  %v3018_v28 = vld [vmem:[%s5370_s1 + $0x210] sm:$0xff] }
  0x31   : > { %439 = vmatpush2.msra.mxu0 %v386_v37  ;;  %3278 = vmatprep.mubr.f32.mxu1 %v3746_v38  ;;  %v3029_v37 = vld [vmem:[%s5370_s1 + $0x268] sm:$0xff] }
  0x32   : > { %1419 = vmatpush1.msra.mxu1 %v3014_v39  ;;  %440 = vmatprep.subr.mxu0 %v3563_v3  ;;  %v1067_v39 = vrot.slane %v3770_v44, 1 }
  0x33   : > { %3279 = vmatmul.mubr.f32.gmra.mxu1 %v3754_v40  ;;  %1420 = vmatprep.subr.mxu1 %v3563_v3 }
  0x34   : > { %441 = vmatpush2.msra.mxu0 %v385_v41  ;;  %1421 = vmatpush1.msra.mxu1 %v3013_v42  ;;  %v1068_v41 = vrot.slane %v3778_v46, 1  ;;  %v3983_v42 = vld [vmem:[%s3716_s6 + $0x120] sm:$0xff] }
  0x35   : > { %442 = vmatprep.subr.mxu0 %v3563_v3  ;;  %1422 = vmatprep.subr.mxu1 %v3563_v3 }
  0x36   : > { %443 = vmatpush2.msra.mxu0 %v384_v43  ;;  %3281 = vmatprep.mubr.f32.mxu1 %v3770_v44  ;;  %v3028_v43 = vld [vmem:[%s5370_s1 + $0x260] sm:$0xff] }
  0x37   : > { %1423 = vmatpush1.msra.mxu1 %v3012_v45  ;;  %444 = vmatprep.subr.mxu0 %v3563_v3  ;;  %v3992_v45 = vld [vmem:[%s3716_s6 + $0x128] sm:$0xff] }
  0x38   : > { %3282 = vmatmul.mubr.f32.gmra.mxu1 %v3778_v46  ;;  %1424 = vmatprep.subr.mxu1 %v3563_v3 }
  0x39   : > { %445 = vmatpush2.msra.mxu0 %v383_v47  ;;  %1425 = vmatpush1.msra.mxu1 %v3011_v48  ;;  %v3997_v47 = vsel %vm1030_vm0, %v1067_v39, %v1068_v41  ;;  %v3027_v48 = vld [vmem:[%s5370_s1 + $0x258] sm:$0xff]  ;;  %v1032_v39 = vrot.slane %v3963_v32, 1 }
  0x3a   : > { %446 = vmatprep.subr.mxu0 %v3563_v3  ;;  %1426 = vmatprep.subr.mxu1 %v3563_v3 }
  0x3b   : > { %447 = vmatpush2.msra.mxu0 %v382_v49  ;;  %3284 = vmatprep.mubr.f32.mxu1 %v3794_v50  ;;  %v1082_v49 = vrot.slane %v3794_v50, 1 }
  0x3c   : > { %1427 = vmatpush1.msra.mxu1 %v3010_v51  ;;  %448 = vmatprep.subr.mxu0 %v3563_v3  ;;  %v1083_v51 = vrot.slane %v3802_v52, 1 }
  0x3d   : > { %3285 = vmatmul.mubr.f32.gmra.mxu1 %v3802_v52  ;;  %1428 = vmatprep.subr.mxu1 %v3563_v3 }
  0x3e   : > { %449 = vmatpush2.msra.mxu0 %v381_v53  ;;  %1429 = vmatpush1.msra.mxu1 %v3009_v54  ;;  %v4008_v53 = vld [vmem:[%s3716_s6 + $0x138] sm:$0xff]  ;;  %v3026_v54 = vld [vmem:[%s5370_s1 + $0x250] sm:$0xff] }
  0x3f   : > { %450 = vmatprep.subr.mxu0 %v3563_v3  ;;  %1430 = vmatprep.subr.mxu1 %v3563_v3 }
  0x40   : > { %451 = vmatpush2.msra.mxu0 %v380_v55  ;;  %3287 = vmatprep.mubr.f32.mxu1 %v3818_v56  ;;  %v4017_v55 = vld [vmem:[%s3716_s6 + $0x140] sm:$0xff] }
  0x41   : > { %1431 = vmatpush1.msra.mxu1 %v3008_v57  ;;  %452 = vmatprep.subr.mxu0 %v3563_v3  ;;  %v4022_v57 = vsel %vm1030_vm0, %v1082_v49, %v1083_v51  ;;  %v3017_v49 = vld [vmem:[%s5370_s1 + $0x208] sm:$0xff] }
  0x42   : > { %3288 = vmatmul.mubr.f32.gmra.mxu1 %v3826_v58  ;;  %1432 = vmatprep.subr.mxu1 %v3563_v3 }
  0x43   : > { %453 = vmatpush2.msra.mxu0 %v379_v59  ;;  %1433 = vmatpush1.msra.mxu1 %v3007_v60  ;;  %v3025_v59 = vld [vmem:[%s5370_s1 + $0x248] sm:$0xff]  ;;  %v4031_v60 = vld [vmem:[%s3716_s6 + $0x150] sm:$0xff] }
  0x44   : > { %454 = vmatprep.subr.mxu0 %v3563_v3  ;;  %1434 = vmatprep.subr.mxu1 %v3563_v3 }
  0x45   : > { %455 = vmatpush2.msra.mxu0 %v378_v61  ;;  %3290 = vmatprep.mubr.f32.mxu1 %v3842_v62  ;;  %v3024_v61 = vld [vmem:[%s5370_s1 + $0x240] sm:$0xff] }
  0x46   : > { %1435 = vmatpush1.msra.mxu1 %v3006_v63  ;;  %456 = vmatprep.subr.mxu0 %v3563_v3  ;;  %v4040_v63 = vld [vmem:[%s3716_s6 + $0x158] sm:$0xff] }
  0x47   : > { %3291 = vmatmul.mubr.f32.gmra.mxu1 %v3850_v0  ;;  %1436 = vmatprep.subr.mxu1 %v3563_v3 }
  0x48   : > { %457 = vmatpush2.msra.mxu0 %v377_v1  ;;  %1437 = vmatpush1.msra.mxu1 %v3005_v2  ;;  %v3023_v1 = vld [vmem:[%s5370_s1 + $0x238] sm:$0xff]  ;;  %v4049_v2 = vld [vmem:[%s3716_s6 + $0x168] sm:$0xff] }
  0x49   : > { %458 = vmatprep.subr.mxu0 %v3563_v3  ;;  %1438 = vmatprep.subr.mxu1 %v3563_v3 }
  0x4a   : > { %459 = vmatpush2.msra.mxu0 %v376_v4  ;;  %3293 = vmatprep.mubr.f32.mxu1 %v3866_v5  ;;  %v3022_v4 = vld [vmem:[%s5370_s1 + $0x230] sm:$0xff] }
  0x4b   : > { %1439 = vmatpush1.msra.mxu1 %v3004_v6  ;;  %460 = vmatprep.subr.mxu0 %v3563_v3  ;;  %v4058_v6 = vld [vmem:[%s3716_s6 + $0x170] sm:$0xff] }
  0x4c   : > { %3294 = vmatmul.mubr.f32.gmra.mxu1 %v3874_v7  ;;  %1440 = vmatprep.subr.mxu1 %v3563_v3 }
  0x4d   : > { %461 = vmatpush2.msra.mxu0 %v375_v8  ;;  %1441 = vmatpush1.msra.mxu1 %v3003_v9  ;;  %v1127_v8 = vrot.slane %v3866_v5, 1  ;;  %v1128_v9 = vrot.slane %v3874_v7, 1 }
  0x4e   : > { %462 = vmatprep.subr.mxu0 %v3563_v3  ;;  %1442 = vmatprep.subr.mxu1 %v3563_v3 }
  0x4f   : > { %463 = vmatpush2.msra.mxu0 %v374_v10  ;;  %3296 = vmatprep.mubr.f32.mxu1 %v3890_v11  ;;  %v4069_v10 = vld [vmem:[%s3716_s6 + $0x180] sm:$0xff] }
  0x50   : > { %1443 = vmatpush1.msra.mxu1 %v3002_v12  ;;  %464 = vmatprep.subr.mxu0 %v3563_v3  ;;  %v3020_v12 = vld [vmem:[%s5370_s1 + $0x220] sm:$0xff] }
  0x51   : > { %3297 = vmatmul.mubr.f32.gmra.mxu1 %v3898_v13  ;;  %1444 = vmatprep.subr.mxu1 %v3563_v3 }
  0x52   : > { %465 = vmatpush2.msra.mxu0 %v373_v14  ;;  %1445 = vmatpush1.msra.mxu1 %v3001_v15  ;;  %v4078_v14 = vld [vmem:[%s3716_s6 + $0x188] sm:$0xff]  ;;  %v4083_v15 = vsel %vm1030_vm0, %v1127_v8, %v1128_v9 }
  0x53   : > { %466 = vmatprep.subr.mxu0 %v3563_v3  ;;  %1446 = vmatprep.subr.mxu1 %v3563_v3 }
  0x54   : > { %467 = vmatpush2.msra.mxu0 %v372_v16  ;;  %468 = vmatprep.mubr.f32.mxu0 %v3914_v17  ;;  %v3019_v16 = vld [vmem:[%s5370_s1 + $0x218] sm:$0xff] }
  0x55   : > { %3299 = vmatprep.mubr.f32.mxu1 %v3919_v20  ;;  %1447 = vmatpush1.msra.mxu1 %v3000_v21  ;;  %v1035_v21 = vrot.slane %v3934_v24, 1 }
  0x56   : > { %469 = vmatmul.mubr.f32.vlgmr.msra.gmra.mxu0 %v3927_v22  ;;  %3300 = vmatmul.mubr.f32.gmra.mxu1 %v3930_v23 }
  0x57   : > { %1448 = vmatprep.subr.mxu1 %v3563_v3  ;;  %473 = vmatprep.mubr.f32.mxu0 %v3934_v24 }
  0x58   : > { %1449 = vmatpush2.msra.mxu1 %v3031_v26  ;;  %3302 = vmatprep.mubr.f32.mxu1 %v3946_v27  ;;  %v4094_v26 = vld [vmem:[%s3716_s6 + $0x198] sm:$0xff] }
  0x59   : > { %1450 = vmatprep.subr.mxu1 %v3563_v3  ;;  %3323 = vmatprep.subr.mxu0 %v3955_v30 }
  0x5a   : > { %1451 = vmatpush2.msra.mxu1 %v3030_v31  ;;  %474 = vmatmul.mubr.f32.gmra.mxu0 %v3963_v32  ;;  %v4102_v31 = vld [vmem:[%s3716_s6 + $0x28] sm:$0xff] }
  0x5b   : > { %3303 = vmatmul.mubr.f32.gmra.mxu1 %v3967_v35  ;;  %1452 = vmatprep.subr.mxu1 %v3563_v3 }
  0x5c   : > { %1453 = vmatpush2.msra.mxu1 %v3029_v37  ;;  %478 = vmatprep.mubr.f32.mxu0 %v3726_v33  ;;  %v1031_v37 = vrot.slane %v3927_v22, 1 }
  0x5d   : > { %1454 = vmatprep.subr.mxu1 %v3563_v3  ;;  %3305 = vmatprep.mubr.f32.mxu1 %v3983_v42 }
  0x5e   : > { %1455 = vmatpush2.msra.mxu1 %v3028_v43  ;;  %479 = vmatmul.mubr.f32.gmra.mxu0 %v3914_v17  ;;  %v1902_v43 = vrot.slane %v3914_v17, 2  ;;  %v1036_v17 = vsel %vm1030_vm0, %v1034_v18, %v1035_v21 }
  0x5f   : > { %3306 = vmatmul.mubr.f32.gmra.mxu1 %v3992_v45  ;;  %1456 = vmatprep.subr.mxu1 %v3563_v3 }
  0x60   : > { %1457 = vmatpush2.msra.mxu1 %v3027_v48  ;;  %483 = vmatprep.mubr.f32.mxu0 %v3730_v34  ;;  %v1903_v48 = vrot.slane %v3934_v24, 2 }
  0x61   : > { %1458 = vmatprep.subr.mxu1 %v3563_v3  ;;  %3308 = vmatprep.mubr.f32.mxu1 %v4008_v53 }
  0x62   : > { %1459 = vmatpush2.msra.mxu1 %v3026_v54  ;;  %484 = vmatmul.mubr.f32.gmra.mxu0 %v3934_v24  ;;  %v4118_v54 = vld [vmem:[%s3716_s6 + $0x10] sm:$0xff]  ;;  %v4137_v8 = vsel %vm1898_vm1, %v1902_v43, %v1903_v48  ;;  %v3045_v43 = vld [vmem:[%s5370_s1 + $0x2e8] sm:$0xff] }
  0x63   : > { %3309 = vmatmul.mubr.f32.gmra.mxu1 %v4017_v55  ;;  %1460 = vmatprep.subr.mxu1 %v3563_v3 }
  0x64   : > { %1461 = vmatpush2.msra.mxu1 %v3025_v59  ;;  %488 = vmatprep.mubr.f32.mxu0 %v3746_v38  ;;  %v1899_v59 = vrot.slane %v3927_v22, 2  ;;  %v1033_v22 = vsel %vm1030_vm0, %v1031_v37, %v1032_v39  ;;  %v4154_v37 = vld [vmem:[%s3716_s6 + $0x40] sm:$0xff] }
  0x65   : > { %1462 = vmatprep.subr.mxu1 %v3563_v3  ;;  %3311 = vmatprep.mubr.f32.mxu1 %v4031_v60 }
  0x66   : > { %1463 = vmatpush2.msra.mxu1 %v3024_v61  ;;  %489 = vmatmul.mubr.f32.gmra.mxu0 %v3726_v33  ;;  %v3021_v33 = vld [vmem:[%s5370_s1 + $0x228] sm:$0xff]  ;;  %v1900_v61 = vrot.slane %v3963_v32, 2 }
  0x67   : > { %3312 = vmatmul.mubr.f32.gmra.mxu1 %v4040_v63  ;;  %1464 = vmatprep.subr.mxu1 %v3563_v3  ;;  %v3085_v32 = vld [vmem:[%s5370_s1 + $0x428] sm:$0xff] }
  0x68   : > { %1465 = vmatpush2.msra.mxu1 %v3023_v1  ;;  %493 = vmatprep.mubr.f32.mxu0 %v3754_v40  ;;  %v1042_v1 = vrot.slane %v4102_v31, 1  ;;  %v4147_v18 = vsel %vm1898_vm1, %v1899_v59, %v1900_v61  ;;  %v4180_v59 = vld [vmem:[%s3716_s6 + $0x58] sm:$0xff] }
  0x69   : > { %1466 = vmatprep.subr.mxu1 %v3563_v3  ;;  %3314 = vmatprep.mubr.f32.mxu1 %v4049_v2 }
  0x6a   : > { %1467 = vmatpush2.msra.mxu1 %v3022_v4  ;;  %494 = vmatmul.mubr.f32.gmra.mxu0 %v3730_v34  ;;  %v3016_v4 = vld [vmem:[%s5370_s1 + $0x200] sm:$0xff]  ;;  %v1072_v34 = vrot.slane %v4180_v59, 1 }
  0x6b   : > { %3315 = vmatmul.mubr.f32.gmra.mxu1 %v4058_v6  ;;  %1468 = vmatprep.subr.mxu1 %v3563_v3 }
  0x6c   : > { %1469 = vmatpush2.msra.mxu1 %v3021_v33  ;;  %498 = vmatprep.mubr.f32.mxu0 %v3770_v44  ;;  %v1040_v33 = vrot.slane %v4118_v54, 1 }
  0x6d   : > { %1470 = vmatprep.subr.mxu1 %v3563_v3  ;;  %3317 = vmatprep.mubr.f32.mxu1 %v4069_v10 }
  0x6e   : > { %1471 = vmatpush2.msra.mxu1 %v3020_v12  ;;  %499 = vmatmul.mubr.f32.gmra.mxu0 %v3746_v38  ;;  %v4108_v38 = vld [vmem:[%s3716_s6 + $0x1a0] sm:$0xff]  ;;  %v3063_v12 = vld [vmem:[%s5370_s1 + $0x378] sm:$0xff] }
  0x6f   : > { %3318 = vmatmul.mubr.f32.gmra.mxu1 %v4078_v14  ;;  %1472 = vmatprep.subr.mxu1 %v3563_v3 }
  0x70   : > { %1473 = vmatpush2.msra.mxu1 %v3019_v16  ;;  %503 = vmatprep.mubr.f32.mxu0 %v3778_v46  ;;  %v1043_v16 = vsel %vm1030_vm0, %v1035_v21, %v1042_v1  ;;  %v1057_v21 = vrot.slane %v4154_v37, 1  ;;  %v3060_v1 = vld [vmem:[%s5370_s1 + $0x360] sm:$0xff] }
  0x71   : > { %1474 = vmatprep.subr.mxu1 %v3563_v3  ;;  %3320 = vmatprep.mubr.f32.mxu1 %v4094_v26 }
  0x72   : > { %1475 = vmatpush2.msra.mxu1 %v3018_v28  ;;  %504 = vmatmul.mubr.f32.gmra.mxu0 %v3754_v40  ;;  %v3046_v28 = vld [vmem:[%s5370_s1 + $0x2f0] sm:$0xff] }
  0x73   : > { %3321 = vmatmul.mubr.f32.gmra.mxu1 %v4108_v38  ;;  %1476 = vmatprep.subr.mxu1 %v3563_v3  ;;  %v3058_v40 = vld [vmem:[%s5370_s1 + $0x350] sm:$0xff] }
  0x74   : > { %1477 = vmatpush2.msra.mxu1 %v3017_v49  ;;  %508 = vmatprep.mubr.f32.mxu0 %v3794_v50  ;;  %v4177_v49 = vsel %vm1030_vm0, %v1038_v19, %v1057_v21  ;;  %v3059_v19 = vld [vmem:[%s5370_s1 + $0x358] sm:$0xff]  ;;  %v3041_v21 = vld [vmem:[%s5370_s1 + $0x2c8] sm:$0xff] }
  0x75   : > { %1478 = vmatprep.subr.mxu1 %v3563_v3  ;;  %1480 = vmatprep.mubr.f32.mxu1 %v1036_v17 }
  0x76   : > { %1479 = vmatpush2.msra.mxu1 %v3016_v4  ;;  %3324 = vmatpush3.msra.mxu0 %v3955_v30  ;;  %v1041_v30 = vsel %vm1030_vm0, %v1032_v39, %v1040_v33  ;;  %v3061_v39 = vld [vmem:[%s5370_s1 + $0x368] sm:$0xff]  ;;  %v4206_v4 = vld [vmem:[%s3716_s6 + $0x70] sm:$0xff] }
  0x77   : > { %509 = vmatmul.mubr.f32.gmra.mxu0 %v3770_v44  ;;  %1481 = vmatmul.mubr.f32.vlgmr.msra.gmra.mxu1 %v1033_v22  ;;  %v3062_v44 = vld [vmem:[%s5370_s1 + $0x370] sm:$0xff]  ;;  %v3043_v22 = vld [vmem:[%s5370_s1 + $0x2d8] sm:$0xff] }
  0x78   : > { %2284 = vmatprep.subr.mxu1 %v3563_v3  ;;  %513 = vmatprep.mubr.f32.mxu0 %v3802_v52  ;;  %v3042_v33 = vld [vmem:[%s5370_s1 + $0x2d0] sm:$0xff] }
  0x79   : > { %2285 = vmatpush1.msra.mxu1 %v3063_v12  ;;  %1485 = vmatprep.mubr.f32.mxu1 %v1043_v16  ;;  %v1262_v12 = vrot.slane %v4094_v26, 1 }
  0x7a   : > { %2286 = vmatprep.subr.mxu1 %v3563_v3  ;;  %3325 = vmatprep.subr.mxu0 %v3046_v28 }
  0x7b   : > { %514 = vmatmul.mubr.f32.gmra.mxu0 %v3778_v46  ;;  %1486 = vmatmul.mubr.f32.gmra.mxu1 %v1041_v30  ;;  %v3056_v46 = vld [vmem:[%s5370_s1 + $0x340] sm:$0xff] }
  0x7c   : > { %2287 = vmatpush1.msra.mxu1 %v3062_v44  ;;  %518 = vmatprep.mubr.f32.mxu0 %v3818_v56  ;;  %v4239_v44 = vld [vmem:[%s3716_s6 + $0x88] sm:$0xff] }
  0x7d   : > { %1490 = vmatprep.mubr.f32.mxu1 %v3939_v25  ;;  %3326 = vmatpush3.msra.mxu0 %v3046_v28  ;;  %v3057_v28 = vld [vmem:[%s5370_s1 + $0x348] sm:$0xff] }
  0x7e   : > { %2288 = vmatprep.subr.mxu1 %v3563_v3  ;;  %3327 = vmatprep.subr.mxu0 %v3045_v43 }
  0x7f   : > { %519 = vmatmul.mubr.f32.gmra.mxu0 %v3794_v50  ;;  %1491 = vmatmul.mubr.f32.gmra.mxu1 %v1036_v17  ;;  %v3044_v50 = vld [vmem:[%s5370_s1 + $0x2e0] sm:$0xff]  ;;  %v4203_v17 = vsel %vm1030_vm0, %v1053_v29, %v1072_v34  ;;  %v1087_v29 = vrot.slane %v4206_v4, 1  ;;  %v1097_v34 = vrot.slane %v3818_v56, 1 }
  0x80   : > { %2289 = vmatpush1.msra.mxu1 %v3061_v39  ;;  %523 = vmatprep.mubr.f32.mxu0 %v3826_v58  ;;  %v3040_v39 = vld [vmem:[%s5370_s1 + $0x2c0] sm:$0xff] }
  0x81   : > { %1495 = vmatprep.mubr.f32.mxu1 %v4177_v49  ;;  %2290 = vmatprep.subr.mxu1 %v3563_v3  ;;  %v4236_v30 = vsel %vm1030_vm0, %v1068_v41, %v1087_v29  ;;  %v1112_v29 = vrot.slane %v3842_v62, 1 }
  0x82   : > { %2291 = vmatpush1.msra.mxu1 %v3060_v1  ;;  %3328 = vmatpush3.msra.mxu0 %v3045_v43  ;;  %v1102_v43 = vrot.slane %v4239_v44, 1  ;;  %v3055_v1 = vld [vmem:[%s5370_s1 + $0x338] sm:$0xff] }
  0x83   : > { %524 = vmatmul.mubr.f32.gmra.mxu0 %v3802_v52  ;;  %1496 = vmatmul.mubr.f32.gmra.mxu1 %v1043_v16  ;;  %v1263_v16 = vrot.slane %v4108_v38, 1  ;;  %v3054_v52 = vld [vmem:[%s5370_s1 + $0x330] sm:$0xff] }
  0x84   : > { %528 = vmatprep.mubr.f32.mxu0 %v3842_v62  ;;  %1500 = vmatprep.mubr.f32.mxu1 %v3972_v36 }
  0x85   : > { %2292 = vmatprep.subr.mxu1 %v3563_v3  ;;  %3329 = vmatprep.subr.mxu0 %v3044_v50  ;;  %v4252_v41 = vsel %vm1030_vm0, %v1262_v12, %v1263_v16 }
  0x86   : > { %2293 = vmatpush1.msra.mxu1 %v3059_v19  ;;  %3330 = vmatpush3.msra.mxu0 %v3044_v50  ;;  %v1098_v50 = vrot.slane %v3826_v58, 1  ;;  %v4274_v19 = vsel %vm1030_vm0, %v1083_v51, %v1102_v43  ;;  %v3053_v51 = vld [vmem:[%s5370_s1 + $0x328] sm:$0xff]  ;;  %v3036_v43 = vld [vmem:[%s5370_s1 + $0x2a0] sm:$0xff] }
  0x87   : > { %529 = vmatmul.mubr.f32.gmra.mxu0 %v3818_v56  ;;  %1501 = vmatmul.mubr.f32.gmra.mxu1 %v3939_v25 }
  0x88   : > { %533 = vmatprep.mubr.f32.mxu0 %v3850_v0  ;;  %1505 = vmatprep.mubr.f32.mxu1 %v4203_v17  ;;  %v4291_v56 = vsel %vm1030_vm0, %v1097_v34, %v1098_v50  ;;  %v4343_v34 = vld [vmem:[%s3716_s6 + $0xd0] sm:$0xff] }
  0x89   : > { %2294 = vmatprep.subr.mxu1 %v3563_v3  ;;  %3331 = vmatprep.subr.mxu0 %v3043_v22 }
  0x8a   : > { %2295 = vmatpush1.msra.mxu1 %v3058_v40  ;;  %3332 = vmatpush3.msra.mxu0 %v3043_v22  ;;  %v4277_v22 = vld [vmem:[%s3716_s6 + $0xa0] sm:$0xff]  ;;  %v3039_v40 = vld [vmem:[%s5370_s1 + $0x2b8] sm:$0xff] }
  0x8b   : > { %534 = vmatmul.mubr.f32.gmra.mxu0 %v3826_v58  ;;  %1506 = vmatmul.mubr.f32.gmra.mxu1 %v4177_v49  ;;  %v1117_v58 = vrot.slane %v4277_v22, 1 }
  0x8c   : > { %538 = vmatprep.mubr.f32.mxu0 %v3866_v5  ;;  %1510 = vmatprep.mubr.f32.mxu1 %v3997_v47 }
  0x8d   : > { %2296 = vmatprep.subr.mxu1 %v3563_v3  ;;  %3333 = vmatprep.subr.mxu0 %v3042_v33  ;;  %v4308_v12 = vsel %vm1030_vm0, %v1098_v50, %v1117_v58  ;;  %v3035_v50 = vld [vmem:[%s5370_s1 + $0x298] sm:$0xff]  ;;  %v3034_v58 = vld [vmem:[%s5370_s1 + $0x290] sm:$0xff] }
  0x8e   : > { %2297 = vmatpush1.msra.mxu1 %v3057_v28  ;;  %3334 = vmatpush3.msra.mxu0 %v3042_v33  ;;  %v1113_v33 = vrot.slane %v3850_v0, 1  ;;  %v4311_v28 = vld [vmem:[%s3716_s6 + $0xb8] sm:$0xff] }
  0x8f   : > { %539 = vmatmul.mubr.f32.gmra.mxu0 %v3842_v62  ;;  %1511 = vmatmul.mubr.f32.gmra.mxu1 %v3972_v36  ;;  %v3052_v62 = vld [vmem:[%s5370_s1 + $0x320] sm:$0xff] }
  0x90   : > { %543 = vmatprep.mubr.f32.mxu0 %v3874_v7  ;;  %1515 = vmatprep.mubr.f32.mxu1 %v4236_v30 }
  0x91   : > { %2298 = vmatprep.subr.mxu1 %v3563_v3  ;;  %3335 = vmatprep.subr.mxu0 %v3041_v21 }
  0x92   : > { %2299 = vmatpush1.msra.mxu1 %v3056_v46  ;;  %3336 = vmatpush3.msra.mxu0 %v3041_v21  ;;  %v3037_v21 = vld [vmem:[%s5370_s1 + $0x2a8] sm:$0xff]  ;;  %v1132_v46 = vrot.slane %v4311_v28, 1 }
  0x93   : > { %544 = vmatmul.mubr.f32.gmra.mxu0 %v3850_v0  ;;  %1516 = vmatmul.mubr.f32.gmra.mxu1 %v4203_v17  ;;  %v4325_v0 = vsel %vm1030_vm0, %v1112_v29, %v1113_v33  ;;  %v1143_v29 = vrot.slane %v3898_v13, 1 }
  0x94   : > { %548 = vmatprep.mubr.f32.mxu0 %v3890_v11  ;;  %1520 = vmatprep.mubr.f32.mxu1 %v4022_v57 }
  0x95   : > { %2300 = vmatprep.subr.mxu1 %v3563_v3  ;;  %3337 = vmatprep.subr.mxu0 %v3040_v39 }
  0x96   : > { %2301 = vmatpush1.msra.mxu1 %v3055_v1  ;;  %3338 = vmatpush3.msra.mxu0 %v3040_v39  ;;  %v3051_v39 = vld [vmem:[%s5370_s1 + $0x318] sm:$0xff]  ;;  %v4340_v1 = vsel %vm1030_vm0, %v1113_v33, %v1132_v46 }
  0x97   : > { %549 = vmatmul.mubr.f32.gmra.mxu0 %v3866_v5  ;;  %1521 = vmatmul.mubr.f32.gmra.mxu1 %v3997_v47  ;;  %v3038_v5 = vld [vmem:[%s5370_s1 + $0x2b0] sm:$0xff]  ;;  %v3079_v46 = vld [vmem:[%s5370_s1 + $0x3f8] sm:$0xff] }
  0x98   : > { %553 = vmatprep.mubr.f32.mxu0 %v3898_v13  ;;  %1525 = vmatprep.mubr.f32.mxu1 %v4274_v19 }
  0x99   : > { %2302 = vmatprep.subr.mxu1 %v3563_v3  ;;  %3339 = vmatprep.subr.mxu0 %v3039_v40 }
  0x9a   : > { %2303 = vmatpush1.msra.mxu1 %v3054_v52  ;;  %3340 = vmatpush3.msra.mxu0 %v3039_v40  ;;  %v3050_v40 = vld [vmem:[%s5370_s1 + $0x310] sm:$0xff]  ;;  %v1147_v52 = vrot.slane %v4343_v34, 1 }
  0x9b   : > { %554 = vmatmul.mubr.f32.gmra.mxu0 %v3874_v7  ;;  %1526 = vmatmul.mubr.f32.gmra.mxu1 %v4236_v30  ;;  %v3048_v7 = vld [vmem:[%s5370_s1 + $0x300] sm:$0xff] }
  0x9c   : > { %558 = vmatprep.mubr.f32.mxu0 %v3919_v20  ;;  %1530 = vmatprep.mubr.f32.mxu1 %v4291_v56  ;;  %v4373_v33 = vsel %vm1030_vm0, %v1128_v9, %v1147_v52  ;;  %v3032_v9 = vld [vmem:[%s5370_s1 + $0x280] sm:$0xff]  ;;  %v4415_v52 = vld [vmem:[%s5370_s1 + $0x478] sm:$0xff] }
  0x9d   : > { %2304 = vmatprep.subr.mxu1 %v3563_v3  ;;  %3341 = vmatprep.subr.mxu0 %v3038_v5 }
  0x9e   : > { %2305 = vmatpush1.msra.mxu1 %v3053_v51  ;;  %3342 = vmatpush3.msra.mxu0 %v3038_v5  ;;  %v3049_v5 = vld [vmem:[%s5370_s1 + $0x308] sm:$0xff]  ;;  %v1142_v51 = vrot.slane %v3890_v11, 1 }
  0x9f   : > { %559 = vmatmul.mubr.f32.gmra.mxu0 %v3890_v11  ;;  %1531 = vmatmul.mubr.f32.gmra.mxu1 %v4022_v57 }
  0xa0   : > { %563 = vmatprep.mubr.f32.mxu0 %v3930_v23  ;;  %1535 = vmatprep.mubr.f32.mxu1 %v4308_v12  ;;  %v4390_v11 = vsel %vm1030_vm0, %v1142_v51, %v1143_v29  ;;  %v1172_v51 = vrot.slane %v3946_v27, 1 }
  0xa1   : > { %2306 = vmatprep.subr.mxu1 %v3563_v3  ;;  %3343 = vmatprep.subr.mxu0 %v3037_v21 }
  0xa2   : > { %2307 = vmatpush1.msra.mxu1 %v3052_v62  ;;  %3344 = vmatpush3.msra.mxu0 %v3037_v21  ;;  %v4376_v21 = vld [vmem:[%s3716_s6 + $0xe8] sm:$0xff] }
  0xa3   : > { %564 = vmatmul.mubr.f32.gmra.mxu0 %v3898_v13  ;;  %1536 = vmatmul.mubr.f32.gmra.mxu1 %v4274_v19  ;;  %v3033_v62 = vld [vmem:[%s5370_s1 + $0x288] sm:$0xff]  ;;  %v1162_v13 = vrot.slane %v4376_v21, 1 }
  0xa4   : > { %568 = vmatprep.mubr.f32.mxu0 %v3946_v27  ;;  %1540 = vmatprep.mubr.f32.mxu1 %v4325_v0 }
  0xa5   : > { %2308 = vmatprep.subr.mxu1 %v3563_v3  ;;  %3345 = vmatprep.subr.mxu0 %v3036_v43 }
  0xa6   : > { %2309 = vmatpush1.msra.mxu1 %v3051_v39  ;;  %3346 = vmatpush3.msra.mxu0 %v3036_v43  ;;  %v1157_v43 = vrot.slane %v3919_v20, 1  ;;  %v1158_v39 = vrot.slane %v3930_v23, 1 }
  0xa7   : > { %569 = vmatmul.mubr.f32.gmra.mxu0 %v3919_v20  ;;  %1541 = vmatmul.mubr.f32.gmra.mxu1 %v4291_v56  ;;  %v3078_v20 = vld [vmem:[%s5370_s1 + $0x3f0] sm:$0xff] }
  0xa8   : > { %573 = vmatprep.mubr.f32.mxu0 %v3967_v35  ;;  %1545 = vmatprep.mubr.f32.mxu1 %v4340_v1 }
  0xa9   : > { %2310 = vmatprep.subr.mxu1 %v3563_v3  ;;  %3347 = vmatprep.subr.mxu0 %v3035_v50 }
  0xaa   : > { %2311 = vmatpush1.msra.mxu1 %v3050_v40  ;;  %3348 = vmatpush3.msra.mxu0 %v3035_v50  ;;  %v4407_v50 = vsel %vm1030_vm0, %v1143_v29, %v1162_v13  ;;  %v4410_v40 = vld [vmem:[%s3716_s6 + $0x100] sm:$0xff]  ;;  %v1173_v29 = vrot.slane %v3967_v35, 1 }
  0xab   : > { %574 = vmatmul.mubr.f32.gmra.mxu0 %v3930_v23  ;;  %1546 = vmatmul.mubr.f32.gmra.mxu1 %v4308_v12  ;;  %v4426_v23 = vsel %vm1030_vm0, %v1157_v43, %v1158_v39  ;;  %v3076_v13 = vld [vmem:[%s5370_s1 + $0x3e0] sm:$0xff]  ;;  %v1188_v43 = vrot.slane %v3992_v45, 1 }
  0xac   : > { %578 = vmatprep.mubr.f32.mxu0 %v3983_v42  ;;  %1550 = vmatprep.mubr.f32.mxu1 %v4083_v15 }
  0xad   : > { %2312 = vmatprep.subr.mxu1 %v3563_v3  ;;  %3349 = vmatprep.subr.mxu0 %v3034_v58 }
  0xae   : > { %2313 = vmatpush1.msra.mxu1 %v3049_v5  ;;  %3350 = vmatpush3.msra.mxu0 %v3034_v58  ;;  %v1177_v58 = vrot.slane %v4410_v40, 1  ;;  %v3077_v5 = vld [vmem:[%s5370_s1 + $0x3e8] sm:$0xff] }
  0xaf   : > { %579 = vmatmul.mubr.f32.gmra.mxu0 %v3946_v27  ;;  %1551 = vmatmul.mubr.f32.gmra.mxu1 %v4325_v0  ;;  %v4455_v27 = vsel %vm1030_vm0, %v1172_v51, %v1173_v29  ;;  %v1202_v51 = vrot.slane %v4008_v53, 1 }
  0xb0   : > { %583 = vmatprep.mubr.f32.mxu0 %v3992_v45  ;;  %1555 = vmatprep.mubr.f32.mxu1 %v4373_v33 }
  0xb1   : > { %2314 = vmatprep.subr.mxu1 %v3563_v3  ;;  %3351 = vmatprep.subr.mxu0 %v3033_v62 }
  0xb2   : > { %2315 = vmatpush1.msra.mxu1 %v3048_v7  ;;  %3352 = vmatpush3.msra.mxu0 %v3033_v62  ;;  %v4441_v62 = vsel %vm1030_vm0, %v1158_v39, %v1177_v58  ;;  %v4444_v7 = vld [vmem:[%s3716_s6 + $0x118] sm:$0xff]  ;;  %v3074_v58 = vld [vmem:[%s5370_s1 + $0x3d0] sm:$0xff] }
  0xb3   : > { %584 = vmatmul.mubr.f32.gmra.mxu0 %v3967_v35  ;;  %1556 = vmatmul.mubr.f32.gmra.mxu1 %v4340_v1  ;;  %v1192_v35 = vrot.slane %v4444_v7, 1 }
  0xb4   : > { %588 = vmatprep.mubr.f32.mxu0 %v4008_v53  ;;  %1560 = vmatprep.mubr.f32.mxu1 %v4390_v11 }
  0xb5   : > { %2316 = vmatprep.subr.mxu1 %v3563_v3  ;;  %3353 = vmatprep.subr.mxu0 %v3032_v9  ;;  %v4469_v39 = vsel %vm1030_vm0, %v1173_v29, %v1192_v35  ;;  %v1203_v29 = vrot.slane %v4017_v55, 1  ;;  %v4500_v35 = vld [vmem:[%s3716_s6 + $0x148] sm:$0xff] }
  0xb6   : > { %2317 = vmatpush2.msra.mxu1 %v3079_v46  ;;  %3354 = vmatpush3.msra.mxu0 %v3032_v9  ;;  %v3075_v9 = vld [vmem:[%s5370_s1 + $0x3d8] sm:$0xff]  ;;  %v1187_v46 = vrot.slane %v3983_v42, 1 }
  0xb7   : > { %589 = vmatmul.mubr.f32.gmra.mxu0 %v3983_v42  ;;  %1561 = vmatmul.mubr.f32.gmra.mxu1 %v4083_v15 }
  0xb8   : > { %593 = vmatprep.mubr.f32.mxu0 %v4017_v55  ;;  %1565 = vmatprep.mubr.f32.mxu1 %v4407_v50  ;;  %v4483_v42 = vsel %vm1030_vm0, %v1187_v46, %v1188_v43  ;;  %v3071_v46 = vld [vmem:[%s5370_s1 + $0x3b8] sm:$0xff] }
  0xb9   : > { %2318 = vmatprep.subr.mxu1 %v3563_v3  ;;  %3403 = vmatprep.subr.mxu0 %v4415_v52 }
  0xba   : > { %2319 = vmatpush2.msra.mxu1 %v3078_v20  ;;  %v4472_v20 = vld [vmem:[%s3716_s6 + $0x130] sm:$0xff] }
  0xbb   : > { %594 = vmatmul.mubr.f32.gmra.mxu0 %v3992_v45  ;;  %1566 = vmatmul.mubr.f32.gmra.mxu1 %v4373_v33  ;;  %v1207_v45 = vrot.slane %v4472_v20, 1 }
  0xbc   : > { %598 = vmatprep.mubr.f32.mxu0 %v4031_v60  ;;  %1570 = vmatprep.mubr.f32.mxu1 %v4426_v23 }
  0xbd   : > { %2320 = vmatprep.subr.mxu1 %v3563_v3 }
  0xbe   : > { %2321 = vmatpush2.msra.mxu1 %v3077_v5  ;;  %v3073_v5 = vld [vmem:[%s5370_s1 + $0x3c8] sm:$0xff] }
  0xbf   : > { %599 = vmatmul.mubr.f32.gmra.mxu0 %v4008_v53  ;;  %1571 = vmatmul.mubr.f32.gmra.mxu1 %v4390_v11  ;;  %v4511_v53 = vsel %vm1030_vm0, %v1202_v51, %v1203_v29 }
  0xc0   : > { %603 = vmatprep.mubr.f32.mxu0 %v4040_v63  ;;  %1575 = vmatprep.mubr.f32.mxu1 %v4441_v62 }
  0xc1   : > { %2322 = vmatprep.subr.mxu1 %v3563_v3 }
  0xc2   : > { %2323 = vmatpush2.msra.mxu1 %v3076_v13  ;;  %v4497_v13 = vsel %vm1030_vm0, %v1188_v43, %v1207_v45  ;;  %v1217_v43 = vrot.slane %v4031_v60, 1 }
  0xc3   : > { %604 = vmatmul.mubr.f32.gmra.mxu0 %v4017_v55  ;;  %1576 = vmatmul.mubr.f32.gmra.mxu1 %v4407_v50  ;;  %v1222_v55 = vrot.slane %v4500_v35, 1 }
  0xc4   : > { %608 = vmatprep.mubr.f32.mxu0 %v4049_v2  ;;  %1580 = vmatprep.mubr.f32.mxu1 %v4455_v27 }
  0xc5   : > { %2324 = vmatprep.subr.mxu1 %v3563_v3  ;;  %v4525_v45 = vsel %vm1030_vm0, %v1203_v29, %v1222_v55  ;;  %v1233_v29 = vrot.slane %v4058_v6, 1 }
  0xc6   : > { %2325 = vmatpush2.msra.mxu1 %v3075_v9  ;;  %v3072_v9 = vld [vmem:[%s5370_s1 + $0x3c0] sm:$0xff] }
  0xc7   : > { %609 = vmatmul.mubr.f32.gmra.mxu0 %v4031_v60  ;;  %1581 = vmatmul.mubr.f32.gmra.mxu1 %v4426_v23  ;;  %v3094_v60 = vld [vmem:[%s5370_s1 + $0x470] sm:$0xff] }
  0xc8   : > { %613 = vmatprep.mubr.f32.mxu0 %v4058_v6  ;;  %1585 = vmatprep.mubr.f32.mxu1 %v4469_v39 }
  0xc9   : > { %2326 = vmatprep.subr.mxu1 %v3563_v3 }
  0xca   : > { %2327 = vmatpush2.msra.mxu1 %v3074_v58  ;;  %v1218_v58 = vrot.slane %v4040_v63, 1 }
  0xcb   : > { %614 = vmatmul.mubr.f32.gmra.mxu0 %v4040_v63  ;;  %1586 = vmatmul.mubr.f32.gmra.mxu1 %v4441_v62 }
  0xcc   : > { %618 = vmatprep.mubr.f32.mxu0 %v4069_v10  ;;  %1590 = vmatprep.mubr.f32.mxu1 %v4483_v42  ;;  %v4542_v63 = vsel %vm1030_vm0, %v1217_v43, %v1218_v58  ;;  %v1248_v43 = vrot.slane %v4078_v14, 1 }
  0xcd   : > { %2328 = vmatprep.subr.mxu1 %v3563_v3 }
  0xce   : > { %2329 = vmatpush2.msra.mxu1 %v3073_v5  ;;  %v4528_v5 = vld [vmem:[%s3716_s6 + $0x160] sm:$0xff] }
  0xcf   : > { %619 = vmatmul.mubr.f32.gmra.mxu0 %v4049_v2  ;;  %1591 = vmatmul.mubr.f32.gmra.mxu1 %v4455_v27  ;;  %v1237_v51 = vrot.slane %v4528_v5, 1 }
  0xd0   : > { %623 = vmatprep.mubr.f32.mxu0 %v4078_v14  ;;  %1595 = vmatprep.mubr.f32.mxu1 %v4497_v13  ;;  %v3090_v14 = vld [vmem:[%s5370_s1 + $0x450] sm:$0xff] }
  0xd1   : > { %2330 = vmatprep.subr.mxu1 %v3563_v3 }
  0xd2   : > { %2331 = vmatpush2.msra.mxu1 %v3072_v9  ;;  %v4563_v9 = vld [vmem:[%s3716_s6 + $0x178] sm:$0xff] }
  0xd3   : > { %624 = vmatmul.mubr.f32.gmra.mxu0 %v4058_v6  ;;  %1596 = vmatmul.mubr.f32.gmra.mxu1 %v4469_v39  ;;  %v1252_v55 = vrot.slane %v4563_v9, 1 }
  0xd4   : > { %1600 = vmatprep.mubr.f32.mxu1 %v4511_v53  ;;  %3355 = vmatprep.mubr.f32.mxu0 %v3939_v25  ;;  %v3070_v25 = vld [vmem:[%s5370_s1 + $0x3b0] sm:$0xff] }
  0xd5   : > { %2332 = vmatprep.subr.mxu1 %v3563_v3 }
  0xd6   : > { %2333 = vmatpush2.msra.mxu1 %v3071_v46  ;;  %v1247_v46 = vrot.slane %v4069_v10, 1  ;;  %v3066_v10 = vld [vmem:[%s5370_s1 + $0x390] sm:$0xff] }
  0xd7   : > { %1601 = vmatmul.mubr.f32.gmra.mxu1 %v4483_v42  ;;  %3356 = vmatmul.mubr.f32.vlgmr.msra.gmra.mxu0 %v4177_v49  ;;  %v3093_v49 = vld [vmem:[%s5370_s1 + $0x468] sm:$0xff] }
  0xd8   : > { %1605 = vmatprep.mubr.f32.mxu1 %v4525_v45  ;;  %3358 = vmatprep.mubr.f32.mxu0 %v3972_v36  ;;  %v3069_v36 = vld [vmem:[%s5370_s1 + $0x3a8] sm:$0xff] }
  0xd9   : > { %2334 = vmatprep.subr.mxu1 %v3563_v3  ;;  %3404 = vmatpush3.msra.mxu0 %v4415_v52  ;;  %v1232_v52 = vrot.slane %v4049_v2, 1  ;;  %v3092_v2 = vld [vmem:[%s5370_s1 + $0x460] sm:$0xff] }
  0xda   : > { %2335 = vmatpush2.msra.mxu1 %v3070_v25  ;;  %3405 = vmatprep.subr.mxu0 %v3094_v60  ;;  %v2130_v25 = vrot.slane %v4094_v26, 2  ;;  %v4613_v26 = vsel %vm1030_vm0, %v1247_v46, %v1248_v43 }
  0xdb   : > { %1606 = vmatmul.mubr.f32.gmra.mxu1 %v4497_v13  ;;  %3359 = vmatmul.mubr.f32.gmra.mxu0 %v4203_v17  ;;  %v4560_v17 = vsel %vm1030_vm0, %v1218_v58, %v1237_v51  ;;  %v4577_v6 = vsel %vm1030_vm0, %v1232_v52, %v1233_v29  ;;  %v4597_v58 = vld [vmem:[%s3716_s6 + $0x190] sm:$0xff] }
  0xdc   : > { %1610 = vmatprep.mubr.f32.mxu1 %v4542_v63  ;;  %3361 = vmatprep.mubr.f32.mxu0 %v3997_v47  ;;  %v3068_v47 = vld [vmem:[%s5370_s1 + $0x3a0] sm:$0xff] }
  0xdd   : > { %2336 = vmatprep.subr.mxu1 %v3563_v3  ;;  %3406 = vmatpush3.msra.mxu0 %v3094_v60  ;;  %v2131_v60 = vrot.slane %v4108_v38, 2  ;;  %v3518_v38 = vld [vmem:[%s3716_s6 + $0x98] sm:$0xff] }
  0xde   : > { %2337 = vmatpush2.msra.mxu1 %v3069_v36  ;;  %3407 = vmatprep.subr.mxu0 %v3093_v49  ;;  %v3089_v36 = vld [vmem:[%s5370_s1 + $0x448] sm:$0xff] }
  0xdf   : > { %1611 = vmatmul.mubr.f32.gmra.mxu1 %v4511_v53  ;;  %3362 = vmatmul.mubr.f32.gmra.mxu0 %v4236_v30  ;;  %v3067_v30 = vld [vmem:[%s5370_s1 + $0x398] sm:$0xff] }
  0xe0   : > { %1615 = vmatprep.mubr.f32.mxu1 %v4560_v17  ;;  %3364 = vmatprep.mubr.f32.mxu0 %v4022_v57  ;;  %v3091_v57 = vld [vmem:[%s5370_s1 + $0x458] sm:$0xff] }
  0xe1   : > { %2338 = vmatprep.subr.mxu1 %v3563_v3  ;;  %3408 = vmatpush3.msra.mxu0 %v3093_v49  ;;  %v4629_v49 = vsel %vm1898_vm1, %v2130_v25, %v2131_v60  ;;  %v3512_v25 = vld [vmem:[%s3716_s6 + $0x50] sm:$0xff] }
  0xe2   : > { %2339 = vmatpush2.msra.mxu1 %v3068_v47  ;;  %3409 = vmatprep.subr.mxu0 %v3092_v2  ;;  %v3088_v47 = vld [vmem:[%s5370_s1 + $0x440] sm:$0xff] }
  0xe3   : > { %1616 = vmatmul.mubr.f32.gmra.mxu1 %v4525_v45  ;;  %3365 = vmatmul.mubr.f32.gmra.mxu0 %v4274_v19  ;;  %v4594_v19 = vsel %vm1030_vm0, %v1233_v29, %v1252_v55 }
  0xe4   : > { %1620 = vmatprep.mubr.f32.mxu1 %v4577_v6  ;;  %3367 = vmatprep.mubr.f32.mxu0 %v4291_v56  ;;  %v1267_v56 = vrot.slane %v4597_v58, 1 }
  0xe5   : > { %2340 = vmatprep.subr.mxu1 %v3563_v3  ;;  %3410 = vmatpush3.msra.mxu0 %v3092_v2 }
  0xe6   : > { %2341 = vmatpush2.msra.mxu1 %v3067_v30  ;;  %3411 = vmatprep.subr.mxu0 %v3091_v57 }
  0xe7   : > { %1621 = vmatmul.mubr.f32.gmra.mxu1 %v4542_v63  ;;  %3368 = vmatmul.mubr.f32.gmra.mxu0 %v4308_v12  ;;  %v4617_v12 = vld [vmem:[%s3716_s6 + $0x1a8] sm:$0xff] }
  0xe8   : > { %1625 = vmatprep.mubr.f32.mxu1 %v4594_v19  ;;  %3370 = vmatprep.mubr.f32.mxu0 %v4325_v0  ;;  %v2137_v51 = vrot.slane %v4617_v12, 2  ;;  %v3065_v0 = vld [vmem:[%s5370_s1 + $0x388] sm:$0xff] }
  0xe9   : > { %2342 = vmatprep.subr.mxu1 %v3563_v3  ;;  %3412 = vmatpush3.msra.mxu0 %v3091_v57  ;;  %v3510_v57 = vld [vmem:[%s3716_s6 + $0x38] sm:$0xff] }
  0xea   : > { %2343 = vmatpush2.msra.mxu1 %v3066_v10  ;;  %3413 = vmatprep.subr.mxu0 %v3090_v14  ;;  %v4634_v52 = vsel %vm1898_vm1, %v2131_v60, %v2137_v51  ;;  %v1906_v46 = vrot.slane %v3510_v57, 2  ;;  %v1921_v60 = vrot.slane %v3512_v25, 2  ;;  %v3513_v51 = vld [vmem:[%s3716_s6 + $0x60] sm:$0xff] }
  0xeb   : > { %1626 = vmatmul.mubr.f32.gmra.mxu1 %v4560_v17  ;;  %3371 = vmatmul.mubr.f32.gmra.mxu0 %v4340_v1  ;;  %v4638_v1 = vsel %vm1030_vm0, %v1248_v43, %v1267_v56  ;;  %v1940_v56 = vrot.slane %v4180_v59, 2  ;;  %v3514_v59 = vld [vmem:[%s3716_s6 + $0x68] sm:$0xff]  ;;  %v3516_v57 = vld [vmem:[%s3716_s6 + $0x80] sm:$0xff] }
  0xec   : > { %1630 = vmatprep.mubr.f32.mxu1 %v4613_v26  ;;  %3373 = vmatprep.mubr.f32.mxu0 %v4083_v15  ;;  %v3064_v15 = vld [vmem:[%s5370_s1 + $0x380] sm:$0xff] }
  0xed   : > { %2344 = vmatprep.subr.mxu1 %v3563_v3  ;;  %3414 = vmatpush3.msra.mxu0 %v3090_v14 }
  0xee   : > { %2345 = vmatpush2.msra.mxu1 %v3065_v0  ;;  %v4640_v29 = vpop.f32.mrf.mxu1  ;;  %3415 = vmatprep.subr.mxu0 %v3089_v36  ;;  %v1935_v0 = vrot.slane %v3513_v51, 2  ;;  %v3519_v51 = vld [vmem:[%s3716_s6 + $0xa8] sm:$0xff] }
  0xef   : > { %1631 = vmatmul.mubr.f32.gmra.mxu1 %v4577_v6  ;;  %3374 = vmatmul.mubr.f32.gmra.mxu0 %v4373_v33  ;;  %v1910_v33 = vrot.slane %v4102_v31, 2  ;;  %v3509_v31 = vld [vmem:[%s3716_s6 + $0x30] sm:$0xff] }
  0xf0   : > { %1635 = vmatprep.mubr.f32.mxu1 %v4638_v1  ;;  %3376 = vmatprep.mubr.f32.mxu0 %v4390_v11  ;;  %v4652_v2 = vpop.f32.mrf.mxu1  ;;  %v3087_v11 = vld [vmem:[%s5370_s1 + $0x438] sm:$0xff]  ;;  %v1905_v30 = vrot.slane %v3509_v31, 2 }
  0xf1   : > { %2346 = vmatprep.subr.mxu1 %v3563_v3  ;;  %3416 = vmatpush3.msra.mxu0 %v3089_v36  ;;  %v1908_v3 = vrot.slane %v4118_v54, 2  ;;  %v3086_v54 = vld [vmem:[%s5370_s1 + $0x430] sm:$0xff]  ;;  %v1936_v36 = vrot.slane %v3514_v59, 2  ;;  %v3515_v31 = vld [vmem:[%s3716_s6 + $0x78] sm:$0xff] }
  0xf2   : > { %2347 = vmatpush2.msra.mxu1 %v3064_v15  ;;  %3417 = vmatprep.subr.mxu0 %v3088_v47  ;;  %v4729_v15 = vsel %vm1898_vm1, %v1921_v60, %v1940_v56  ;;  %v3520_v59 = vld [vmem:[%s3716_s6 + $0xb0] sm:$0xff] }
  0xf3   : > { %1636 = vmatmul.mubr.f32.gmra.mxu1 %v4594_v19  ;;  %3377 = vmatmul.mubr.f32.gmra.mxu0 %v4407_v50  ;;  %v4658_v55 = vpop.f32.mrf.mxu1  ;;  %v1911_v50 = vsel %vm1898_vm1, %v1903_v48, %v1910_v33  ;;  %v1909_v24 = vsel %vm1898_vm1, %v1900_v61, %v1908_v3  ;;  %v3511_v61 = vld [vmem:[%s3716_s6 + $0x48] sm:$0xff]  ;;  %v1949_v33 = vsel %vm1898_vm1, %v1935_v0, %v1936_v36  ;;  %v1269_v3 = vrot.slane %v4617_v12, 1 }
  0xf4   : > { %3379 = vmatprep.mubr.f32.mxu0 %v4426_v23  ;;  %2348 = vmatprep.mubr.f32.mxu1 %v4137_v8  ;;  %v4685_v23 = vsel %vm1898_vm1, %v1905_v30, %v1906_v46  ;;  %v1950_v30 = vrot.slane %v3515_v31, 2  ;;  %v1980_v0 = vrot.slane %v3519_v51, 2 }
  0xf5   : > { %v4671_v43 = vpop.f32.mrf.mxu1  ;;  %3418 = vmatpush3.msra.mxu0 %v3088_v47  ;;  %v1270_v12 = vsel %vm1030_vm0, %v1263_v16, %v1269_v3  ;;  %v2000_v3 = vrot.slane %v4311_v28, 2 }
  0xf6   : > { %3419 = vmatprep.subr.mxu0 %v3087_v11 }
  0xf7   : > { %3380 = vmatmul.mubr.f32.gmra.mxu0 %v4441_v62  ;;  %2349 = vmatmul.mubr.f32.vlgmr.msra.gmra.mxu1 %v4147_v18  ;;  %v1925_v18 = vrot.slane %v4154_v37, 2 }
  0xf8   : > { %3382 = vmatprep.mubr.f32.mxu0 %v4455_v27  ;;  %2353 = vmatprep.mubr.f32.mxu1 %v1911_v50  ;;  %v4682_v48 = vpop.f32.mrf.mxu1  ;;  %v1920_v27 = vrot.slane %v3511_v61, 2 }
  0xf9   : > { %3420 = vmatpush3.msra.mxu0 %v3087_v11  ;;  %v4699_v37 = vsel %vm1898_vm1, %v1906_v46, %v1925_v18  ;;  %v3081_v11 = vld [vmem:[%s5370_s1 + $0x408] sm:$0xff] }
  0xfa   : > { %v4688_v62 = vpop.f32.mrf.mxu1  ;;  %3421 = vmatprep.subr.mxu0 %v3086_v54  ;;  %v4713_v14 = vsel %vm1898_vm1, %v1920_v27, %v1921_v60 }
  0xfb   : > { %3383 = vmatmul.mubr.f32.gmra.mxu0 %v4469_v39  ;;  %2354 = vmatmul.mubr.f32.gmra.mxu1 %v1909_v24 }
  0xfc   : > { %3385 = vmatprep.mubr.f32.mxu0 %v4483_v42  ;;  %2358 = vmatprep.mubr.f32.mxu1 %v4685_v23  ;;  %v3084_v42 = vld [vmem:[%s5370_s1 + $0x420] sm:$0xff] }
  0xfd   : > { %v4701_v10 = vpop.f32.mrf.mxu1  ;;  %3422 = vmatpush3.msra.mxu0 %v3086_v54  ;;  %v1970_v54 = vrot.slane %v4239_v44, 2 }
  0xfe   : > { %3423 = vmatprep.subr.mxu0 %v3085_v32 }
  0xff   : > { %3386 = vmatmul.mubr.f32.gmra.mxu0 %v4497_v13  ;;  %2359 = vmatmul.mubr.f32.gmra.mxu1 %v4137_v8  ;;  %v4705_v39 = vpop.f32.mrf.mxu1  ;;  %v3083_v8 = vld [vmem:[%s5370_s1 + $0x418] sm:$0xff] }
 0x100   : > { %3388 = vmatprep.mubr.f32.mxu0 %v4511_v53  ;;  %2363 = vmatprep.mubr.f32.mxu1 %v4699_v37 }
 0x101   : > { %3424 = vmatpush3.msra.mxu0 %v3085_v32  ;;  %v1966_v32 = vrot.slane %v3518_v38, 2  ;;  %v2002_v38 = vrot.slane %v4343_v34, 2 }
 0x102   : > { %v4716_v13 = vpop.f32.mrf.mxu1  ;;  %3425 = vmatprep.subr.mxu0 %v3084_v42 }
 0x103   : > { %3389 = vmatmul.mubr.f32.gmra.mxu0 %v4525_v45  ;;  %2364 = vmatmul.mubr.f32.gmra.mxu1 %v1911_v50 }
 0x104   : > { %3391 = vmatprep.mubr.f32.mxu0 %v4542_v63  ;;  %2368 = vmatprep.mubr.f32.mxu1 %v4713_v14  ;;  %v4724_v53 = vpop.f32.mrf.mxu1  ;;  %v3082_v63 = vld [vmem:[%s5370_s1 + $0x410] sm:$0xff] }
 0x105   : > { %3426 = vmatpush3.msra.mxu0 %v3084_v42  ;;  %v1985_v42 = vrot.slane %v4277_v22, 2 }
 0x106   : > { %3427 = vmatprep.subr.mxu0 %v3083_v8 }
 0x107   : > { %3392 = vmatmul.mubr.f32.gmra.mxu0 %v4560_v17  ;;  %2369 = vmatmul.mubr.f32.gmra.mxu1 %v4685_v23  ;;  %v4733_v45 = vpop.f32.mrf.mxu1  ;;  %v1955_v17 = vrot.slane %v4206_v4, 2  ;;  %v1951_v4 = vrot.slane %v3516_v57, 2  ;;  %v1986_v22 = vsel %vm1898_vm1, %v1966_v32, %v1985_v42 }
 0x108   : > { %3394 = vmatprep.mubr.f32.mxu0 %v4577_v6  ;;  %2373 = vmatprep.mubr.f32.mxu1 %v4729_v15 }
 0x109   : > { %v4740_v47 = vpop.f32.mrf.mxu1  ;;  %3428 = vmatpush3.msra.mxu0 %v3083_v8  ;;  %v1956_v46 = vsel %vm1898_vm1, %v1936_v36, %v1955_v17  ;;  %v1971_v16 = vsel %vm1898_vm1, %v1951_v4, %v1970_v54 }
 0x10a   : > { %3429 = vmatprep.subr.mxu0 %v3082_v63 }
 0x10b   : > { %3395 = vmatmul.mubr.f32.gmra.mxu0 %v4594_v19  ;;  %2374 = vmatmul.mubr.f32.gmra.mxu1 %v4699_v37 }
 0x10c   : > { %3397 = vmatprep.mubr.f32.mxu0 %v4613_v26  ;;  %2378 = vmatprep.mubr.f32.mxu1 %v1949_v33  ;;  %v4750_v6 = vpop.f32.mrf.mxu1  ;;  %v3080_v26 = vld [vmem:[%s5370_s1 + $0x400] sm:$0xff] }
 0x10d   : > { %3430 = vmatpush3.msra.mxu0 %v3082_v63 }
 0x10e   : > { %v4756_v19 = vpop.f32.mrf.mxu1  ;;  %3431 = vmatprep.subr.mxu0 %v3081_v11 }
 0x10f   : > { %3398 = vmatmul.mubr.f32.gmra.mxu0 %v4638_v1  ;;  %2379 = vmatmul.mubr.f32.gmra.mxu1 %v4713_v14  ;;  %v1964_v1 = vsel %vm1898_vm1, %v1950_v30, %v1951_v4  ;;  %v3521_v4 = vld [vmem:[%s3716_s6 + $0xc0] sm:$0xff] }
 0x110   : > { %3400 = vmatprep.mubr.f32.mxu0 %v4252_v41  ;;  %2383 = vmatprep.mubr.f32.mxu1 %v1956_v46  ;;  %v3517_v41 = vld [vmem:[%s3716_s6 + $0x90] sm:$0xff] }
 0x111   : > { %v4767_v50 = vpop.f32.mrf.mxu1  ;;  %3432 = vmatpush3.msra.mxu0 %v3081_v11  ;;  %v1965_v18 = vrot.slane %v3517_v41, 2 }
 0x112   : > { %3433 = vmatprep.subr.mxu0 %v3080_v26 }
 0x113   : > { %3401 = vmatmul.mubr.f32.gmra.mxu0 %v1270_v12  ;;  %2384 = vmatmul.mubr.f32.gmra.mxu1 %v4729_v15  ;;  %v4772_v24 = vpop.f32.mrf.mxu1 }
 0x114   : > { %2388 = vmatprep.mubr.f32.mxu1 %v1964_v1  ;;  %3434 = vmatpush3.msra.mxu0 %v3080_v26  ;;  %v3522_v26 = vld [vmem:[%s3716_s6 + $0xc8] sm:$0xff] }
 0x115   : > { %3435 = vmatprep.mubr.f32.mxu0 %v4685_v23  ;;  %v1979_v23 = vsel %vm1898_vm1, %v1965_v18, %v1966_v32  ;;  %v1996_v12 = vrot.slane %v3522_v26, 2  ;;  %v3523_v32 = vld [vmem:[%s3716_s6 + $0xd8] sm:$0xff]  ;;  %v3527_v26 = vld [vmem:[%s3716_s6 + $0x108] sm:$0xff] }
 0x116   : > { %v470_v61 = vpop.f32.mrf.mxu0  ;;  %v4778_v27 = vpop.f32.mrf.mxu1 }
 0x117   : > { %v4781_v44 = vadd.f32 %v4652_v2, %v470_v61  ;;  %2389 = vmatmul.mubr.f32.gmra.mxu1 %v1949_v33  ;;  %3436 = vmatmul.mubr.f32.vlgmr.msra.gmra.mxu0 %v4699_v37  ;;  %v3524_v61 = vld [vmem:[%s3716_s6 + $0xe0] sm:$0xff]  ;;  %v2003_v34 = vsel %vm1898_vm1, %v1996_v12, %v2002_v38 }
 0x118   : > { %v472_v25 = vpop.f32.mrf.mxu0  ;;  %v4784_v60 = vpop.f32.mrf.mxu1  ;;  %2393 = vmatprep.mubr.f32.mxu1 %v1971_v16  ;;  %3438 = vmatprep.mubr.f32.mxu0 %v4713_v14  ;;  %v1981_v14 = vrot.slane %v3520_v59, 2  ;;  %v3525_v59 = vld [vmem:[%s3716_s6 + $0xf0] sm:$0xff] }
 0x119   : > { %5373 = vst [vmem:[#allocation2_spill] sm:$0xff] %v4781_v44  ;;  %v2011_v25 = vrot.slane %v3524_v61, 2 }
 0x11a   : > { %v475_v56 = vpop.f32.mrf.mxu0  ;;  %v1994_v11 = vsel %vm1898_vm1, %v1980_v0, %v1981_v14  ;;  %v2001_v28 = vsel %vm1898_vm1, %v1981_v14, %v2000_v3  ;;  %v2017_v0 = vrot.slane %v4376_v21, 2  ;;  %v2025_v14 = vrot.slane %v3525_v59, 2 }
 0x11b   : > { %v4790_v8 = vadd.f32 %v4640_v29, %v475_v56  ;;  %v4792_v2 = vpop.f32.mrf.mxu1  ;;  %2394 = vmatmul.mubr.f32.gmra.mxu1 %v1956_v46  ;;  %3439 = vmatmul.mubr.f32.gmra.mxu0 %v4729_v15 }
 0x11c   : > { %v477_v37 = vpop.f32.mrf.mxu0  ;;  %2398 = vmatprep.mubr.f32.mxu1 %v1979_v23  ;;  %3441 = vmatprep.mubr.f32.mxu0 %v1949_v33 }
 0x11d   : > { %v4797_v36 = vpop.f32.mrf.mxu1 }
 0x11e   : > { %v480_v63 = vpop.f32.mrf.mxu0 }
 0x11f   : > { %v4801_v29 = vadd.f32 %v4671_v43, %v480_v63  ;;  %v4803_v17 = vpop.f32.mrf.mxu1  ;;  %2399 = vmatmul.mubr.f32.gmra.mxu1 %v1964_v1  ;;  %3442 = vmatmul.mubr.f32.gmra.mxu0 %v1956_v46  ;;  %v1995_v46 = vrot.slane %v3521_v4, 2  ;;  %v3526_v63 = vld [vmem:[%s3716_s6 + $0xf8] sm:$0xff]  ;;  %v4851_v4 = vsel %vm1898_vm1, %v2011_v25, %v2017_v0 }
 0x120   : > { %v482_v15 = vpop.f32.mrf.mxu0  ;;  %2403 = vmatprep.mubr.f32.mxu1 %v1986_v22  ;;  %3444 = vmatprep.mubr.f32.mxu0 %v1964_v1 }
 0x121   : > { %5374 = vst [vmem:[#allocation3_spill] sm:$0xff] %v4801_v29  ;;  %v4805_v33 = vpop.f32.mrf.mxu1  ;;  %v2026_v15 = vrot.slane %v3526_v63, 2 }
 0x122   : > { %v485_v31 = vpop.f32.mrf.mxu0 }
 0x123   : > { %v4810_v30 = vadd.f32 %v4658_v55, %v485_v31  ;;  %v4812_v43 = vpop.f32.mrf.mxu1  ;;  %2404 = vmatmul.mubr.f32.gmra.mxu1 %v1971_v16  ;;  %3445 = vmatmul.mubr.f32.gmra.mxu0 %v1971_v16  ;;  %v2010_v16 = vrot.slane %v3523_v32, 2 }
 0x124   : > { %v487_v57 = vpop.f32.mrf.mxu0  ;;  %2408 = vmatprep.mubr.f32.mxu1 %v1994_v11  ;;  %3447 = vmatprep.mubr.f32.mxu0 %v1979_v23 }
 0x125   : > { %5375 = vst [vmem:[#allocation4_spill] sm:$0xff] %v4810_v30  ;;  %v4816_v1 = vpop.f32.mrf.mxu1 }
 0x126   : > { %v490_v54 = vpop.f32.mrf.mxu0 }
 0x127   : > { %v4820_v55 = vadd.f32 %v4688_v62, %v490_v54  ;;  %v4822_v41 = vpop.f32.mrf.mxu1  ;;  %2409 = vmatmul.mubr.f32.gmra.mxu1 %v1979_v23  ;;  %3448 = vmatmul.mubr.f32.gmra.mxu0 %v1986_v22  ;;  %v2009_v62 = vsel %vm1898_vm1, %v1995_v46, %v1996_v12  ;;  %v2032_v46 = vrot.slane %v4410_v40, 2  ;;  %v2040_v12 = vrot.slane %v3527_v26, 2  ;;  %v3528_v54 = vld [vmem:[%s3716_s6 + $0x110] sm:$0xff]  ;;  %v3532_v26 = vld [vmem:[%s3716_s6 + $0x140] sm:$0xff] }
 0x128   : > { %v492_v18 = vpop.f32.mrf.mxu0  ;;  %2413 = vmatprep.mubr.f32.mxu1 %v2001_v28  ;;  %3450 = vmatprep.mubr.f32.mxu0 %v1994_v11 }
 0x129   : > { %5376 = vst [vmem:[#allocation5_spill] sm:$0xff] %v4820_v55  ;;  %v4827_v42 = vpop.f32.mrf.mxu1  ;;  %v4870_v61 = vsel %vm1898_vm1, %v2026_v15, %v2032_v46 }
 0x12a   : > { %v495_v56 = vpop.f32.mrf.mxu0 }
 0x12b   : > { %v4831_v37 = vadd.f32 %v4682_v48, %v495_v56  ;;  %v4833_v23 = vpop.f32.mrf.mxu1  ;;  %2414 = vmatmul.mubr.f32.gmra.mxu1 %v1986_v22  ;;  %3451 = vmatmul.mubr.f32.gmra.mxu0 %v2001_v28  ;;  %v4842_v48 = vsel %vm1898_vm1, %v2010_v16, %v2011_v25  ;;  %v2047_v25 = vrot.slane %v4444_v7, 2  ;;  %v3529_v56 = vld [vmem:[%s3716_s6 + $0x120] sm:$0xff] }
 0x12c   : > { %v497_v51 = vpop.f32.mrf.mxu0  ;;  %2418 = vmatprep.mubr.f32.mxu1 %v2009_v62  ;;  %3453 = vmatprep.mubr.f32.mxu0 %v2009_v62 }
 0x12d   : > { %5377 = vst [vmem:[#allocation6_spill] sm:$0xff] %v4831_v37  ;;  %v4839_v3 = vpop.f32.mrf.mxu1  ;;  %v2055_v51 = vrot.slane %v3529_v56, 2  ;;  %v3533_v56 = vld [vmem:[%s3716_s6 + $0x150] sm:$0xff] }
 0x12e   : > { %v500_v22 = vpop.f32.mrf.mxu0 }
 0x12f   : > { %v4845_v31 = vadd.f32 %v4705_v39, %v500_v22  ;;  %v4847_v57 = vpop.f32.mrf.mxu1  ;;  %2419 = vmatmul.mubr.f32.gmra.mxu1 %v1994_v11  ;;  %3454 = vmatmul.mubr.f32.gmra.mxu0 %v2003_v34  ;;  %v2041_v39 = vrot.slane %v3528_v54, 2  ;;  %v4859_v11 = vsel %vm1898_vm1, %v2025_v14, %v2026_v15  ;;  %v2062_v22 = vrot.slane %v4472_v20, 2 }
 0x130   : > { %v502_v21 = vpop.f32.mrf.mxu0  ;;  %2423 = vmatprep.mubr.f32.mxu1 %v2003_v34  ;;  %3456 = vmatprep.mubr.f32.mxu0 %v4842_v48 }
 0x131   : > { %5378 = vst [vmem:[#allocation7_spill] sm:$0xff] %v4845_v31  ;;  %v4856_v18 = vpop.f32.mrf.mxu1  ;;  %v4889_v7 = vsel %vm1898_vm1, %v2041_v39, %v2047_v25  ;;  %v3531_v21 = vld [vmem:[%s3716_s6 + $0x138] sm:$0xff]  ;;  %v2077_v25 = vrot.slane %v4500_v35, 2 }
 0x132   : > { %v505_v38 = vpop.f32.mrf.mxu0  ;;  %v2070_v46 = vrot.slane %v3531_v21, 2 }
 0x133   : > { %v4862_v32 = vadd.f32 %v4701_v10, %v505_v38  ;;  %v4864_v16 = vpop.f32.mrf.mxu1  ;;  %2424 = vmatmul.mubr.f32.gmra.mxu1 %v2001_v28  ;;  %3457 = vmatmul.mubr.f32.gmra.mxu0 %v4851_v4  ;;  %v3530_v10 = vld [vmem:[%s3716_s6 + $0x128] sm:$0xff]  ;;  %v4878_v28 = vsel %vm1898_vm1, %v2040_v12, %v2041_v39 }
 0x134   : > { %v507_v40 = vpop.f32.mrf.mxu0  ;;  %2428 = vmatprep.mubr.f32.mxu1 %v4842_v48  ;;  %3459 = vmatprep.mubr.f32.mxu0 %v4859_v11  ;;  %v2056_v0 = vrot.slane %v3530_v10, 2  ;;  %v3534_v10 = vld [vmem:[%s3716_s6 + $0x158] sm:$0xff] }
 0x135   : > { %5379 = vst [vmem:[#allocation8_spill] sm:$0xff] %v4862_v32  ;;  %v4875_v59 = vpop.f32.mrf.mxu1 }
 0x136   : > { %v4906_v20 = vsel %vm1898_vm1, %v2056_v0, %v2062_v22  ;;  %v2092_v22 = vrot.slane %v4528_v5, 2 }
 0x137   : > { %v510_v14 = vpop.f32.mrf.mxu0  ;;  %v4880_v63 = vpop.f32.mrf.mxu1  ;;  %2429 = vmatmul.mubr.f32.gmra.mxu1 %v2009_v62  ;;  %3460 = vmatmul.mubr.f32.gmra.mxu0 %v4870_v61  ;;  %v2071_v62 = vrot.slane %v3532_v26, 2 }
 0x138   : > { %v4884_v15 = vadd.f32 %v4724_v53, %v510_v14  ;;  %2433 = vmatprep.mubr.f32.mxu1 %v4851_v4  ;;  %3462 = vmatprep.mubr.f32.mxu0 %v4878_v28  ;;  %v4895_v53 = vsel %vm1898_vm1, %v2055_v51, %v2056_v0  ;;  %v2085_v51 = vrot.slane %v3533_v56, 2 }
 0x139   : > { %v512_v12 = vpop.f32.mrf.mxu0  ;;  %v1484_v54 = vpop.f32.mrf.mxu1  ;;  %v4924_v0 = vsel %vm1898_vm1, %v2071_v62, %v2077_v25  ;;  %v2107_v25 = vrot.slane %v4563_v9, 2 }
 0x13a   : > { %5380 = vst [vmem:[#allocation9_spill] sm:$0xff] %v4884_v15 }
 0x13b   : > { %v515_v38 = vpop.f32.mrf.mxu0  ;;  %v4897_v40 = vpop.f32.mrf.mxu1  ;;  %2434 = vmatmul.mubr.f32.gmra.mxu1 %v2003_v34  ;;  %3463 = vmatmul.mubr.f32.gmra.mxu0 %v4889_v7  ;;  %v2086_v34 = vrot.slane %v3534_v10, 2 }
 0x13c   : > { %v4901_v39 = vadd.f32 %v4716_v13, %v515_v38  ;;  %2438 = vmatprep.mubr.f32.mxu1 %v4859_v11  ;;  %3465 = vmatprep.mubr.f32.mxu0 %v4895_v53  ;;  %v4912_v13 = vsel %vm1898_vm1, %v2070_v46, %v2071_v62  ;;  %v3535_v46 = vld [vmem:[%s3716_s6 + $0x168] sm:$0xff]  ;;  %v3536_v38 = vld [vmem:[%s3716_s6 + $0x170] sm:$0xff] }
 0x13d   : > { %v517_v14 = vpop.f32.mrf.mxu0  ;;  %v1489_v21 = vpop.f32.mrf.mxu1  ;;  %v2100_v54 = vrot.slane %v3535_v46, 2  ;;  %v4942_v62 = vsel %vm1898_vm1, %v2086_v34, %v2092_v22  ;;  %v3538_v46 = vld [vmem:[%s3716_s6 + $0x188] sm:$0xff]  ;;  %v2122_v22 = vrot.slane %v4597_v58, 2 }
 0x13e   : > { %5381 = vst [vmem:[#allocation10_spill] sm:$0xff] %v4901_v39 }
 0x13f   : > { %v520_v26 = vpop.f32.mrf.mxu0  ;;  %v4914_v12 = vpop.f32.mrf.mxu1  ;;  %2439 = vmatmul.mubr.f32.gmra.mxu1 %v4842_v48  ;;  %3466 = vmatmul.mubr.f32.gmra.mxu0 %v4906_v20  ;;  %v2101_v48 = vrot.slane %v3536_v38, 2  ;;  %v2116_v38 = vrot.slane %v3538_v46, 2 }
 0x140   : > { %5382 = vst [vmem:[#allocation11_spill] sm:$0xff] %v4914_v12  ;;  %v4919_v35 = vadd.f32 %v4740_v47, %v520_v26  ;;  %2443 = vmatprep.mubr.f32.mxu1 %v4870_v61  ;;  %3468 = vmatprep.mubr.f32.mxu0 %v4912_v13  ;;  %v4930_v47 = vsel %vm1898_vm1, %v2085_v51, %v2086_v34  ;;  %v3537_v51 = vld [vmem:[%s3716_s6 + $0x180] sm:$0xff] }
 0x141   : > { %v522_v56 = vpop.f32.mrf.mxu0  ;;  %v1494_v10 = vpop.f32.mrf.mxu1  ;;  %v2115_v26 = vrot.slane %v3537_v51, 2  ;;  %v4960_v9 = vsel %vm1898_vm1, %v2101_v48, %v2107_v25 }
 0x142   : > { %5383 = vst [vmem:[#allocation12_spill] sm:$0xff] %v4919_v35  ;;  %v4948_v10 = vsel %vm1898_vm1, %v2100_v54, %v2101_v48  ;;  %v2123_v48 = vsel %vm1898_vm1, %v2116_v38, %v2122_v22 }
 0x143   : > { %v525_v14 = vpop.f32.mrf.mxu0  ;;  %v4932_v21 = vpop.f32.mrf.mxu1  ;;  %2444 = vmatmul.mubr.f32.gmra.mxu1 %v4851_v4  ;;  %3469 = vmatmul.mubr.f32.gmra.mxu0 %v4924_v0  ;;  %v2117_v46 = vsel %vm1898_vm1, %v2115_v26, %v2116_v38 }
 0x144   : > { %5384 = vst [vmem:[#allocation13_spill] sm:$0xff] %v4932_v21  ;;  %v4937_v5 = vadd.f32 %v4733_v45, %v525_v14  ;;  %2448 = vmatprep.mubr.f32.mxu1 %v4878_v28  ;;  %3471 = vmatprep.mubr.f32.mxu0 %v4930_v47 }
 0x145   : > { %v527_v56 = vpop.f32.mrf.mxu0  ;;  %v1499_v4 = vpop.f32.mrf.mxu1 }
 0x146   : > { %5385 = vst [vmem:[#allocation14_spill] sm:$0xff] %v4937_v5 }
 0x147   : > { %v530_v45 = vpop.f32.mrf.mxu0  ;;  %v4950_v14 = vpop.f32.mrf.mxu1  ;;  %2449 = vmatmul.mubr.f32.gmra.mxu1 %v4859_v11  ;;  %3472 = vmatmul.mubr.f32.gmra.mxu0 %v4942_v62 }
 0x148   : > { %5386 = vst [vmem:[#allocation15_spill] sm:$0xff] %v4950_v14  ;;  %v4955_v34 = vadd.f32 %v4756_v19, %v530_v45  ;;  %2453 = vmatprep.mubr.f32.mxu1 %v4889_v7  ;;  %3474 = vmatprep.mubr.f32.mxu0 %v4948_v10 }
 0x149   : > { %v532_v54 = vpop.f32.mrf.mxu0  ;;  %v1504_v51 = vpop.f32.mrf.mxu1 }
 0x14a   : > { %5387 = vst [vmem:[#allocation16_spill] sm:$0xff] %v4955_v34 }
 0x14b   : > { %v535_v56 = vpop.f32.mrf.mxu0  ;;  %v4964_v11 = vpop.f32.mrf.mxu1  ;;  %2454 = vmatmul.mubr.f32.gmra.mxu1 %v4870_v61  ;;  %3475 = vmatmul.mubr.f32.gmra.mxu0 %v4960_v9 }
 0x14c   : > { %5388 = vst [vmem:[#allocation17_spill] sm:$0xff] %v4964_v11  ;;  %v4969_v19 = vadd.f32 %v4750_v6, %v535_v56  ;;  %2458 = vmatprep.mubr.f32.mxu1 %v4895_v53  ;;  %3477 = vmatprep.mubr.f32.mxu0 %v2117_v46 }
 0x14d   : > { %v537_v58 = vpop.f32.mrf.mxu0  ;;  %v1509_v25 = vpop.f32.mrf.mxu1 }
 0x14e   : > { %5389 = vst [vmem:[#allocation18_spill] sm:$0xff] %v4969_v19 }
 0x14f   : > { %v540_v4 = vpop.f32.mrf.mxu0  ;;  %v4973_v45 = vpop.f32.mrf.mxu1  ;;  %2459 = vmatmul.mubr.f32.gmra.mxu1 %v4878_v28  ;;  %3478 = vmatmul.mubr.f32.gmra.mxu0 %v2123_v48 }
 0x150   : > { %5390 = vst [vmem:[#allocation19_spill] sm:$0xff] %v4973_v45  ;;  %v4977_v61 = vadd.f32 %v4772_v24, %v540_v4  ;;  %2463 = vmatprep.mubr.f32.mxu1 %v4906_v20  ;;  %3480 = vmatprep.mubr.f32.mxu0 %v4629_v49 }
 0x151   : > { %v542_v6 = vpop.f32.mrf.mxu0  ;;  %v1514_v26 = vpop.f32.mrf.mxu1 }
 0x152   : > { %5391 = vst [vmem:[#allocation20_spill] sm:$0xff] %v4977_v61 }
 0x153   : > { %v4981_v54 = vpop.f32.mrf.mxu0  ;;  %v4983_v38 = vpop.f32.mrf.mxu1  ;;  %2464 = vmatmul.mubr.f32.gmra.mxu1 %v4889_v7  ;;  %3481 = vmatmul.mubr.f32.gmra.mxu0 %v4634_v52 }
 0x154   : > { %5392 = vst [vmem:[#allocation21_spill] sm:$0xff] %v4983_v38  ;;  %2468 = vmatprep.mubr.f32.mxu1 %v4912_v13 }
 0x155   : > { %v547_v28 = vpop.f32.mrf.mxu0  ;;  %v1519_v22 = vpop.f32.mrf.mxu1 }
 0x157   : > { %v550_v24 = vpop.f32.mrf.mxu0  ;;  %v4988_v51 = vpop.f32.mrf.mxu1  ;;  %2469 = vmatmul.mubr.f32.gmra.mxu1 %v4895_v53 }
 0x158   : > { %5393 = vst [vmem:[#allocation22_spill] sm:$0xff] %v4988_v51  ;;  %v4992_v49 = vadd.f32 %v4784_v60, %v550_v24  ;;  %2473 = vmatprep.mubr.f32.mxu1 %v4924_v0 }
 0x159   : > { %v552_v56 = vpop.f32.mrf.mxu0  ;;  %v1524_v58 = vpop.f32.mrf.mxu1 }
 0x15a   : > { %5394 = vst [vmem:[#allocation23_spill] sm:$0xff] %v4992_v49 }
 0x15b   : > { %v4995_v25 = vpop.f32.mrf.mxu0  ;;  %v4997_v7 = vpop.f32.mrf.mxu1  ;;  %2474 = vmatmul.mubr.f32.gmra.mxu1 %v4906_v20 }
 0x15c   : > { %5395 = vst [vmem:[#allocation24_spill] sm:$0xff] %v4997_v7  ;;  %2478 = vmatprep.mubr.f32.mxu1 %v4930_v47 }
 0x15d   : > { %v557_v52 = vpop.f32.mrf.mxu0  ;;  %v1529_v4 = vpop.f32.mrf.mxu1 }
 0x15f   : > { %v5001_v6 = vpop.f32.mrf.mxu0  ;;  %v5003_v53 = vpop.f32.mrf.mxu1  ;;  %2479 = vmatmul.mubr.f32.gmra.mxu1 %v4912_v13 }
 0x160   : > { %5396 = vst [vmem:[#allocation25_spill] sm:$0xff] %v5003_v53  ;;  %2483 = vmatprep.mubr.f32.mxu1 %v4942_v62 }
 0x161   : > { %v562_v60 = vpop.f32.mrf.mxu0  ;;  %v1534_v26 = vpop.f32.mrf.mxu1 }
 0x163   : > { %v5007_v28 = vpop.f32.mrf.mxu0  ;;  %v5009_v22 = vpop.f32.mrf.mxu1  ;;  %2484 = vmatmul.mubr.f32.gmra.mxu1 %v4924_v0 }
 0x164   : > { %5397 = vst [vmem:[#allocation26_spill] sm:$0xff] %v5009_v22  ;;  %2488 = vmatprep.mubr.f32.mxu1 %v4948_v10  ;;  %v791_v44 = vadd.f32 %v4792_v2, %v5007_v28 }
 0x165   : > { %v567_v20 = vpop.f32.mrf.mxu0  ;;  %v1539_v24 = vpop.f32.mrf.mxu1 }
 0x167   : > { %v5013_v56 = vpop.f32.mrf.mxu0  ;;  %v5015_v58 = vpop.f32.mrf.mxu1  ;;  %2489 = vmatmul.mubr.f32.gmra.mxu1 %v4930_v47 }
 0x168   : > { %5398 = vst [vmem:[#allocation27_spill] sm:$0xff] %v5015_v58  ;;  %2493 = vmatprep.mubr.f32.mxu1 %v4960_v9 }
 0x169   : > { %v572_v13 = vpop.f32.mrf.mxu0  ;;  %v1544_v52 = vpop.f32.mrf.mxu1 }
 0x16b   : > { %v5019_v4 = vpop.f32.mrf.mxu0  ;;  %v5021_v60 = vpop.f32.mrf.mxu1  ;;  %2494 = vmatmul.mubr.f32.gmra.mxu1 %v4942_v62 }
 0x16c   : > { %5399 = vst [vmem:[#allocation28_spill] sm:$0xff] %v5021_v60  ;;  %2498 = vmatprep.mubr.f32.mxu1 %v2117_v46 }
 0x16d   : > { %v577_v0 = vpop.f32.mrf.mxu0  ;;  %v1549_v26 = vpop.f32.mrf.mxu1 }
 0x16f   : > { %v5024_v20 = vpop.f32.mrf.mxu0  ;;  %v5026_v24 = vpop.f32.mrf.mxu1  ;;  %2499 = vmatmul.mubr.f32.gmra.mxu1 %v4948_v10 }
 0x170   : > { %5400 = vst [vmem:[#allocation29_spill] sm:$0xff] %v5026_v24  ;;  %2503 = vmatprep.mubr.f32.mxu1 %v2123_v48 }
 0x171   : > { %v582_v47 = vpop.f32.mrf.mxu0  ;;  %v1554_v49 = vpop.f32.mrf.mxu1 }
 0x173   : > { %v5029_v13 = vpop.f32.mrf.mxu0  ;;  %v5031_v52 = vpop.f32.mrf.mxu1  ;;  %2504 = vmatmul.mubr.f32.gmra.mxu1 %v4960_v9 }
 0x175   : > { %v587_v61 = vpop.f32.mrf.mxu0  ;;  %v1559_v62 = vpop.f32.mrf.mxu1 }
 0x177   : > { %v5034_v46 = vpop.f32.mrf.mxu0  ;;  %v5036_v0 = vpop.f32.mrf.mxu1 }
 0x178   : > { %5401 = vst [vmem:[#allocation30_spill] sm:$0xff] %v5036_v0 }
 0x179   : > { %v592_v26 = vpop.f32.mrf.mxu0  ;;  %v1564_v34 = vpop.f32.mrf.mxu1 }
 0x17b   : > { %v5038_v24 = vpop.f32.mrf.mxu0  ;;  %v5040_v10 = vpop.f32.mrf.mxu1 }
 0x17d   : > { %v597_v48 = vpop.f32.mrf.mxu0  ;;  %v1569_v49 = vpop.f32.mrf.mxu1 }
 0x17f   : > { %v5042_v47 = vpop.f32.mrf.mxu0  ;;  %v5044_v58 = vpop.f32.mrf.mxu1 }
 0x181   : > { %v602_v19 = vpop.f32.mrf.mxu0  ;;  %v1574_v9 = vpop.f32.mrf.mxu1 }
 0x183   : > { %v5046_v61 = vpop.f32.mrf.mxu0  ;;  %v5048_v62 = vpop.f32.mrf.mxu1 }
 0x185   : > { %v607_v60 = vpop.f32.mrf.mxu0  ;;  %v1579_v0 = vpop.f32.mrf.mxu1 }
 0x187   : > { %v5050_v26 = vpop.f32.mrf.mxu0  ;;  %v5052_v34 = vpop.f32.mrf.mxu1 }
 0x189   : > { %v612_v35 = vpop.f32.mrf.mxu0  ;;  %v1584_v53 = vpop.f32.mrf.mxu1 }
 0x18b   : > { %v5054_v48 = vpop.f32.mrf.mxu0  ;;  %v5056_v49 = vpop.f32.mrf.mxu1 }
 0x18d   : > { %v617_v5 = vpop.f32.mrf.mxu0  ;;  %v1589_v22 = vpop.f32.mrf.mxu1 }
 0x18f   : > { %v5058_v19 = vpop.f32.mrf.mxu0  ;;  %v5060_v9 = vpop.f32.mrf.mxu1 }
 0x191   : > { %v622_v15 = vpop.f32.mrf.mxu0  ;;  %v1594_v51 = vpop.f32.mrf.mxu1 }
 0x193   : > { %v5062_v60 = vpop.f32.mrf.mxu0  ;;  %v5064_v0 = vpop.f32.mrf.mxu1 }
 0x195   : > { %v627_v39 = vpop.f32.mrf.mxu0  ;;  %v1599_v7 = vpop.f32.mrf.mxu1 }
 0x197   : > { %v5066_v35 = vpop.f32.mrf.mxu1  ;;  %v5068_v53 = vpop.f32.mrf.mxu0 }
 0x199   : > { %v1604_v31 = vpop.f32.mrf.mxu1  ;;  %v5070_v45 = vpop.f32.mrf.mxu0 }
 0x19b   : > { %v5072_v5 = vpop.f32.mrf.mxu1  ;;  %v5074_v22 = vpop.f32.mrf.mxu0 }
 0x19c   : > { %5402 = vst [vmem:[#allocation31_spill] sm:$0xff] %v5074_v22 }
 0x19d   : > { %v1609_v32 = vpop.f32.mrf.mxu1  ;;  %v5076_v15 = vpop.f32.mrf.mxu0 }
 0x19e   : > { %5403 = vst [vmem:[#allocation32_spill] sm:$0xff] %v5076_v15 }
 0x19f   : > { %v5078_v51 = vpop.f32.mrf.mxu1  ;;  %v5080_v38 = vpop.f32.mrf.mxu0 }
 0x1a0   : > { %5404 = vst [vmem:[#allocation33_spill] sm:$0xff] %v5080_v38 }
 0x1a1   : > { %v1614_v39 = vpop.f32.mrf.mxu1  ;;  %v5082_v7 = vpop.f32.mrf.mxu0 }
 0x1a2   : > { %5405 = vst [vmem:[#allocation34_spill] sm:$0xff] %v5082_v7 }
 0x1a3   : > { %v5084_v55 = vpop.f32.mrf.mxu1  ;;  %v5086_v14 = vpop.f32.mrf.mxu0 }
 0x1a4   : > { %5406 = vst [vmem:[#allocation35_spill] sm:$0xff] %v5086_v14 }
 0x1a5   : > { %v1619_v31 = vpop.f32.mrf.mxu1  ;;  %v5088_v37 = vpop.f32.mrf.mxu0 }
 0x1a6   : > { %5407 = vst [vmem:[#allocation36_spill] sm:$0xff] %v5088_v37  ;;  %v771_v31 = vadd.f32 %v4767_v50, %v4981_v54 }
 0x1a7   : > { %v5090_v11 = vpop.f32.mrf.mxu1  ;;  %v5092_v29 = vpop.f32.mrf.mxu0 }
 0x1a8   : > { %5408 = vst [vmem:[#allocation37_spill] sm:$0xff] %v5092_v29 }
 0x1a9   : > { %v1624_v32 = vpop.f32.mrf.mxu1  ;;  %v5094_v15 = vpop.f32.mrf.mxu0 }
 0x1aa   : > { %5409 = vst [vmem:[#allocation38_spill] sm:$0xff] %v5094_v15  ;;  %v5113_v32 = vld [vmem:[%s5371_s2] ss:$0 sm:$0xff] }
 0x1ab   : > { %v5096_v12 = vpop.f32.mrf.mxu1  ;;  %v5098_v38 = vpop.f32.mrf.mxu0 }
 0x1ac   : > { %5410 = vst [vmem:[#allocation39_spill] sm:$0xff] %v5098_v38  ;;  %v781_v38 = vadd.f32 %v4778_v27, %v4995_v25 }
 0x1ad   : > { %v1629_v39 = vpop.f32.mrf.mxu1  ;;  %v5100_v7 = vpop.f32.mrf.mxu0 }
 0x1ae   : > { %5411 = vst [vmem:[#allocation40_spill] sm:$0xff] %v5100_v7  ;;  %v869_v7 = vadd.f32 %v5113_v32, %v771_v31  ;;  %v871_v21 = vadd.f32 %v5113_v32, %v781_v38  ;;  %v801_v38 = vadd.f32 %v4803_v17, %v5019_v4  ;;  %v811_v17 = vadd.f32 %v4812_v43, %v5029_v13 }
 0x1af   : > { %v5102_v30 = vpop.f32.mrf.mxu1  ;;  %v5104_v14 = vpop.f32.mrf.mxu0  ;;  %v821_v13 = vadd.f32 %v4822_v41, %v5038_v24  ;;  %v831_v24 = vadd.f32 %v4833_v23, %v5046_v61  ;;  %v841_v61 = vadd.f32 %v4847_v57, %v5054_v48  ;;  %v851_v48 = vadd.f32 %v4864_v16, %v5062_v60 }
 0x1b0   : > { %5412 = vst [vmem:[#allocation41_spill] sm:$0xff] %v5102_v30  ;;  %5413 = vst [vmem:[#allocation42_spill] sm:$0xff] %v5104_v14  ;;  %v877_v43 = vadd.f32 %v5113_v32, %v811_v17 }
 0x1b1   : > { %v1634_v37 = vpop.f32.mrf.mxu1  ;;  %v5108_v22 = vpop.f32.mrf.mxu0  ;;  %v879_v41 = vadd.f32 %v5113_v32, %v821_v13  ;;  %v881_v23 = vadd.f32 %v5113_v32, %v831_v24  ;;  %v883_v57 = vadd.f32 %v5113_v32, %v841_v61  ;;  %v885_v16 = vadd.f32 %v5113_v32, %v851_v48 }
 0x1b2   : > { %5414 = vst [vmem:[#allocation43_spill] sm:$0xff] %v5108_v22 }
 0x1b3   : > { %v5115_v15 = vpop.f32.mrf.mxu1  ;;  %v3378_v39 = vpop.f32.mrf.mxu0 }
 0x1b4   : > { %v1783_v14 = vadd.f32 %v3378_v39, %v5031_v52 }
 0x1b5   : > { %v1639_v29 = vpop.f32.mrf.mxu1  ;;  %v5121_v50 = vpop.f32.mrf.mxu0 }
 0x1b6   : > { %v5123_v37 = vadd.f32 %v1783_v14, %v869_v7  ;;  %v786_v29 = vadd.f32 %v4797_v36, %v5001_v6  ;;  %v873_v7 = vadd.f32 %v5113_v32, %v791_v44  ;;  %v875_v44 = vadd.f32 %v5113_v32, %v801_v38 }
 0x1b7   : > { %v3381_v54 = vpop.f32.mrf.mxu0  ;;  %v5125_v22 = vpop.f32.mrf.mxu1 }
 0x1b8   : > { %v1793_v31 = vadd.f32 %v3381_v54, %v5040_v10  ;;  %v872_v39 = vadd.f32 %v5113_v32, %v786_v29  ;;  %v796_v54 = vadd.f32 %v4805_v33, %v5013_v56  ;;  %v806_v56 = vadd.f32 %v4816_v1, %v5024_v20 }
 0x1b9   : > { %v5131_v30 = vpop.f32.mrf.mxu0  ;;  %v2352_v27 = vpop.f32.mrf.mxu1  ;;  %v816_v20 = vadd.f32 %v4827_v42, %v5034_v46  ;;  %v826_v46 = vadd.f32 %v4839_v3, %v5042_v47  ;;  %v836_v47 = vadd.f32 %v4856_v18, %v5050_v26  ;;  %v846_v26 = vadd.f32 %v4875_v59, %v5058_v19 }
 0x1ba   : > { %v5135_v25 = vadd.f32 %v1793_v31, %v871_v21  ;;  %v874_v33 = vadd.f32 %v5113_v32, %v796_v54  ;;  %v876_v1 = vadd.f32 %v5113_v32, %v806_v56  ;;  %v855_v59 = vadd.f32 %v5113_v32, %v4790_v8  ;;  %v5417_v8 = vld [vmem:[#allocation13_spill] sm:$0xff] }
 0x1bb   : > { %v3384_v14 = vpop.f32.mrf.mxu0  ;;  %v5137_v52 = vpop.f32.mrf.mxu1  ;;  %v878_v42 = vadd.f32 %v5113_v32, %v816_v20  ;;  %v880_v3 = vadd.f32 %v5113_v32, %v826_v46  ;;  %v882_v18 = vadd.f32 %v5113_v32, %v836_v47  ;;  %v884_v24 = vadd.f32 %v5113_v32, %v846_v26  ;;  %v5421_v47 = vld [vmem:[#allocation32_spill] sm:$0xff]  ;;  %v5424_v26 = vld [vmem:[#allocation33_spill] sm:$0xff] }
 0x1bc   : > { %v1803_v2 = vadd.f32 %v3384_v14, %v5048_v62 }
 0x1bd   : > { %v1797_v28 = vpop.f32.mrf.mxu0  ;;  %v2357_v10 = vpop.f32.mrf.mxu1 }
 0x1be   : > { %v5146_v36 = vadd.f32 %v1803_v2, %v873_v7  ;;  %v1798_v21 = vadd.f32 %v1797_v28, %v5044_v58 }
 0x1bf   : > { %v3387_v6 = vpop.f32.mrf.mxu0  ;;  %v5149_v31 = vpop.f32.mrf.mxu1 }
 0x1c0   : > { %v5154_v4 = vadd.f32 %v1798_v21, %v872_v39  ;;  %v1813_v62 = vadd.f32 %v3387_v6, %v5056_v49 }
 0x1c1   : > { %v1807_v27 = vpop.f32.mrf.mxu0  ;;  %v2362_v29 = vpop.f32.mrf.mxu1 }
 0x1c2   : > { %v5160_v58 = vadd.f32 %v1813_v62, %v875_v44  ;;  %v1808_v14 = vadd.f32 %v1807_v27, %v5052_v34 }
 0x1c3   : > { %v3390_v7 = vpop.f32.mrf.mxu0  ;;  %v5163_v38 = vpop.f32.mrf.mxu1 }
 0x1c4   : > { %v5168_v49 = vadd.f32 %v1808_v14, %v874_v33  ;;  %v1823_v2 = vadd.f32 %v3390_v7, %v5064_v0 }
 0x1c5   : > { %v1817_v28 = vpop.f32.mrf.mxu0  ;;  %v2367_v10 = vpop.f32.mrf.mxu1 }
 0x1c6   : > { %v5174_v34 = vadd.f32 %v1823_v2, %v877_v43  ;;  %v1818_v39 = vadd.f32 %v1817_v28, %v5060_v9 }
 0x1c7   : > { %v3393_v54 = vpop.f32.mrf.mxu0  ;;  %v5177_v21 = vpop.f32.mrf.mxu1 }
 0x1c8   : > { %v5182_v0 = vadd.f32 %v1818_v39, %v876_v1  ;;  %v1833_v6 = vadd.f32 %v3393_v54, %v5072_v5 }
 0x1c9   : > { %v1827_v44 = vpop.f32.mrf.mxu0  ;;  %v2372_v17 = vpop.f32.mrf.mxu1 }
 0x1ca   : > { %v5188_v9 = vadd.f32 %v1833_v6, %v879_v41  ;;  %v1828_v62 = vadd.f32 %v1827_v44, %v5066_v35  ;;  %v5415_v44 = vld [vmem:[#allocation41_spill] sm:$0xff] }
 0x1cb   : > { %v3396_v27 = vpop.f32.mrf.mxu0  ;;  %v5191_v29 = vpop.f32.mrf.mxu1 }
 0x1cc   : > { %v5196_v5 = vadd.f32 %v1828_v62, %v878_v42  ;;  %v1843_v33 = vadd.f32 %v3396_v27, %v5084_v55  ;;  %v5418_v62 = vld [vmem:[#allocation31_spill] sm:$0xff] }
 0x1cd   : > { %v1837_v56 = vpop.f32.mrf.mxu0  ;;  %v2377_v14 = vpop.f32.mrf.mxu1  ;;  %v1723_v27 = vadd.f32 %v5418_v62, %v5417_v8  ;;  %v5429_v8 = vld [vmem:[#allocation21_spill] sm:$0xff]  ;;  %v5430_v62 = vld [vmem:[#allocation35_spill] sm:$0xff] }
 0x1ce   : > { %v5202_v35 = vadd.f32 %v1843_v33, %v881_v23  ;;  %v1838_v7 = vadd.f32 %v1837_v56, %v5078_v51 }
 0x1cf   : > { %v3399_v43 = vpop.f32.mrf.mxu0  ;;  %v5205_v13 = vpop.f32.mrf.mxu1 }
 0x1d0   : > { %v5210_v55 = vadd.f32 %v1838_v7, %v880_v3  ;;  %v1853_v2 = vadd.f32 %v3399_v43, %v5096_v12  ;;  %v1713_v12 = vadd.f32 %v5068_v53, %v4897_v40  ;;  %v5416_v40 = vld [vmem:[#allocation2_spill] sm:$0xff]  ;;  %v5420_v3 = vld [vmem:[#allocation11_spill] sm:$0xff] }
 0x1d1   : > { %v1847_v28 = vpop.f32.mrf.mxu0  ;;  %v2382_v10 = vpop.f32.mrf.mxu1  ;;  %v854_v53 = vadd.f32 %v5113_v32, %v5416_v40  ;;  %v1718_v7 = vadd.f32 %v5421_v47, %v5420_v3  ;;  %v5428_v40 = vld [vmem:[#allocation5_spill] sm:$0xff]  ;;  %v5432_v3 = vld [vmem:[#allocation19_spill] sm:$0xff]  ;;  %v5433_v47 = vld [vmem:[#allocation36_spill] sm:$0xff] }
 0x1d2   : > { %v5216_v51 = vadd.f32 %v1853_v2, %v883_v57  ;;  %v1848_v1 = vadd.f32 %v1847_v28, %v5090_v11  ;;  %v1708_v11 = vadd.f32 %v5070_v45, %v4880_v63  ;;  %v1867_v46 = vadd.f32 %v1713_v12, %v855_v59  ;;  %v5419_v63 = vld [vmem:[#allocation4_spill] sm:$0xff]  ;;  %v5425_v12 = vld [vmem:[#allocation6_spill] sm:$0xff] }
 0x1d3   : > { %v3402_v20 = vpop.f32.mrf.mxu0  ;;  %v5219_v39 = vpop.f32.mrf.mxu1  ;;  %v857_v45 = vadd.f32 %v5113_v32, %v5419_v63 }
 0x1d4   : > { %v5224_v60 = vadd.f32 %v1848_v1, %v882_v18  ;;  %v1863_v54 = vadd.f32 %v3402_v20, %v5115_v15  ;;  %v1866_v14 = vadd.f32 %v1708_v11, %v854_v53  ;;  %v5423_v18 = vld [vmem:[#allocation17_spill] sm:$0xff]  ;;  %v858_v53 = vadd.f32 %v5113_v32, %v5428_v40 }
 0x1d5   : > { %v1857_v19 = vpop.f32.mrf.mxu0  ;;  %v2387_v41 = vpop.f32.mrf.mxu1  ;;  %v1869_v10 = vadd.f32 %v1723_v27, %v857_v45  ;;  %v1733_v1 = vadd.f32 %v5424_v26, %v5423_v18  ;;  %v1743_v27 = vadd.f32 %v5430_v62, %v5429_v8  ;;  %v5431_v45 = vld [vmem:[#allocation8_spill] sm:$0xff]  ;;  %v5436_v26 = vld [vmem:[#allocation37_spill] sm:$0xff]  ;;  %v5442_v8 = vld [vmem:[#allocation39_spill] sm:$0xff] }
 0x1d6   : > { %v5232_v6 = vadd.f32 %v1863_v54, %v885_v16  ;;  %v1858_v17 = vadd.f32 %v1857_v19, %v5415_v44  ;;  %v859_v54 = vadd.f32 %v5113_v32, %v5425_v12  ;;  %v5426_v41 = vld [vmem:[#allocation15_spill] sm:$0xff]  ;;  %v5435_v18 = vld [vmem:[#allocation24_spill] sm:$0xff]  ;;  %v5437_v12 = vld [vmem:[#allocation10_spill] sm:$0xff] }
 0x1d7   : > { %v5238_v42 = vpop.f32.mrf.mxu1  ;;  %v3437_v15 = vpop.f32.mrf.mxu0 }
 0x1d8   : > { %v5242_v23 = vadd.f32 %v1858_v17, %v884_v24  ;;  %v2581_v61 = vadd.f32 %v3437_v15, %v5137_v52  ;;  %v5422_v52 = vld [vmem:[#allocation3_spill] sm:$0xff]  ;;  %v5427_v24 = vld [vmem:[#allocation34_spill] sm:$0xff] }
 0x1d9   : > { %v2392_v33 = vpop.f32.mrf.mxu1  ;;  %v2575_v56 = vpop.f32.mrf.mxu0  ;;  %v856_v48 = vadd.f32 %v5113_v32, %v5422_v52  ;;  %v1728_v11 = vadd.f32 %v5427_v24, %v5426_v41  ;;  %v5434_v52 = vld [vmem:[#allocation7_spill] sm:$0xff]  ;;  %v5439_v41 = vld [vmem:[#allocation38_spill] sm:$0xff] }
 0x1da   : > { %v2735_v43 = vadd.f32 %v2581_v61, %v1867_v46  ;;  %v2576_v57 = vadd.f32 %v2575_v56, %v5125_v22  ;;  %v861_v33 = vadd.f32 %v5113_v32, %v5431_v45 }
 0x1db   : > { %v2395_v2 = vpop.f32.mrf.mxu1  ;;  %v3440_v28 = vpop.f32.mrf.mxu0  ;;  %v1868_v22 = vadd.f32 %v1718_v7, %v856_v48  ;;  %v1738_v7 = vadd.f32 %v5433_v47, %v5432_v3  ;;  %v860_v48 = vadd.f32 %v5113_v32, %v5434_v52 }
 0x1dc   : > { %2767 = vst [vmem:[%s5250_s12 + $0x8] sm:$0xff] %v2735_v43  ;;  %v2734_v20 = vadd.f32 %v2576_v57, %v1866_v14  ;;  %v2591_v16 = vadd.f32 %v3440_v28, %v5163_v38  ;;  %v1871_v38 = vadd.f32 %v1733_v1, %v859_v54  ;;  %v1753_v1 = vadd.f32 %v5436_v26, %v5435_v18 }
 0x1dd   : > { %v2397_v59 = vpop.f32.mrf.mxu1  ;;  %v2585_v19 = vpop.f32.mrf.mxu0  ;;  %v863_v54 = vadd.f32 %v5113_v32, %v5437_v12 }
 0x1de   : > { %2766 = vst [vmem:[%s5250_s12] sm:$0xff] %v2734_v20  ;;  %v2737_v44 = vadd.f32 %v2591_v16, %v1869_v10  ;;  %v2586_v17 = vadd.f32 %v2585_v19, %v5149_v31  ;;  %v1870_v31 = vadd.f32 %v1728_v11, %v858_v53 }
 0x1df   : > { %v2400_v15 = vpop.f32.mrf.mxu1  ;;  %v3443_v46 = vpop.f32.mrf.mxu0 }
 0x1e0   : > { %2769 = vst [vmem:[%s5250_s12 + $0x18] sm:$0xff] %v2737_v44  ;;  %v2736_v61 = vadd.f32 %v2586_v17, %v1868_v22  ;;  %v2601_v63 = vadd.f32 %v3443_v46, %v5191_v29  ;;  %v1873_v29 = vadd.f32 %v1743_v27, %v861_v33  ;;  %v5438_v22 = vld [vmem:[#allocation22_spill] sm:$0xff]  ;;  %v5440_v17 = vld [vmem:[#allocation9_spill] sm:$0xff] }
 0x1e1   : > { %v2402_v56 = vpop.f32.mrf.mxu1  ;;  %v2595_v14 = vpop.f32.mrf.mxu0  ;;  %v1748_v24 = vadd.f32 %v5439_v41, %v5438_v22  ;;  %v862_v40 = vadd.f32 %v5113_v32, %v5440_v17 }
 0x1e2   : > { %2768 = vst [vmem:[%s5250_s12 + $0x10] sm:$0xff] %v2736_v61  ;;  %v2739_v43 = vadd.f32 %v2601_v63, %v1871_v38  ;;  %v2596_v57 = vadd.f32 %v2595_v14, %v5177_v21  ;;  %v1872_v21 = vadd.f32 %v1738_v7, %v860_v48  ;;  %v5441_v38 = vld [vmem:[#allocation26_spill] sm:$0xff] }
 0x1e3   : > { %v2405_v28 = vpop.f32.mrf.mxu1  ;;  %v3446_v10 = vpop.f32.mrf.mxu0  ;;  %v1763_v62 = vadd.f32 %v5442_v8, %v5441_v38  ;;  %v5443_v63 = vld [vmem:[#allocation14_spill] sm:$0xff]  ;;  %v1874_v14 = vadd.f32 %v1748_v24, %v862_v40 }
 0x1e4   : > { %2771 = vst [vmem:[%s5250_s12 + $0x28] sm:$0xff] %v2739_v43  ;;  %v2738_v20 = vadd.f32 %v2596_v57, %v1870_v31  ;;  %v2611_v16 = vadd.f32 %v3446_v10, %v5219_v39  ;;  %v1875_v39 = vadd.f32 %v1753_v1, %v863_v54  ;;  %v865_v45 = vadd.f32 %v5113_v32, %v5443_v63  ;;  %v5445_v31 = vld [vmem:[#allocation40_spill] sm:$0xff] }
 0x1e5   : > { %v2407_v59 = vpop.f32.mrf.mxu1  ;;  %v2605_v19 = vpop.f32.mrf.mxu0  ;;  %v5446_v43 = vld [vmem:[#allocation12_spill] sm:$0xff] }
 0x1e6   : > { %2770 = vst [vmem:[%s5250_s12 + $0x20] sm:$0xff] %v2738_v20  ;;  %v2741_v11 = vadd.f32 %v2611_v16, %v1873_v29  ;;  %v2606_v44 = vadd.f32 %v2605_v19, %v5205_v13  ;;  %v5444_v13 = vld [vmem:[#allocation25_spill] sm:$0xff]  ;;  %v864_v57 = vadd.f32 %v5113_v32, %v5446_v43  ;;  %v5447_v10 = vld [vmem:[#allocation28_spill] sm:$0xff]  ;;  %v5448_v29 = vld [vmem:[#allocation42_spill] sm:$0xff] }
 0x1e7   : > { %v2410_v53 = vpop.f32.mrf.mxu1  ;;  %v3449_v46 = vpop.f32.mrf.mxu0  ;;  %v1758_v3 = vadd.f32 %v5445_v31, %v5444_v13  ;;  %v1773_v18 = vadd.f32 %v5448_v29, %v5447_v10  ;;  %v5449_v20 = vld [vmem:[#allocation18_spill] sm:$0xff]  ;;  %v5451_v19 = vld [vmem:[#allocation43_spill] sm:$0xff] }
 0x1e8   : > { %2773 = vst [vmem:[%s5250_s12 + $0x38] sm:$0xff] %v2741_v11  ;;  %v2740_v27 = vadd.f32 %v2606_v44, %v1872_v21  ;;  %v2621_v61 = vadd.f32 %v3449_v46, %v2395_v2  ;;  %v1877_v2 = vadd.f32 %v1763_v62, %v865_v45  ;;  %v867_v16 = vadd.f32 %v5113_v32, %v5449_v20  ;;  %v5452_v44 = vld [vmem:[#allocation16_spill] sm:$0xff]  ;;  %v5453_v62 = vld [vmem:[#allocation29_spill] sm:$0xff] }
 0x1e9   : > { %v2412_v33 = vpop.f32.mrf.mxu1  ;;  %v2615_v56 = vpop.f32.mrf.mxu0  ;;  %v1876_v59 = vadd.f32 %v1758_v3, %v864_v57  ;;  %v866_v17 = vadd.f32 %v5113_v32, %v5452_v44 }
 0x1ea   : > { %2772 = vst [vmem:[%s5250_s12 + $0x30] sm:$0xff] %v2740_v27  ;;  %v2743_v47 = vadd.f32 %v2621_v61, %v1875_v39  ;;  %v2616_v7 = vadd.f32 %v2615_v56, %v5238_v42  ;;  %v5450_v42 = vld [vmem:[#allocation27_spill] sm:$0xff]  ;;  %v1778_v27 = vadd.f32 %v5121_v50, %v5453_v62  ;;  %v5454_v33 = vld [vmem:[#allocation20_spill] sm:$0xff] }
 0x1eb   : > { %v2415_v52 = vpop.f32.mrf.mxu1  ;;  %v3452_v48 = vpop.f32.mrf.mxu0  ;;  %v1768_v21 = vadd.f32 %v5451_v19, %v5450_v42  ;;  %v868_v56 = vadd.f32 %v5113_v32, %v5454_v33 }
 0x1ec   : > { %2775 = vst [vmem:[%s5250_s12 + $0x48] sm:$0xff] %v2743_v47  ;;  %v2742_v26 = vadd.f32 %v2616_v7, %v1874_v14  ;;  %v2631_v1 = vadd.f32 %v3452_v48, %v2405_v28  ;;  %v1879_v28 = vadd.f32 %v1773_v18, %v867_v16  ;;  %v5455_v7 = vld [vmem:[#allocation30_spill] sm:$0xff]  ;;  %v5456_v48 = vld [vmem:[#allocation23_spill] sm:$0xff] }
 0x1ed   : > { %v2417_v12 = vpop.f32.mrf.mxu1  ;;  %v2625_v54 = vpop.f32.mrf.mxu0  ;;  %v1878_v8 = vadd.f32 %v1768_v21, %v866_v17  ;;  %v1880_v47 = vadd.f32 %v1778_v27, %v868_v56  ;;  %v1788_v43 = vadd.f32 %v5131_v30, %v5455_v7 }
 0x1ee   : > { %2774 = vst [vmem:[%s5250_s12 + $0x40] sm:$0xff] %v2742_v26  ;;  %v2745_v22 = vadd.f32 %v2631_v1, %v1877_v2  ;;  %v2626_v41 = vadd.f32 %v2625_v54, %v2400_v15  ;;  %v870_v2 = vadd.f32 %v5113_v32, %v5456_v48 }
 0x1ef   : > { %v2420_v24 = vpop.f32.mrf.mxu1  ;;  %v3455_v11 = vpop.f32.mrf.mxu0 }
 0x1f0   : > { %2777 = vst [vmem:[%s5250_s12 + $0x58] sm:$0xff] %v2745_v22  ;;  %v2744_v40 = vadd.f32 %v2626_v41, %v1876_v59  ;;  %v2641_v46 = vadd.f32 %v3455_v11, %v2415_v52  ;;  %v1882_v26 = vadd.f32 %v1788_v43, %v870_v2 }
 0x1f1   : > { %v2422_v39 = vpop.f32.mrf.mxu1  ;;  %v2635_v38 = vpop.f32.mrf.mxu0 }
 0x1f2   : > { %2776 = vst [vmem:[%s5250_s12 + $0x50] sm:$0xff] %v2744_v40  ;;  %v2747_v61 = vadd.f32 %v2641_v46, %v1879_v28  ;;  %v2636_v15 = vadd.f32 %v2635_v38, %v2410_v53 }
 0x1f3   : > { %v2425_v63 = vpop.f32.mrf.mxu1  ;;  %v3458_v45 = vpop.f32.mrf.mxu0 }
 0x1f4   : > { %2779 = vst [vmem:[%s5250_s12 + $0x68] sm:$0xff] %v2747_v61  ;;  %v2746_v14 = vadd.f32 %v2636_v15, %v1878_v8  ;;  %v2651_v13 = vadd.f32 %v3458_v45, %v2425_v63 }
 0x1f5   : > { %v2427_v31 = vpop.f32.mrf.mxu1  ;;  %v2645_v3 = vpop.f32.mrf.mxu0 }
 0x1f6   : > { %2778 = vst [vmem:[%s5250_s12 + $0x60] sm:$0xff] %v2746_v14  ;;  %v2749_v50 = vadd.f32 %v2651_v13, %v5123_v37  ;;  %v2646_v53 = vadd.f32 %v2645_v3, %v2420_v24 }
 0x1f7   : > { %v2430_v57 = vpop.f32.mrf.mxu1  ;;  %v3461_v52 = vpop.f32.mrf.mxu0 }
 0x1f8   : > { %2781 = vst [vmem:[%s5250_s12 + $0x78] sm:$0xff] %v2749_v50  ;;  %v2748_v10 = vadd.f32 %v2646_v53, %v1880_v47 }
 0x1f9   : > { %v2432_v29 = vpop.f32.mrf.mxu1  ;;  %v2655_v18 = vpop.f32.mrf.mxu0 }
 0x1fa   : > { %2780 = vst [vmem:[%s5250_s12 + $0x70] sm:$0xff] %v2748_v10  ;;  %v2656_v1 = vadd.f32 %v2655_v18, %v2430_v57 }
 0x1fb   : > { %v2435_v30 = vpop.f32.mrf.mxu1  ;;  %v3464_v20 = vpop.f32.mrf.mxu0 }
 0x1fc   : > { %v2750_v16 = vadd.f32 %v2656_v1, %v1882_v26  ;;  %v2661_v37 = vadd.f32 %v3461_v52, %v2435_v30 }
 0x1fd   : > { %v2437_v12 = vpop.f32.mrf.mxu1  ;;  %v2665_v54 = vpop.f32.mrf.mxu0 }
 0x1fe   : > { %2782 = vst [vmem:[%s5250_s12 + $0x80] sm:$0xff] %v2750_v16  ;;  %v2751_v59 = vadd.f32 %v2661_v37, %v5135_v25 }
 0x1ff   : > { %v2440_v32 = vpop.f32.mrf.mxu1  ;;  %v3467_v21 = vpop.f32.mrf.mxu0 }
 0x200   : > { %2783 = vst [vmem:[%s5250_s12 + $0x88] sm:$0xff] %v2751_v59  ;;  %v2666_v42 = vadd.f32 %v2665_v54, %v2440_v32 }
 0x201   : > { %v2442_v19 = vpop.f32.mrf.mxu1  ;;  %v2675_v44 = vpop.f32.mrf.mxu0 }
 0x202   : > { %v2752_v22 = vadd.f32 %v2666_v42, %v5154_v4 }
 0x203   : > { %v2445_v41 = vpop.f32.mrf.mxu1  ;;  %v3470_v46 = vpop.f32.mrf.mxu0 }
 0x204   : > { %2784 = vst [vmem:[%s5250_s12 + $0x90] sm:$0xff] %v2752_v22  ;;  %v2671_v24 = vadd.f32 %v3464_v20, %v2445_v41 }
 0x205   : > { %v2447_v11 = vpop.f32.mrf.mxu1  ;;  %v2685_v62 = vpop.f32.mrf.mxu0 }
 0x206   : > { %v2753_v17 = vadd.f32 %v2671_v24, %v5146_v36 }
 0x207   : > { %v2450_v28 = vpop.f32.mrf.mxu1  ;;  %v3473_v63 = vpop.f32.mrf.mxu0 }
 0x208   : > { %2785 = vst [vmem:[%s5250_s12 + $0x98] sm:$0xff] %v2753_v17  ;;  %v2676_v40 = vadd.f32 %v2675_v44, %v2450_v28 }
 0x209   : > { %v2452_v25 = vpop.f32.mrf.mxu1  ;;  %v2695_v14 = vpop.f32.mrf.mxu0 }
 0x20a   : > { %v2754_v39 = vadd.f32 %v2676_v40, %v5168_v49 }
 0x20b   : > { %v2455_v38 = vpop.f32.mrf.mxu1  ;;  %v3476_v47 = vpop.f32.mrf.mxu0 }
 0x20c   : > { %2786 = vst [vmem:[%s5250_s12 + $0xa0] sm:$0xff] %v2754_v39  ;;  %v2681_v8 = vadd.f32 %v3467_v21, %v2455_v38 }
 0x20d   : > { %v2457_v4 = vpop.f32.mrf.mxu1  ;;  %v2705_v53 = vpop.f32.mrf.mxu0 }
 0x20e   : > { %v2755_v27 = vadd.f32 %v2681_v8, %v5160_v58 }
 0x20f   : > { %v2460_v61 = vpop.f32.mrf.mxu1  ;;  %v3479_v2 = vpop.f32.mrf.mxu0 }
 0x210   : > { %2787 = vst [vmem:[%s5250_s12 + $0xa8] sm:$0xff] %v2755_v27  ;;  %v2686_v15 = vadd.f32 %v2685_v62, %v2460_v61 }
 0x211   : > { %v2462_v36 = vpop.f32.mrf.mxu1  ;;  %v2715_v26 = vpop.f32.mrf.mxu0 }
 0x212   : > { %v2756_v45 = vadd.f32 %v2686_v15, %v5182_v0 }
 0x213   : > { %v2465_v33 = vpop.f32.mrf.mxu1  ;;  %v3482_v16 = vpop.f32.mrf.mxu0 }
 0x214   : > { %2788 = vst [vmem:[%s5250_s12 + $0xb0] sm:$0xff] %v2756_v45  ;;  %v2691_v56 = vadd.f32 %v3470_v46, %v2465_v33 }
 0x215   : > { %v2467_v49 = vpop.f32.mrf.mxu1  ;;  %v2725_v59 = vpop.f32.mrf.mxu0 }
 0x216   : > { %v2757_v13 = vadd.f32 %v2691_v56, %v5174_v34 }
 0x217   : > { %v2470_v31 = vpop.f32.mrf.mxu1 }
 0x218   : > { %2789 = vst [vmem:[%s5250_s12 + $0xb8] sm:$0xff] %v2757_v13  ;;  %v2696_v3 = vadd.f32 %v2695_v14, %v2470_v31 }
 0x219   : > { %v2472_v58 = vpop.f32.mrf.mxu1 }
 0x21a   : > { %v2758_v7 = vadd.f32 %v2696_v3, %v5196_v5 }
 0x21b   : > { %v2475_v43 = vpop.f32.mrf.mxu1 }
 0x21c   : > { %2790 = vst [vmem:[%s5250_s12 + $0xc0] sm:$0xff] %v2758_v7  ;;  %v2701_v50 = vadd.f32 %v3473_v63, %v2475_v43 }
 0x21d   : > { %v2477_v0 = vpop.f32.mrf.mxu1 }
 0x21e   : > { %v2759_v57 = vadd.f32 %v2701_v50, %v5188_v9 }
 0x21f   : > { %v2480_v52 = vpop.f32.mrf.mxu1 }
 0x220   : > { %2791 = vst [vmem:[%s5250_s12 + $0xc8] sm:$0xff] %v2759_v57  ;;  %v2706_v48 = vadd.f32 %v2705_v53, %v2480_v52 }
 0x221   : > { %v2482_v34 = vpop.f32.mrf.mxu1 }
 0x222   : > { %v2760_v10 = vadd.f32 %v2706_v48, %v5210_v55 }
 0x223   : > { %v2485_v29 = vpop.f32.mrf.mxu1 }
 0x224   : > { %2792 = vst [vmem:[%s5250_s12 + $0xd0] sm:$0xff] %v2760_v10  ;;  %v2711_v18 = vadd.f32 %v3476_v47, %v2485_v29 }
 0x225   : > { %v2487_v5 = vpop.f32.mrf.mxu1 }
 0x226   : > { %v2761_v1 = vadd.f32 %v2711_v18, %v5202_v35 }
 0x227   : > { %v2490_v30 = vpop.f32.mrf.mxu1 }
 0x228   : > { %2793 = vst [vmem:[%s5250_s12 + $0xd8] sm:$0xff] %v2761_v1  ;;  %v2716_v20 = vadd.f32 %v2715_v26, %v2490_v30 }
 0x229   : > { %v2492_v9 = vpop.f32.mrf.mxu1 }
 0x22a   : > { %v2762_v37 = vadd.f32 %v2716_v20, %v5224_v60 }
 0x22b   : > { %v2495_v12 = vpop.f32.mrf.mxu1 }
 0x22c   : > { %2794 = vst [vmem:[%s5250_s12 + $0xe0] sm:$0xff] %v2762_v37  ;;  %v2721_v55 = vadd.f32 %v3479_v2, %v2495_v12 }
 0x22d   : > { %v2497_v54 = vpop.f32.mrf.mxu1 }
 0x22e   : > { %v2763_v32 = vadd.f32 %v2721_v55, %v5216_v51 }
 0x22f   : > { %v2500_v42 = vpop.f32.mrf.mxu1 }
 0x230   : > { %2795 = vst [vmem:[%s5250_s12 + $0xe8] sm:$0xff] %v2763_v32  ;;  %v2726_v19 = vadd.f32 %v2725_v59, %v2500_v42 }
 0x231   : > { %v2502_v35 = vpop.f32.mrf.mxu1 }
 0x232   : > { %v2764_v21 = vadd.f32 %v2726_v19, %v5242_v23 }
 0x233   : > { %v2505_v22 = vpop.f32.mrf.mxu1 }
 0x234   : > { %2796 = vst [vmem:[%s5250_s12 + $0xf0] sm:$0xff] %v2764_v21  ;;  %v2731_v41 = vadd.f32 %v3482_v16, %v2505_v22 }
 0x235   : > { %v2507_v24 = vpop.f32.mrf.mxu1 }
 0x236   : > { %v2765_v60 = vadd.f32 %v2731_v41, %v5232_v6 }
 0x238   : > { %2797 = vst [vmem:[%s5250_s12 + $0xf8] sm:$0xff] %v2765_v60 }
 0x239 PF: > { %s13_s14 = sadd.s32 1, %s3561_s14   ;;  %s5457_s12 = smov %s3557_s13 }
 0x23a   : > { %p10_p5 = scmp.ge.s32.totalorder %s13_s14, 4   ;;  %s5458_s13 = smov %s5460_s15 }
 0x23c   :  { %12 = sbr.rel (!%p10_p5) target bundleno = 2 (0x2), region = 67 }

</bundles_post_ra>
